<compile_context>
chip_gen: v5e
topology: v5e:2x2
jax: 0.10.0
libtpu: 0.0.40
codegen_flags: <defaults>
</compile_context>

<pallas_src>
import functools

import jax
import jax.numpy as jnp
from jax.experimental import pallas as pl
from jax.experimental.pallas import tpu as pltpu


def _sage_appnp_kernel(a_ref, x_ref, coef_ref, pool_ref, wlr_ref, b_ref,
                       wlin_ref, blin_ref, out_ref,
                       xw_ref, y_ref, ah_ref, z0_ref, z1_ref, *, K, alpha):
    phase = pl.program_id(0)          # 0 = projection + SAGE stage, 1..K = APPNP power steps
    blk = pl.program_id(1)            # row block of the propagation operator
    TM = a_ref.shape[0]
    H = y_ref.shape[1]
    row0 = pl.multiple_of(blk * TM, TM)

    # ---- phase 0, block 0: ONE fused projection x @ [W_l' | W_r'] (BatchNorm folded in). ----
    @pl.when(jnp.logical_and(phase == 0, blk == 0))
    def _():
        xw = jnp.dot(x_ref[...], wlr_ref[...], preferred_element_type=jnp.float32)  # (Np, 2H)
        xw_ref[...] = xw
        d_sqrt = coef_ref[...][:, 1:2]                                               # (Np, 1)
        y_ref[...] = (d_sqrt * xw[:, :H]).astype(jnp.bfloat16)                       # matmul RHS

    # ---- phase 0, every block: SAGE mean aggregation + folded-BN bias + ReLU; init z0, ah. ----
    @pl.when(phase == 0)
    def _():
        nbr = jnp.dot(a_ref[...], y_ref[...], preferred_element_type=jnp.float32)    # (TM, H)
        c = coef_ref[pl.ds(row0, TM), :]                                             # (TM, 3)
        xw_blk = xw_ref[pl.ds(row0, TM), :]                                          # (TM, 2H)
        h = jnp.maximum(c[:, 0:1] * nbr - c[:, 2:3] * xw_blk[:, :H]
                        + xw_blk[:, H:] + b_ref[...], 0.0)
        # Dropout: identity in eval mode.
        # TODO(synk): training-mode dropout (p=0.6) would need pltpu.prng_random_bits.
        z0_ref[pl.ds(row0, TM), :] = h.astype(jnp.bfloat16)
        ah_ref[pl.ds(row0, TM), :] = alpha * h

    # ---- phases 1..K: z_{k+1}[blk] = A_s[blk, :] @ z_k + alpha*h[blk]  (ping-pong z buffers). ----
    def appnp_step(z_src_ref, z_dst_ref):
        znew = (jnp.dot(a_ref[...], z_src_ref[...], preferred_element_type=jnp.float32)
                + ah_ref[pl.ds(row0, TM), :])
        z_dst_ref[pl.ds(row0, TM), :] = znew.astype(jnp.bfloat16)

    @pl.when(jnp.logical_and(phase >= 1, phase % 2 == 1))
    def _():
        appnp_step(z0_ref, z1_ref)     # odd phases read z0 -> write z1

    @pl.when(jnp.logical_and(phase >= 1, phase % 2 == 0))
    def _():
        appnp_step(z1_ref, z0_ref)     # even phases (>=2) read z1 -> write z0

    # ---- final grid step: global_mean_pool + linear head (lane-padded output). ----
    @pl.when(jnp.logical_and(phase == K, blk == pl.num_programs(1) - 1))
    def _():
        z_fin = (z0_ref if (K % 2 == 0) else z1_ref)[...]                            # static slot
        pooled = jnp.dot(pool_ref[...], z_fin, preferred_element_type=jnp.float32)   # (B, H)
        out_ref[...] = (jnp.dot(pooled.astype(jnp.bfloat16), wlin_ref[...],
                                preferred_element_type=jnp.float32) + blin_ref[...])


def _vmem_capacity_bytes():
    try:
        return int(pltpu.get_tpu_info().vmem_capacity_bytes)
    except Exception:
        return 64 << 20   # conservative floor (v7x per-core VMEM)


def sage_appnp_forward(x, edge_index, batch, params, num_graphs,
                       K=10, alpha=0.1, eps=1e-5, tm=None):
    """Build dense normalized operators (trace-time JAX), fold BN/alpha constants, run the kernel."""
    N, Fin = x.shape
    H = params["wl"].shape[1]
    Np = ((N + 127) // 128) * 128      # pad node count so row blocks are (8,128)-friendly

    src, dst = edge_index[0], edge_index[1]
    ones = jnp.ones(src.shape[0], jnp.float32)

    # Dense adjacency (messages src -> dst; duplicate edges counted with multiplicity, as in PyG).
    A = jnp.zeros((Np, Np), jnp.float32).at[dst, src].add(ones)
    deg_in = A.sum(axis=1)
    inv_deg = 1.0 / jnp.maximum(deg_in, 1.0)                        # SAGE mean normalization

    # GCN-normalized operator with self-loops (APPNP propagation). Padded rows only get the
    # self-loop (d = 1), stay isolated from real rows, and are masked out by the pool operator.
    A_hat = A + jnp.eye(Np, dtype=jnp.float32)
    d = A_hat.sum(axis=1)
    d_inv_sqrt = jax.lax.rsqrt(d)
    A_gcn = d_inv_sqrt[:, None] * A_hat * d_inv_sqrt[None, :]

    # Single resident/streamed (N,N) operator, pre-scaled by (1-alpha), bf16 for the MXU.
    A_s = ((1.0 - alpha) * A_gcn).astype(jnp.bfloat16)
    d_sqrt = jnp.sqrt(d)
    scale_l = inv_deg * d_sqrt / (1.0 - alpha)
    # Exact self-loop cancellation against the *quantized* diagonal of A_s; genuine self-loops of
    # the original graph are re-added at f32 precision.
    inv_deg_eff = (scale_l * jnp.diagonal(A_s).astype(jnp.float32) * d_sqrt
                   - inv_deg * jnp.diagonal(A))
    coef = jnp.stack([scale_l, d_sqrt, inv_deg_eff], axis=1).astype(jnp.float32)   # (Np, 3)

    # global_mean_pool operator: (num_graphs, Np), bf16 so pooling is a single-pass MXU matmul.
    onehot = jax.nn.one_hot(batch, num_graphs, dtype=jnp.float32).T                # (G, N)
    pool = onehot / jnp.maximum(onehot.sum(axis=1, keepdims=True), 1.0)
    pool_p = jnp.zeros((num_graphs, Np), jnp.float32).at[:, :N].set(pool).astype(jnp.bfloat16)

    # Fold BatchNorm (eval: running stats) into the SAGE linears, fuse [W_l' | W_r'].
    s = params["gamma"] * jax.lax.rsqrt(params["rvar"] + eps)                       # (1, H)
    wlr = jnp.concatenate([params["wl"] * s, params["wr"] * s], axis=1).astype(jnp.bfloat16)
    b = ((params["bl"] - params["rmean"]) * s + params["beta"]).astype(jnp.float32)  # (1, H)

    out_ch = params["wlin"].shape[1]
    out_pad = ((out_ch + 127) // 128) * 128                                         # lane-dense output
    wlin = (jnp.zeros((H, out_pad), jnp.float32).at[:, :out_ch]
            .set(params["wlin"]).astype(jnp.bfloat16))
    blin = jnp.zeros((1, out_pad), jnp.float32).at[:, :out_ch].set(params["blin"])

    x_p = jnp.zeros((Np, Fin), jnp.float32).at[:N].set(x).astype(jnp.bfloat16)

    # --- device-aware row-block size and VMEM budget ---
    vmem_cap = _vmem_capacity_bytes()
    if tm is None:
        # Keep the whole operator resident (single row block, DMA'd once) while it fits
        # comfortably; otherwise stream 128-row blocks (pipelined, scales past the VMEM ceiling).
        tm = Np if 2 * Np * Np * 2 <= int(0.35 * vmem_cap) else 128
    TM = min(int(tm), Np)
    assert Np % TM == 0, "row-block size must divide the padded node count"
    NB = Np // TM
    B = num_graphs

    resident = (x_p, coef, pool_p, wlr, b, wlin, blin)
    resident_bytes = sum(int(o.size) * o.dtype.itemsize for o in resident)
    a_block_bytes = TM * Np * 2
    scratch_bytes = (Np * 2 * H * 4) + (Np * H * 2) + (Np * H * 4) + 2 * (Np * H * 2)
    need = 2 * (resident_bytes + a_block_bytes) + scratch_bytes + 2 * B * out_pad * 4
    vmem_limit = int(min(int(0.8 * vmem_cap), max(32 << 20, 2 * need)))

    cmap = lambda k, i: (0, 0)   # constant index map: resident across the whole grid
    grid_spec = pltpu.PrefetchScalarGridSpec(
        num_scalar_prefetch=0,
        grid=(K + 1, NB),
        in_specs=[
            pl.BlockSpec((TM, Np), lambda k, i: (i, 0)),   # (1-alpha)*A_gcn rows, streamed
            pl.BlockSpec((Np, Fin), cmap),                 # node features (bf16)
            pl.BlockSpec((Np, 3), cmap),                   # packed per-node coefficients
            pl.BlockSpec((B, Np), cmap),                   # mean-pool operator (bf16)
            pl.BlockSpec((Fin, 2 * H), cmap),              # fused [W_l' | W_r'] (bf16)
            pl.BlockSpec((1, H), cmap),                    # folded BN/SAGE bias
            pl.BlockSpec((H, out_pad), cmap),              # head weight (bf16, lane-padded)
            pl.BlockSpec((1, out_pad), cmap),              # head bias
        ],
        out_specs=pl.BlockSpec((B, out_pad), cmap),
        scratch_shapes=[
            pltpu.VMEM((Np, 2 * H), jnp.float32),          # xw = x @ [W_l'|W_r']
            pltpu.VMEM((Np, H), jnp.bfloat16),             # y  = d_sqrt * xw_l (matmul RHS)
            pltpu.VMEM((Np, H), jnp.float32),              # alpha * h
            pltpu.VMEM((Np, H), jnp.bfloat16),             # z ping
            pltpu.VMEM((Np, H), jnp.bfloat16),             # z pong
        ],
    )

    kernel = functools.partial(_sage_appnp_kernel, K=K, alpha=alpha)
    out_padded = pl.pallas_call(
        kernel,
        out_shape=jax.ShapeDtypeStruct((B, out_pad), jnp.float32),
        grid_spec=grid_spec,
        compiler_params=pltpu.CompilerParams(
            # TODO(synk): row-block axis shares the z scratch -> must stay "arbitrary";
            # v7x 2-TC megacore split would need per-core z replication or CMEM.
            dimension_semantics=("arbitrary", "arbitrary"),
            vmem_limit_bytes=vmem_limit,
        ),
    )(A_s, x_p, coef, pool_p, wlr, b, wlin, blin)

    return out_padded[:, :out_ch]


def reference_forward(x, edge_index, batch, params, num_graphs, K=10, alpha=0.1, eps=1e-5):
    """Pure-JAX f32 reference matching the PyTorch eval-mode forward."""
    N = x.shape[0]
    src, dst = edge_index[0], edge_index[1]
    A = jnp.zeros((N, N), jnp.float32).at[dst, src].add(1.0)
    deg = A.sum(axis=1, keepdims=True)
    A_mean = A / jnp.maximum(deg, 1.0)

    h = A_mean @ x @ params["wl"] + params["bl"] + x @ params["wr"]
    h = (h - params["rmean"]) * jax.lax.rsqrt(params["rvar"] + eps) * params["gamma"] + params["beta"]
    h = jnp.maximum(h, 0.0)

    A_hat = A + jnp.eye(N, dtype=jnp.float32)
    d = A_hat.sum(axis=1)
    di = jax.lax.rsqrt(d)
    A_gcn = di[:, None] * A_hat * di[None, :]
    z = h
    for _ in range(K):
        z = (1.0 - alpha) * (A_gcn @ z) + alpha * h

    onehot = jax.nn.one_hot(batch, num_graphs, dtype=jnp.float32).T
    pool = onehot / jnp.maximum(onehot.sum(axis=1, keepdims=True), 1.0)
    return pool @ z @ params["wlin"] + params["blin"]


def init_params(key, in_channels, hidden_channels, out_channels):
    ks = jax.random.split(key, 6)
    scale_in = 1.0 / jnp.sqrt(jnp.float32(in_channels))
    scale_h = 1.0 / jnp.sqrt(jnp.float32(hidden_channels))
    return dict(
        # SAGEConv: lin_l (aggregated neighbors, with bias), lin_r (root, no bias).
        wl=jax.random.normal(ks[0], (in_channels, hidden_channels), jnp.float32) * scale_in,
        bl=jax.random.normal(ks[1], (1, hidden_channels), jnp.float32) * 0.01,
        wr=jax.random.normal(ks[2], (in_channels, hidden_channels), jnp.float32) * scale_in,
        # BatchNorm (eval): affine params + deterministic "running" stats.
        gamma=jnp.ones((1, hidden_channels), jnp.float32),
        beta=jnp.zeros((1, hidden_channels), jnp.float32),
        rmean=jax.random.normal(ks[3], (1, hidden_channels), jnp.float32) * 0.1,
        rvar=jnp.ones((1, hidden_channels), jnp.float32)
             + 0.1 * jax.random.uniform(ks[4], (1, hidden_channels), jnp.float32),
        # Final Linear.
        wlin=jax.random.normal(ks[5], (hidden_channels, out_channels), jnp.float32) * scale_h,
        blin=jnp.zeros((1, out_channels), jnp.float32),
    )


if __name__ == "__main__":
    # Small, MXU-friendly sizes consistent with the module's graph semantics.
    # NOTE: at this size everything is latency-bound; the streaming/parallel machinery only pays
    # off at N >= 2-4K nodes (see review) -- we just validate both code paths here.
    N = 256             # nodes
    E = 1024            # edges
    IN_CH = 256
    HID_CH = 128
    OUT_CH = 2
    NUM_GRAPHS = 4
    K, ALPHA = 10, 0.1

    key = jax.random.PRNGKey(0)
    k_x, k_e, k_p = jax.random.split(key, 3)

    x = jax.random.normal(k_x, (N, IN_CH), jnp.float32)
    edge_index = jax.random.randint(k_e, (2, E), 0, N, dtype=jnp.int32)
    batch = jnp.repeat(jnp.arange(NUM_GRAPHS, dtype=jnp.int32), N // NUM_GRAPHS)
    params = init_params(k_p, IN_CH, HID_CH, OUT_CH)

    ref = reference_forward(x, edge_index, batch, params, NUM_GRAPHS, K=K, alpha=ALPHA)

    # (a) resident-operator path (adaptive tm -> single row block at this size).
    out_res = sage_appnp_forward(x, edge_index, batch, params, NUM_GRAPHS, K=K, alpha=ALPHA)
    jax.block_until_ready(out_res)

    # (b) streamed row-block path (tm=128 -> 2 row blocks), exercises the pipelined A_s grid.
    out_str = sage_appnp_forward(x, edge_index, batch, params, NUM_GRAPHS, K=K, alpha=ALPHA, tm=128)
    jax.block_until_ready(out_str)

    for out in (out_res, out_str):
        assert out.shape == (NUM_GRAPHS, OUT_CH)
        assert bool(jnp.all(jnp.isfinite(out)))
        max_err = float(jnp.max(jnp.abs(out - ref)))
        assert max_err < 0.3, f"max abs error vs f32 reference too large: {max_err}"

    print("KERNEL_OK")
</pallas_src>

<mosaic_0001>
module attributes {stable_mosaic.version = 11 : i64} {
  func.func @_sage_appnp_kernel(%arg0: i32, %arg1: i32, %arg2: memref<256x256xbf16, #tpu.memory_space<vmem>>, %arg3: memref<256x256xbf16, #tpu.memory_space<vmem>>, %arg4: memref<256x3xf32, #tpu.memory_space<vmem>>, %arg5: memref<4x256xbf16, #tpu.memory_space<vmem>>, %arg6: memref<256x256xbf16, #tpu.memory_space<vmem>>, %arg7: memref<1x128xf32, #tpu.memory_space<vmem>>, %arg8: memref<128x128xbf16, #tpu.memory_space<vmem>>, %arg9: memref<1x128xf32, #tpu.memory_space<vmem>>, %arg10: memref<4x128xf32, #tpu.memory_space<vmem>>, %arg11: memref<256x256xf32, #tpu.memory_space<vmem>>, %arg12: memref<256x128xbf16, #tpu.memory_space<vmem>>, %arg13: memref<256x128xf32, #tpu.memory_space<vmem>>, %arg14: memref<256x128xbf16, #tpu.memory_space<vmem>>, %arg15: memref<256x128xbf16, #tpu.memory_space<vmem>>) attributes {dimension_semantics = [#tpu.dimension_semantics<arbitrary>, #tpu.dimension_semantics<arbitrary>], iteration_bounds = array<i64: 11, 1>, scalar_prefetch = 0 : i64, scratch_operands = 5 : i64, tpu.core_type = #tpu.core_type<tc>, window_params = [{transform_indices = @transform_0, window_bounds = array<i64: 256, 256>}, {pipeline_mode = #tpu.pipeline_mode<synchronous>, transform_indices = @transform_1, window_bounds = array<i64: 256, 256>}, {pipeline_mode = #tpu.pipeline_mode<synchronous>, transform_indices = @transform_2, window_bounds = array<i64: 256, 3>}, {pipeline_mode = #tpu.pipeline_mode<synchronous>, transform_indices = @transform_3, window_bounds = array<i64: 4, 256>}, {pipeline_mode = #tpu.pipeline_mode<synchronous>, transform_indices = @transform_4, window_bounds = array<i64: 256, 256>}, {pipeline_mode = #tpu.pipeline_mode<synchronous>, transform_indices = @transform_5, window_bounds = array<i64: 1, 128>}, {pipeline_mode = #tpu.pipeline_mode<synchronous>, transform_indices = @transform_6, window_bounds = array<i64: 128, 128>}, {pipeline_mode = #tpu.pipeline_mode<synchronous>, transform_indices = @transform_7, window_bounds = array<i64: 1, 128>}, {pipeline_mode = #tpu.pipeline_mode<synchronous>, transform_indices = @transform_8, window_bounds = array<i64: 4, 128>}]} {
    %c256_i32 = arith.constant 256 : i32
    %0 = arith.muli %arg1, %c256_i32 : i32
    %1 = tpu.assume_multiple %0, 256 : i32
    %c0_i32 = arith.constant 0 : i32
    %2 = arith.cmpi eq, %arg0, %c0_i32 : i32
    %c0_i32_0 = arith.constant 0 : i32
    %3 = arith.cmpi eq, %arg1, %c0_i32_0 : i32
    %4 = arith.andi %2, %3 : i1
    %5 = arith.extui %4 : i1 to i32
    %c0_i32_1 = arith.constant 0 : i32
    %6 = arith.cmpi ne, %5, %c0_i32_1 : i32
    scf.if %6 {
      %c0 = arith.constant 0 : index
      %c0_22 = arith.constant 0 : index
      %45 = vector.load %arg3[%c0, %c0_22] : memref<256x256xbf16, #tpu.memory_space<vmem>>, vector<256x256xbf16>
      %c0_23 = arith.constant 0 : index
      %c0_24 = arith.constant 0 : index
      %46 = vector.load %arg6[%c0_23, %c0_24] : memref<256x256xbf16, #tpu.memory_space<vmem>>, vector<256x256xbf16>
      %cst = arith.constant dense<0.000000e+00> : vector<256x256xf32>
      %47 = tpu.matmul %45, %46, %cst {dimension_numbers = #tpu.dot_dimension_numbers<[1], [0], [0], [1], [0, 0, 1, 1], [], []>} : vector<256x256xbf16>, vector<256x256xbf16>, vector<256x256xf32> -> vector<256x256xf32>
      %c0_25 = arith.constant 0 : index
      %c0_26 = arith.constant 0 : index
      %48 = vector.load %arg11[%c0_25, %c0_26] : memref<256x256xf32, #tpu.memory_space<vmem>>, vector<256x256xf32>
      tpu.vector_store %arg11[%c0_25, %c0_26], %47 {strides = array<i32>} : memref<256x256xf32, #tpu.memory_space<vmem>>, vector<256x256xf32>,
      %c0_27 = arith.constant 0 : index
      %c0_28 = arith.constant 0 : index
      %49 = vector.load %arg4[%c0_27, %c0_28] : memref<256x3xf32, #tpu.memory_space<vmem>>, vector<256x3xf32>
      %50 = vector.extract_strided_slice %49 {offsets = [0, 1], sizes = [256, 1], strides = [1, 1]} : vector<256x3xf32> to vector<256x1xf32>
      %51 = vector.extract_strided_slice %47 {offsets = [0, 0], sizes = [256, 128], strides = [1, 1]} : vector<256x256xf32> to vector<256x128xf32>
      %52 = vector.broadcast %50 : vector<256x1xf32> to vector<256x128xf32>
      %53 = arith.mulf %52, %51 : vector<256x128xf32>
      %54 = arith.truncf %53 : vector<256x128xf32> to vector<256x128xbf16>
      %c0_29 = arith.constant 0 : index
      %c0_30 = arith.constant 0 : index
      %55 = vector.load %arg12[%c0_29, %c0_30] : memref<256x128xbf16, #tpu.memory_space<vmem>>, vector<256x128xbf16>
      tpu.vector_store %arg12[%c0_29, %c0_30], %54 {strides = array<i32>} : memref<256x128xbf16, #tpu.memory_space<vmem>>, vector<256x128xbf16>,
    } else {
    }
    %c0_i32_2 = arith.constant 0 : i32
    %7 = arith.cmpi eq, %arg0, %c0_i32_2 : i32
    %8 = arith.extui %7 : i1 to i32
    %c0_i32_3 = arith.constant 0 : i32
    %9 = arith.cmpi ne, %8, %c0_i32_3 : i32
    scf.if %9 {
      %c0 = arith.constant 0 : index
      %c0_22 = arith.constant 0 : index
      %45 = vector.load %arg2[%c0, %c0_22] : memref<256x256xbf16, #tpu.memory_space<vmem>>, vector<256x256xbf16>
      %c0_23 = arith.constant 0 : index
      %c0_24 = arith.constant 0 : index
      %46 = vector.load %arg12[%c0_23, %c0_24] : memref<256x128xbf16, #tpu.memory_space<vmem>>, vector<256x128xbf16>
      %cst = arith.constant dense<0.000000e+00> : vector<256x128xf32>
      %47 = tpu.matmul %45, %46, %cst {dimension_numbers = #tpu.dot_dimension_numbers<[1], [0], [0], [1], [0, 0, 1, 1], [], []>} : vector<256x256xbf16>, vector<256x128xbf16>, vector<256x128xf32> -> vector<256x128xf32>
      %48 = arith.index_cast %1 : i32 to index
      %c0_25 = arith.constant 0 : index
      %49 = vector.load %arg4[%48, %c0_25] : memref<256x3xf32, #tpu.memory_space<vmem>>, vector<256x3xf32>
      %50 = arith.index_cast %1 : i32 to index
      %c0_26 = arith.constant 0 : index
      %51 = vector.load %arg11[%50, %c0_26] : memref<256x256xf32, #tpu.memory_space<vmem>>, vector<256x256xf32>
      %52 = vector.extract_strided_slice %49 {offsets = [0, 0], sizes = [256, 1], strides = [1, 1]} : vector<256x3xf32> to vector<256x1xf32>
      %53 = vector.broadcast %52 : vector<256x1xf32> to vector<256x128xf32>
      %54 = arith.mulf %53, %47 : vector<256x128xf32>
      %55 = vector.extract_strided_slice %49 {offsets = [0, 2], sizes = [256, 1], strides = [1, 1]} : vector<256x3xf32> to vector<256x1xf32>
      %56 = vector.extract_strided_slice %51 {offsets = [0, 0], sizes = [256, 128], strides = [1, 1]} : vector<256x256xf32> to vector<256x128xf32>
      %57 = vector.broadcast %55 : vector<256x1xf32> to vector<256x128xf32>
      %58 = arith.mulf %57, %56 : vector<256x128xf32>
      %59 = arith.subf %54, %58 : vector<256x128xf32>
      %60 = vector.extract_strided_slice %51 {offsets = [0, 128], sizes = [256, 128], strides = [1, 1]} : vector<256x256xf32> to vector<256x128xf32>
      %61 = arith.addf %59, %60 : vector<256x128xf32>
      %c0_27 = arith.constant 0 : index
      %c0_28 = arith.constant 0 : index
      %62 = vector.load %arg7[%c0_27, %c0_28] : memref<1x128xf32, #tpu.memory_space<vmem>>, vector<1x128xf32>
      %63 = vector.broadcast %62 : vector<1x128xf32> to vector<256x128xf32>
      %64 = arith.addf %61, %63 : vector<256x128xf32>
      %cst_29 = arith.constant 0.000000e+00 : f32
      %65 = vector.broadcast %cst_29 : f32 to vector<256x128xf32>
      %66 = arith.maximumf %64, %65 : vector<256x128xf32>
      %67 = arith.truncf %66 : vector<256x128xf32> to vector<256x128xbf16>
      %68 = arith.index_cast %1 : i32 to index
      %c0_30 = arith.constant 0 : index
      %69 = vector.load %arg14[%68, %c0_30] : memref<256x128xbf16, #tpu.memory_space<vmem>>, vector<256x128xbf16>
      tpu.vector_store %arg14[%68, %c0_30], %67 {strides = array<i32>} : memref<256x128xbf16, #tpu.memory_space<vmem>>, vector<256x128xbf16>,
      %cst_31 = arith.constant 1.000000e-01 : f32
      %70 = vector.broadcast %cst_31 : f32 to vector<256x128xf32>
      %71 = arith.mulf %70, %66 : vector<256x128xf32>
      %72 = arith.index_cast %1 : i32 to index
      %c0_32 = arith.constant 0 : index
      %73 = vector.load %arg13[%72, %c0_32] : memref<256x128xf32, #tpu.memory_space<vmem>>, vector<256x128xf32>
      tpu.vector_store %arg13[%72, %c0_32], %71 {strides = array<i32>} : memref<256x128xf32, #tpu.memory_space<vmem>>, vector<256x128xf32>,
    } else {
    }
    %c1_i32 = arith.constant 1 : i32
    %10 = arith.cmpi sge, %arg0, %c1_i32 : i32
    %c2_i32 = arith.constant 2 : i32
    %c0_i32_4 = arith.constant 0 : i32
    %11 = arith.cmpi eq, %c2_i32, %c0_i32_4 : i32
    %c1_i32_5 = arith.constant 1 : i32
    %12 = arith.select %11, %c1_i32_5, %c2_i32 : i32
    %13 = arith.remsi %arg0, %12 : i32
    %c0_i32_6 = arith.constant 0 : i32
    %14 = arith.cmpi ne, %13, %c0_i32_6 : i32
    %c0_i32_7 = arith.constant 0 : i32
    %15 = arith.cmpi slt, %13, %c0_i32_7 : i32
    %c0_i32_8 = arith.constant 0 : i32
    %16 = arith.cmpi slt, %12, %c0_i32_8 : i32
    %17 = arith.xori %15, %16 : i1
    %18 = arith.andi %17, %14 : i1
    %19 = arith.addi %13, %12 : i32
    %20 = arith.select %18, %19, %13 : i32
    %c1_i32_9 = arith.constant 1 : i32
    %21 = arith.cmpi eq, %20, %c1_i32_9 : i32
    %22 = arith.andi %10, %21 : i1
    %23 = arith.extui %22 : i1 to i32
    %c0_i32_10 = arith.constant 0 : i32
    %24 = arith.cmpi ne, %23, %c0_i32_10 : i32
    scf.if %24 {
      %c0 = arith.constant 0 : index
      %c0_22 = arith.constant 0 : index
      %45 = vector.load %arg2[%c0, %c0_22] : memref<256x256xbf16, #tpu.memory_space<vmem>>, vector<256x256xbf16>
      %c0_23 = arith.constant 0 : index
      %c0_24 = arith.constant 0 : index
      %46 = vector.load %arg14[%c0_23, %c0_24] : memref<256x128xbf16, #tpu.memory_space<vmem>>, vector<256x128xbf16>
      %cst = arith.constant dense<0.000000e+00> : vector<256x128xf32>
      %47 = tpu.matmul %45, %46, %cst {dimension_numbers = #tpu.dot_dimension_numbers<[1], [0], [0], [1], [0, 0, 1, 1], [], []>} : vector<256x256xbf16>, vector<256x128xbf16>, vector<256x128xf32> -> vector<256x128xf32>
      %48 = arith.index_cast %1 : i32 to index
      %c0_25 = arith.constant 0 : index
      %49 = vector.load %arg13[%48, %c0_25] : memref<256x128xf32, #tpu.memory_space<vmem>>, vector<256x128xf32>
      %50 = arith.addf %47, %49 : vector<256x128xf32>
      %51 = arith.truncf %50 : vector<256x128xf32> to vector<256x128xbf16>
      %52 = arith.index_cast %1 : i32 to index
      %c0_26 = arith.constant 0 : index
      %53 = vector.load %arg15[%52, %c0_26] : memref<256x128xbf16, #tpu.memory_space<vmem>>, vector<256x128xbf16>
      tpu.vector_store %arg15[%52, %c0_26], %51 {strides = array<i32>} : memref<256x128xbf16, #tpu.memory_space<vmem>>, vector<256x128xbf16>,
    } else {
    }
    %c1_i32_11 = arith.constant 1 : i32
    %25 = arith.cmpi sge, %arg0, %c1_i32_11 : i32
    %c2_i32_12 = arith.constant 2 : i32
    %c0_i32_13 = arith.constant 0 : i32
    %26 = arith.cmpi eq, %c2_i32_12, %c0_i32_13 : i32
    %c1_i32_14 = arith.constant 1 : i32
    %27 = arith.select %26, %c1_i32_14, %c2_i32_12 : i32
    %28 = arith.remsi %arg0, %27 : i32
    %c0_i32_15 = arith.constant 0 : i32
    %29 = arith.cmpi ne, %28, %c0_i32_15 : i32
    %c0_i32_16 = arith.constant 0 : i32
    %30 = arith.cmpi slt, %28, %c0_i32_16 : i32
    %c0_i32_17 = arith.constant 0 : i32
    %31 = arith.cmpi slt, %27, %c0_i32_17 : i32
    %32 = arith.xori %30, %31 : i1
    %33 = arith.andi %32, %29 : i1
    %34 = arith.addi %28, %27 : i32
    %35 = arith.select %33, %34, %28 : i32
    %c0_i32_18 = arith.constant 0 : i32
    %36 = arith.cmpi eq, %35, %c0_i32_18 : i32
    %37 = arith.andi %25, %36 : i1
    %38 = arith.extui %37 : i1 to i32
    %c0_i32_19 = arith.constant 0 : i32
    %39 = arith.cmpi ne, %38, %c0_i32_19 : i32
    scf.if %39 {
      %c0 = arith.constant 0 : index
      %c0_22 = arith.constant 0 : index
      %45 = vector.load %arg2[%c0, %c0_22] : memref<256x256xbf16, #tpu.memory_space<vmem>>, vector<256x256xbf16>
      %c0_23 = arith.constant 0 : index
      %c0_24 = arith.constant 0 : index
      %46 = vector.load %arg15[%c0_23, %c0_24] : memref<256x128xbf16, #tpu.memory_space<vmem>>, vector<256x128xbf16>
      %cst = arith.constant dense<0.000000e+00> : vector<256x128xf32>
      %47 = tpu.matmul %45, %46, %cst {dimension_numbers = #tpu.dot_dimension_numbers<[1], [0], [0], [1], [0, 0, 1, 1], [], []>} : vector<256x256xbf16>, vector<256x128xbf16>, vector<256x128xf32> -> vector<256x128xf32>
      %48 = arith.index_cast %1 : i32 to index
      %c0_25 = arith.constant 0 : index
      %49 = vector.load %arg13[%48, %c0_25] : memref<256x128xf32, #tpu.memory_space<vmem>>, vector<256x128xf32>
      %50 = arith.addf %47, %49 : vector<256x128xf32>
      %51 = arith.truncf %50 : vector<256x128xf32> to vector<256x128xbf16>
      %52 = arith.index_cast %1 : i32 to index
      %c0_26 = arith.constant 0 : index
      %53 = vector.load %arg14[%52, %c0_26] : memref<256x128xbf16, #tpu.memory_space<vmem>>, vector<256x128xbf16>
      tpu.vector_store %arg14[%52, %c0_26], %51 {strides = array<i32>} : memref<256x128xbf16, #tpu.memory_space<vmem>>, vector<256x128xbf16>,
    } else {
    }
    %c10_i32 = arith.constant 10 : i32
    %40 = arith.cmpi eq, %arg0, %c10_i32 : i32
    %c0_i32_20 = arith.constant 0 : i32
    %41 = arith.cmpi eq, %arg1, %c0_i32_20 : i32
    %42 = arith.andi %40, %41 : i1
    %43 = arith.extui %42 : i1 to i32
    %c0_i32_21 = arith.constant 0 : i32
    %44 = arith.cmpi ne, %43, %c0_i32_21 : i32
    scf.if %44 {
      %c0 = arith.constant 0 : index
      %c0_22 = arith.constant 0 : index
      %45 = vector.load %arg14[%c0, %c0_22] : memref<256x128xbf16, #tpu.memory_space<vmem>>, vector<256x128xbf16>
      %c0_23 = arith.constant 0 : index
      %c0_24 = arith.constant 0 : index
      %46 = vector.load %arg5[%c0_23, %c0_24] : memref<4x256xbf16, #tpu.memory_space<vmem>>, vector<4x256xbf16>
      %cst = arith.constant dense<0.000000e+00> : vector<4x128xf32>
      %47 = tpu.matmul %46, %45, %cst {dimension_numbers = #tpu.dot_dimension_numbers<[1], [0], [0], [1], [0, 0, 1, 1], [], []>} : vector<4x256xbf16>, vector<256x128xbf16>, vector<4x128xf32> -> vector<4x128xf32>
      %48 = arith.truncf %47 : vector<4x128xf32> to vector<4x128xbf16>
      %c0_25 = arith.constant 0 : index
      %c0_26 = arith.constant 0 : index
      %49 = vector.load %arg8[%c0_25, %c0_26] : memref<128x128xbf16, #tpu.memory_space<vmem>>, vector<128x128xbf16>
      %cst_27 = arith.constant dense<0.000000e+00> : vector<4x128xf32>
      %50 = tpu.matmul %48, %49, %cst_27 {dimension_numbers = #tpu.dot_dimension_numbers<[1], [0], [0], [1], [0, 0, 1, 1], [], []>} : vector<4x128xbf16>, vector<128x128xbf16>, vector<4x128xf32> -> vector<4x128xf32>
      %c0_28 = arith.constant 0 : index
      %c0_29 = arith.constant 0 : index
      %51 = vector.load %arg9[%c0_28, %c0_29] : memref<1x128xf32, #tpu.memory_space<vmem>>, vector<1x128xf32>
      %52 = vector.broadcast %51 : vector<1x128xf32> to vector<4x128xf32>
      %53 = arith.addf %50, %52 : vector<4x128xf32>
      %c0_30 = arith.constant 0 : index
      %c0_31 = arith.constant 0 : index
      %54 = vector.load %arg10[%c0_30, %c0_31] : memref<4x128xf32, #tpu.memory_space<vmem>>, vector<4x128xf32>
      tpu.vector_store %arg10[%c0_30, %c0_31], %53 {strides = array<i32>} : memref<4x128xf32, #tpu.memory_space<vmem>>, vector<4x128xf32>,
    } else {
    }
    return
  }
  func.func @transform_0(%arg0: i32, %arg1: i32) -> (i32, i32) {
    %c0_i32 = arith.constant 0 : i32
    %c0_i32_0 = arith.constant 0 : i32
    return %arg1, %c0_i32 : i32, i32
  }
  func.func @transform_1(%arg0: i32, %arg1: i32) -> (i32, i32) {
    %c0_i32 = arith.constant 0 : i32
    %c0_i32_0 = arith.constant 0 : i32
    %c0_i32_1 = arith.constant 0 : i32
    return %c0_i32, %c0_i32_0 : i32, i32
  }
  func.func @transform_2(%arg0: i32, %arg1: i32) -> (i32, i32) {
    %c0_i32 = arith.constant 0 : i32
    %c0_i32_0 = arith.constant 0 : i32
    %c0_i32_1 = arith.constant 0 : i32
    return %c0_i32, %c0_i32_0 : i32, i32
  }
  func.func @transform_3(%arg0: i32, %arg1: i32) -> (i32, i32) {
    %c0_i32 = arith.constant 0 : i32
    %c0_i32_0 = arith.constant 0 : i32
    %c0_i32_1 = arith.constant 0 : i32
    return %c0_i32, %c0_i32_0 : i32, i32
  }
  func.func @transform_4(%arg0: i32, %arg1: i32) -> (i32, i32) {
    %c0_i32 = arith.constant 0 : i32
    %c0_i32_0 = arith.constant 0 : i32
    %c0_i32_1 = arith.constant 0 : i32
    return %c0_i32, %c0_i32_0 : i32, i32
  }
  func.func @transform_5(%arg0: i32, %arg1: i32) -> (i32, i32) {
    %c0_i32 = arith.constant 0 : i32
    %c0_i32_0 = arith.constant 0 : i32
    %c0_i32_1 = arith.constant 0 : i32
    return %c0_i32, %c0_i32_0 : i32, i32
  }
  func.func @transform_6(%arg0: i32, %arg1: i32) -> (i32, i32) {
    %c0_i32 = arith.constant 0 : i32
    %c0_i32_0 = arith.constant 0 : i32
    %c0_i32_1 = arith.constant 0 : i32
    return %c0_i32, %c0_i32_0 : i32, i32
  }
  func.func @transform_7(%arg0: i32, %arg1: i32) -> (i32, i32) {
    %c0_i32 = arith.constant 0 : i32
    %c0_i32_0 = arith.constant 0 : i32
    %c0_i32_1 = arith.constant 0 : i32
    return %c0_i32, %c0_i32_0 : i32, i32
  }
  func.func @transform_8(%arg0: i32, %arg1: i32) -> (i32, i32) {
    %c0_i32 = arith.constant 0 : i32
    %c0_i32_0 = arith.constant 0 : i32
    %c0_i32_1 = arith.constant 0 : i32
    return %c0_i32, %c0_i32_0 : i32, i32
  }
}

</mosaic_0001>

<bundles_post_ra>
// kernel: tpu_custom_call.1
= control target key start
LH: loop header
LB: loop body
LE: loop exit
PB: predicated region body
PF: predicated region fallthrough
CT: control target
= control target key end

     0   :  { %13 = vsyncpa [#allocation8], 0  ;;  %s7397_s0 = inlined_call_operand.vmem [shape: bf16[256,256], index: 0, kind: input, shape index: {}]   ;;  %s7398_s1 = inlined_call_operand.hbm [shape: bf16[256,256], index: 1, kind: input, shape index: {}]   ;;  %s7399_s2 = inlined_call_operand.vmem [shape: f32[256,3], index: 2, kind: input, shape index: {}]   ;;  %s7400_s3 = inlined_call_operand.vmem [shape: bf16[4,256], index: 3, kind: input, shape index: {}]   ;;  %s7401_s4 = inlined_call_operand.hbm [shape: bf16[256,256], index: 4, kind: input, shape index: {}]   ;;  %s7402_s5 = inlined_call_operand.vmem [shape: f32[1,128], index: 5, kind: input, shape index: {}]   ;;  %s7403_s6 = inlined_call_operand.hbm [shape: bf16[128,128], index: 6, kind: input, shape index: {}]   ;;  %s7404_s7 = inlined_call_operand.vmem [shape: f32[1,128], index: 7, kind: input, shape index: {}]   ;;  %s7405_s8 = inlined_call_operand.hbm [shape: f32[4,128], index: 8, kind: output, shape index: {}]  }
   0x1   :  { %14 = vsyncpa [#allocation11], 0 }
   0x2   :  { %15 = vsyncpa [#allocation9], 0  ;;  %s6153_s27 = smov 0   ;;  %s6155_s28 = smov 0  }
   0x3   :  { %s6157_s29 = smov 0  }
   0x4 LB: > { %s4253_s30 = sadd.s32 4294967295, %s6095_s29   ;;  %p4254_p0 = scmp.ge.s32.totalorder %s6095_s29, 1  ;;  %s6095_s29 = sphi %s6157_s29, %s21_s29   ;;  %s6091_s28 = sphi %s6155_s28, %s7420_s28   ;;  %s6087_s27 = sphi %s6153_s27, %s7419_s27  }
   0x5   : > { %p232_p1 = scmp.lt.s32.totalorder %s6095_s29, 12  ;;  %p6173_p2 = scmp.eq.s32.totalorder %s4253_s30, 0 }
   0x6   : > { %s273_s12 = sshll.u32 %s7401_s4, 4  ;;  %s6097_s14 = smov [#allocation10]   ;;  %s274_s12 = int_to_ptr.hbm [resolvable:$true] %s273_s12 }
   0x7   : > { %p6180_p3 = pnand %p4254_p0, %p232_p1  ;;  %s275_s15 = sshll.u32 %s6097_s14, 4  ;;  %s276_s15 = int_to_ptr.vmem [resolvable:$true] %s275_s15 }
   0x8   : > { %s33_s17 = sadd.s32 1, %s6091_s28  ;;  %s6098_s18 = smov 128  }
   0x9   : > { %p5879_p4 = pneg %p6180_p3  ;;  %p35_p6 = scmp.ge.s32.totalorder %s33_s17, 11 }
   0xa   : > { %s6099_s19 = smov 8   ;;  %s253_s22 = sshll.u32 %s7398_s1, 4  ;;  %s254_s22 = int_to_ptr.hbm [resolvable:$true] %s253_s22 }
   0xb   : > { %p6188_p5 = pnand %p6173_p2, %p5879_p4  ;;  %s7422_s17 = smov (%p35_p6, %s33_s17), 0 }
   0xc   : > { %s6100_s23 = smov [#allocation7]   ;;  %s290_s10 = sshll.u32 %s7403_s6, 4  ;;  %s291_s10 = int_to_ptr.hbm [resolvable:$true] %s290_s10 }
   0xd   : > { %5885 = dma.hbm_to_vmem [thread:$0]  (!%p6188_p5), %s274_s12, 4096, %s276_s15, [#allocation11], %s6098_s18, %s6098_s18, %s6099_s19  }
   0xe   : > { %s255_s24 = sshll.u32 %s6100_s23, 4  ;;  %s6101_s11 = smov [#allocation12]   ;;  %s256_s24 = int_to_ptr.vmem [resolvable:$true] %s255_s24 }
   0xf   : > { %5882 = dma.hbm_to_vmem [thread:$0]  (!%p6188_p5), %s254_s22, 4096, %s256_s24, [#allocation8], %s6098_s18, %s6098_s18, %s6099_s19  }
  0x10   : > { %s292_s14 = sshll.u32 %s6101_s11, 4  ;;  %s6102_s12 = smov 64   ;;  %s293_s14 = int_to_ptr.vmem [resolvable:$true] %s292_s14 }
  0x11   : > { %s6103_s15 = smov 4   ;;  %311 = sbr.rel (%p6180_p3) target bundleno = 1681 (0x691), region = 52 }
  0x12   : > { %5888 = dma.hbm_to_vmem [thread:$0]  (!%p6188_p5), %s291_s10, 1024, %s293_s14, [#allocation11], %s6102_s12, %s6102_s12, %s6103_s15  }
  0x16   : > { %6074 = dma.done.wait (%p6173_p2), [#allocation8], 4096  }
  0x17   : > { %6076 = vsyncadd (%p6173_p2), [#allocation8], 4294963200 }
  0x18   : > { %6078 = dma.done.wait (%p6173_p2), [#allocation11], 5120  }
  0x19   : > { %6080 = vsyncadd (%p6173_p2), [#allocation11], 4294962176  ;;  %p360_p7 = scmp.eq.s32.totalorder %s6087_s27, 0 }
  0x1a   : > { %v4450_v0 = vld [vmem:[#allocation10 + $0x70] sm:$0xf] (%p360_p7)  ;;  %v5249_v1 = vld [vmem:[#allocation10 + $0x74] sm:$0xf0] (%p360_p7)  ;;  %v5248_v5 = vld [vmem:[#allocation10 + $0x74] sm:$0xf] (%p360_p7) }
  0x1b   : > { %365 = sbr.rel (!%p360_p7) target bundleno = 446 (0x1be), region = 68  ;;  %v4514_v2 = vld [vmem:[#allocation10 + $0xf0] sm:$0xf] (%p360_p7)  ;;  %v4451_v3 = vor.u32 (%p360_p7), %v5249_v1, %v4450_v0  ;;  %v5265_v4 = vld [vmem:[#allocation10 + $0xf4] sm:$0xf0] (%p360_p7) }
  0x1c   : > { %v4452_v6 = vld [vmem:[#allocation10 + $0x78] sm:$0xf0] (%p360_p7)  ;;  %v4515_v7 = vor.u32 (%p360_p7), %v5265_v4, %v4514_v2  ;;  %v5264_v9 = vld [vmem:[#allocation10 + $0xf4] sm:$0xf] (%p360_p7)  ;;  %v4442_v11 = vld [vmem:[#allocation10 + $0x60] sm:$0xf] (%p360_p7) }
  0x1d   : > { %v4455_v8 = vor.u32 (%p360_p7), %v5248_v5, %v4452_v6  ;;  %v4516_v10 = vld [vmem:[#allocation10 + $0xf8] sm:$0xf0] (%p360_p7)  ;;  %750 = vmatpush.bf16.msra.mxu0 (%p360_p7), %v4451_v3  ;;  %v5247_v13 = vld [vmem:[#allocation10 + $0x64] sm:$0xf0] (%p360_p7)  ;;  %v4506_v14 = vld [vmem:[#allocation10 + $0xe0] sm:$0xf] (%p360_p7) }
  0x1e   : > { %v4519_v12 = vor.u32 (%p360_p7), %v5264_v9, %v4516_v10  ;;  %v5263_v15 = vld [vmem:[#allocation10 + $0xe4] sm:$0xf0] (%p360_p7)  ;;  %839 = vmatpush.bf16.msra.mxu1 (%p360_p7), %v4515_v7  ;;  %v4443_v16 = vor.u32 (%p360_p7), %v5247_v13, %v4442_v11  ;;  %v5246_v18 = vld [vmem:[#allocation10 + $0x64] sm:$0xf] (%p360_p7)  ;;  %v4444_v19 = vld [vmem:[#allocation10 + $0x68] sm:$0xf0] (%p360_p7) }
  0x1f   : > { %928 = vmatpush.bf16.msra.mxu2 (%p360_p7), %v4455_v8  ;;  %v4507_v17 = vor.u32 (%p360_p7), %v5263_v15, %v4506_v14  ;;  %v5262_v20 = vld [vmem:[#allocation10 + $0xe4] sm:$0xf] (%p360_p7)  ;;  %v4447_v21 = vor.u32 (%p360_p7), %v5246_v18, %v4444_v19  ;;  %v4508_v22 = vld [vmem:[#allocation10 + $0xe8] sm:$0xf0] (%p360_p7)  ;;  %v4434_v23 = vld [vmem:[#allocation10 + $0x50] sm:$0xf] (%p360_p7) }
  0x20   : > { %1017 = vmatpush.bf16.msra.mxu3 %v4519_v12  ;;  %v5245_v24 = vld [vmem:[#allocation10 + $0x54] sm:$0xf0]  ;;  %v4511_v25 = vor.u32 %v5262_v20, %v4508_v22  ;;  %v4498_v26 = vld [vmem:[#allocation10 + $0xd0] sm:$0xf]  ;;  %v5244_v28 = vld [vmem:[#allocation10 + $0x54] sm:$0xf] }
  0x21   : > { %v5261_v27 = vld [vmem:[#allocation10 + $0xd4] sm:$0xf0]  ;;  %751 = vmatpush.bf16.msra.mxu0 %v4443_v16  ;;  %v4435_v29 = vor.u32 %v5245_v24, %v4434_v23  ;;  %v4436_v30 = vld [vmem:[#allocation10 + $0x58] sm:$0xf0]  ;;  %v5260_v31 = vld [vmem:[#allocation10 + $0xd4] sm:$0xf] }
  0x22   : > { %v4500_v32 = vld [vmem:[#allocation10 + $0xd8] sm:$0xf0]  ;;  %840 = vmatpush.bf16.msra.mxu1 %v4507_v17  ;;  %v4499_v33 = vor.u32 %v5261_v27, %v4498_v26  ;;  %v4439_v34 = vor.u32 %v5244_v28, %v4436_v30  ;;  %v4426_v35 = vld [vmem:[#allocation10 + $0x40] sm:$0xf]  ;;  %v5243_v36 = vld [vmem:[#allocation10 + $0x44] sm:$0xf0] }
  0x23   : > { %929 = vmatpush.bf16.msra.mxu2 %v4447_v21  ;;  %v4490_v37 = vld [vmem:[#allocation10 + $0xc0] sm:$0xf]  ;;  %v4503_v38 = vor.u32 %v5260_v31, %v4500_v32  ;;  %v5259_v39 = vld [vmem:[#allocation10 + $0xc4] sm:$0xf0]  ;;  %v5242_v40 = vld [vmem:[#allocation10 + $0x44] sm:$0xf]  ;;  %v4427_v44 = vor.u32 %v5243_v36, %v4426_v35 }
  0x24   : > { %1018 = vmatpush.bf16.msra.mxu3 %v4511_v25  ;;  %v4428_v41 = vld [vmem:[#allocation10 + $0x48] sm:$0xf0]  ;;  %v5258_v42 = vld [vmem:[#allocation10 + $0xc4] sm:$0xf]  ;;  %v4491_v45 = vor.u32 %v5259_v39, %v4490_v37  ;;  %v4418_v47 = vld [vmem:[#allocation10 + $0x30] sm:$0xf] }
  0x25   : > { %v4492_v43 = vld [vmem:[#allocation10 + $0xc8] sm:$0xf0]  ;;  %752 = vmatpush.bf16.msra.mxu0 %v4435_v29  ;;  %v4431_v46 = vor.u32 %v5242_v40, %v4428_v41  ;;  %v5241_v48 = vld [vmem:[#allocation10 + $0x34] sm:$0xf0]  ;;  %v4482_v49 = vld [vmem:[#allocation10 + $0xb0] sm:$0xf] }
  0x26   : > { %841 = vmatpush.bf16.msra.mxu1 %v4499_v33  ;;  %v4495_v50 = vor.u32 %v5258_v42, %v4492_v43  ;;  %v5257_v51 = vld [vmem:[#allocation10 + $0xb4] sm:$0xf0]  ;;  %v5240_v52 = vld [vmem:[#allocation10 + $0x34] sm:$0xf]  ;;  %v4420_v53 = vld [vmem:[#allocation10 + $0x38] sm:$0xf0]  ;;  %v4419_v56 = vor.u32 %v5241_v48, %v4418_v47 }
  0x27   : > { %930 = vmatpush.bf16.msra.mxu2 %v4439_v34  ;;  %v5256_v54 = vld [vmem:[#allocation10 + $0xb4] sm:$0xf]  ;;  %v4484_v55 = vld [vmem:[#allocation10 + $0xb8] sm:$0xf0]  ;;  %v4483_v57 = vor.u32 %v5257_v51, %v4482_v49  ;;  %v4423_v58 = vor.u32 %v5240_v52, %v4420_v53  ;;  %v4410_v59 = vld [vmem:[#allocation10 + $0x20] sm:$0xf] }
  0x28   : > { %1019 = vmatpush.bf16.msra.mxu3 %v4503_v38  ;;  %v5239_v60 = vld [vmem:[#allocation10 + $0x24] sm:$0xf0]  ;;  %v4474_v61 = vld [vmem:[#allocation10 + $0xa0] sm:$0xf]  ;;  %v4487_v62 = vor.u32 %v5256_v54, %v4484_v55  ;;  %v5238_v0 = vld [vmem:[#allocation10 + $0x24] sm:$0xf] }
  0x29   : > { %753 = vmatpush.bf16.msra.mxu0 %v4427_v44  ;;  %v5255_v63 = vld [vmem:[#allocation10 + $0xa4] sm:$0xf0]  ;;  %v4412_v1 = vld [vmem:[#allocation10 + $0x28] sm:$0xf0]  ;;  %v5254_v2 = vld [vmem:[#allocation10 + $0xa4] sm:$0xf]  ;;  %v4411_v4 = vor.u32 %v5239_v60, %v4410_v59 }
  0x2a   : > { %842 = vmatpush.bf16.msra.mxu1 %v4491_v45  ;;  %v4476_v3 = vld [vmem:[#allocation10 + $0xa8] sm:$0xf0]  ;;  %v4475_v5 = vor.u32 %v5255_v63, %v4474_v61  ;;  %v4415_v6 = vor.u32 %v5238_v0, %v4412_v1  ;;  %v4402_v7 = vld [vmem:[#allocation10 + $0x10] sm:$0xf]  ;;  %v5237_v8 = vld [vmem:[#allocation10 + $0x14] sm:$0xf0] }
  0x2b   : > { %931 = vmatpush.bf16.msra.mxu2 %v4431_v46  ;;  %v4466_v9 = vld [vmem:[#allocation10 + $0x90] sm:$0xf]  ;;  %v4479_v10 = vor.u32 %v5254_v2, %v4476_v3  ;;  %v5253_v11 = vld [vmem:[#allocation10 + $0x94] sm:$0xf0]  ;;  %v5236_v12 = vld [vmem:[#allocation10 + $0x14] sm:$0xf]  ;;  %v4403_v17 = vor.u32 %v5237_v8, %v4402_v7 }
  0x2c   : > { %1020 = vmatpush.bf16.msra.mxu3 %v4495_v50  ;;  %v4404_v13 = vld [vmem:[#allocation10 + $0x18] sm:$0xf0]  ;;  %v5252_v14 = vld [vmem:[#allocation10 + $0x94] sm:$0xf]  ;;  %v4394_v18 = vld [vmem:[#allocation10] sm:$0xf]  ;;  %v4467_v20 = vor.u32 %v5253_v11, %v4466_v9 }
  0x2d   : > { %754 = vmatpush.bf16.msra.mxu0 %v4419_v56  ;;  %v4468_v15 = vld [vmem:[#allocation10 + $0x98] sm:$0xf0]  ;;  %v6104_v19 = vmov 1   ;;  %v4407_v21 = vor.u32 %v5236_v12, %v4404_v13  ;;  %v5235_v22 = vld [vmem:[#allocation10 + $0x4] sm:$0xf0]  ;;  %v1171_v40 = vld [vmem:[%s7399_s2 + $0x8] sm:$0xff] }
  0x2e   : > { %843 = vmatpush.bf16.msra.mxu1 %v4483_v57  ;;  %v1170_v16 = vld [vmem:[%s7399_s2] sm:$0xff]  ;;  %5932 = vset.pattern.permute.xlu0 %v6104_v19  ;;  %v4458_v23 = vld [vmem:[#allocation10 + $0x80] sm:$0xf]  ;;  %v1172_v24 = vld [vmem:[%s7399_s2 + $0x10] sm:$0xff]  ;;  %v4471_v25 = vor.u32 %v5252_v14, %v4468_v15  ;;  %v4395_v31 = vor.u32 %v5235_v22, %v4394_v18 }
  0x2f   : > { %932 = vmatpush.bf16.msra.mxu2 %v4423_v58  ;;  %v5251_v26 = vld [vmem:[#allocation10 + $0x84] sm:$0xf0]  ;;  %v5234_v27 = vld [vmem:[#allocation10 + $0x4] sm:$0xf]  ;;  %v4396_v28 = vld [vmem:[#allocation10 + $0x8] sm:$0xf0]  ;;  %1204 = vperm.xlu0 %5932, %v1170_v16  }
  0x30   : > { %1021 = vmatpush.bf16.msra.mxu3 %v4487_v62  ;;  %v5250_v29 = vld [vmem:[#allocation10 + $0x84] sm:$0xf]  ;;  %v4460_v30 = vld [vmem:[#allocation10 + $0x88] sm:$0xf0]  ;;  %5933 = vset.pattern.permute.xlu1 %v6104_v19  ;;  %v4266_v32 = vld [vmem:[#allocation7] sm:$0xf]  ;;  %v4459_v34 = vor.u32 %v5251_v26, %v4458_v23  ;;  %v4399_v35 = vor.u32 %v5234_v27, %v4396_v28 }
  0x31   : > { %755 = vmatpush.bf16.msra.mxu0 %v4411_v4  ;;  %5934 = vset.pattern.permute.xlu2 %v6104_v19  ;;  %v5203_v33 = vld [vmem:[#allocation7 + $0x4] sm:$0xf0]  ;;  %v5202_v36 = vld [vmem:[#allocation7 + $0x4] sm:$0xf]  ;;  %v4268_v37 = vld [vmem:[#allocation7 + $0x8] sm:$0xf0]  ;;  %v4463_v38 = vor.u32 %v5250_v29, %v4460_v30 }
  0x32   : > { %844 = vmatpush.bf16.msra.mxu1 %v4475_v5  ;;  %1214 = vperm.xlu1 %5933, %v1172_v24   ;;  %v4267_v39 = vor.u32 %v5203_v33, %v4266_v32  ;;  %v4271_v41 = vor.u32 %v5202_v36, %v4268_v37  ;;  %v1173_v42 = vld [vmem:[%s7399_s2 + $0x18] sm:$0xff]  ;;  %v5205_v44 = vld [vmem:[#allocation7 + $0x14] sm:$0xf0]  ;;  %v4276_v46 = vld [vmem:[#allocation7 + $0x18] sm:$0xf0] }
  0x33   : > { %933 = vmatpush.bf16.msra.mxu2 %v4415_v6  ;;  %v4274_v43 = vld [vmem:[#allocation7 + $0x10] sm:$0xf]  ;;  %v5204_v45 = vld [vmem:[#allocation7 + $0x14] sm:$0xf]  ;;  %v1176_v49 = vld [vmem:[%s7399_s2 + $0x30] sm:$0xff] }
  0x34   : > { %1022 = vmatpush.bf16.msra.mxu3 %v4479_v10  ;;  %v4275_v47 = vor.u32 %v5205_v44, %v4274_v43  ;;  %v4279_v48 = vor.u32 %v5204_v45, %v4276_v46  ;;  %v4282_v50 = vld [vmem:[#allocation7 + $0x20] sm:$0xf]  ;;  %v5207_v51 = vld [vmem:[#allocation7 + $0x24] sm:$0xf0]  ;;  %v5206_v52 = vld [vmem:[#allocation7 + $0x24] sm:$0xf] }
  0x35   : > { %756 = vmatpush.bf16.msra.mxu0 %v4403_v17  ;;  %v4284_v53 = vld [vmem:[#allocation7 + $0x28] sm:$0xf0]  ;;  %v4283_v54 = vor.u32 %v5207_v51, %v4282_v50  ;;  %v1174_v56 = vld [vmem:[%s7399_s2 + $0x20] sm:$0xff]  ;;  %v1177_v57 = vld [vmem:[%s7399_s2 + $0x38] sm:$0xff] }
  0x36   : > { %845 = vmatpush.bf16.msra.mxu1 %v4467_v20  ;;  %v4287_v55 = vor.u32 %v5206_v52, %v4284_v53  ;;  %1224 = vperm.xlu2 %5934, %v1174_v56   ;;  %v1175_v58 = vld [vmem:[%s7399_s2 + $0x28] sm:$0xff]  ;;  %v4290_v59 = vld [vmem:[#allocation7 + $0x30] sm:$0xf]  ;;  %v5209_v60 = vld [vmem:[#allocation7 + $0x34] sm:$0xf0] }
  0x37   : > { %934 = vmatpush.bf16.msra.mxu2 %v4407_v21  ;;  %1209 = vperm.xlu0 %5932, %v1171_v40   ;;  %v5208_v61 = vld [vmem:[#allocation7 + $0x34] sm:$0xf]  ;;  %v4292_v62 = vld [vmem:[#allocation7 + $0x38] sm:$0xf0]  ;;  %v4291_v63 = vor.u32 %v5209_v60, %v4290_v59  ;;  %v1179_v1 = vld [vmem:[%s7399_s2 + $0x48] sm:$0xff] }
  0x38   : > { %1023 = vmatpush.bf16.msra.mxu3 %v4471_v25  ;;  %v4295_v0 = vor.u32 %v5208_v61, %v4292_v62  ;;  %v1180_v2 = vld [vmem:[%s7399_s2 + $0x50] sm:$0xff]  ;;  %v4298_v3 = vld [vmem:[#allocation7 + $0x40] sm:$0xf]  ;;  %v5210_v5 = vld [vmem:[#allocation7 + $0x44] sm:$0xf] }
  0x39   : > { %757 = vmatpush.bf16.msra.mxu0 %v4395_v31  ;;  %v5211_v4 = vld [vmem:[#allocation7 + $0x44] sm:$0xf0]  ;;  %v4300_v6 = vld [vmem:[#allocation7 + $0x48] sm:$0xf0]  ;;  %v1178_v9 = vld [vmem:[%s7399_s2 + $0x40] sm:$0xff] }
  0x3a   : > { %846 = vmatpush.bf16.msra.mxu1 %v4459_v34  ;;  %1219 = vperm.xlu1 %5933, %v1173_v42   ;;  %v4299_v7 = vor.u32 %v5211_v4, %v4298_v3  ;;  %v4303_v8 = vor.u32 %v5210_v5, %v4300_v6  ;;  %v1182_v10 = vld [vmem:[%s7399_s2 + $0x60] sm:$0xff]  ;;  %v4306_v11 = vld [vmem:[#allocation7 + $0x50] sm:$0xf]  ;;  %v5212_v13 = vld [vmem:[#allocation7 + $0x54] sm:$0xf] }
  0x3b   : > { %935 = vmatpush.bf16.msra.mxu2 %v4399_v35  ;;  %v5213_v12 = vld [vmem:[#allocation7 + $0x54] sm:$0xf0]  ;;  %v4308_v14 = vld [vmem:[#allocation7 + $0x58] sm:$0xf0]  ;;  %v1183_v17 = vld [vmem:[%s7399_s2 + $0x68] sm:$0xff] }
  0x3c   : > { %1024 = vmatpush.bf16.msra.mxu3 %v4463_v38  ;;  %758 = vmatmul.bf16.vlgmr.msra.gmra.mxu0 %v4267_v39  ;;  %v4307_v15 = vor.u32 %v5213_v12, %v4306_v11  ;;  %v4311_v16 = vor.u32 %v5212_v13, %v4308_v14  ;;  %v1181_v18 = vld [vmem:[%s7399_s2 + $0x58] sm:$0xff]  ;;  %v4314_v19 = vld [vmem:[#allocation7 + $0x60] sm:$0xf]  ;;  %v5215_v20 = vld [vmem:[#allocation7 + $0x64] sm:$0xf0] }
  0x3d   : > { %847 = vmatmul.bf16.vlgmr.msra.gmra.mxu1 %v4271_v41  ;;  %v5214_v21 = vld [vmem:[#allocation7 + $0x64] sm:$0xf]  ;;  %v4316_v22 = vld [vmem:[#allocation7 + $0x68] sm:$0xf0]  ;;  %v4315_v23 = vor.u32 %v5215_v20, %v4314_v19  ;;  %v1185_v25 = vld [vmem:[%s7399_s2 + $0x78] sm:$0xff] }
  0x3e   : > { %936 = vmatmul.bf16.vlgmr.msra.gmra.mxu2 %v4267_v39  ;;  %1229 = vperm.xlu2 %5934, %v1175_v58   ;;  %v4319_v24 = vor.u32 %v5214_v21, %v4316_v22  ;;  %v4322_v26 = vld [vmem:[#allocation7 + $0x70] sm:$0xf]  ;;  %v5217_v27 = vld [vmem:[#allocation7 + $0x74] sm:$0xf0]  ;;  %v5216_v28 = vld [vmem:[#allocation7 + $0x74] sm:$0xf] }
  0x3f   : > { %1025 = vmatmul.bf16.vlgmr.msra.gmra.mxu3 %v4271_v41  ;;  %1234 = vperm.xlu0 %5932, %v1176_v49   ;;  %v4324_v29 = vld [vmem:[#allocation7 + $0x78] sm:$0xf0]  ;;  %v4323_v30 = vor.u32 %v5217_v27, %v4322_v26  ;;  %v1184_v33 = vld [vmem:[%s7399_s2 + $0x70] sm:$0xff]  ;;  %v1189_v34 = vld [vmem:[%s7399_s2 + $0x98] sm:$0xff] }
  0x40   : > { %v4327_v31 = vor.u32 %v5216_v28, %v4324_v29  ;;  %v1186_v32 = vld [vmem:[%s7399_s2 + $0x80] sm:$0xff]  ;;  %v1188_v35 = vld [vmem:[%s7399_s2 + $0x90] sm:$0xff]  ;;  %v4330_v36 = vld [vmem:[#allocation7 + $0x80] sm:$0xf] }
  0x41   : > { %v5219_v37 = vld [vmem:[#allocation7 + $0x84] sm:$0xf0]  ;;  %v5218_v38 = vld [vmem:[#allocation7 + $0x84] sm:$0xf]  ;;  %v4332_v39 = vld [vmem:[#allocation7 + $0x88] sm:$0xf0] }
  0x42   : > { %1239 = vperm.xlu1 %5933, %v1177_v57   ;;  %v4331_v41 = vor.u32 %v5219_v37, %v4330_v36  ;;  %v4335_v43 = vor.u32 %v5218_v38, %v4332_v39  ;;  %v1192_v46 = vld [vmem:[%s7399_s2 + $0xb0] sm:$0xff]  ;;  %v1194_v56 = vld [vmem:[%s7399_s2 + $0xc0] sm:$0xff]  ;;  %v4338_v59 = vld [vmem:[#allocation7 + $0x90] sm:$0xf] }
  0x43   : > { %v5221_v60 = vld [vmem:[#allocation7 + $0x94] sm:$0xf0]  ;;  %v5220_v61 = vld [vmem:[#allocation7 + $0x94] sm:$0xf]  ;;  %v4340_v62 = vld [vmem:[#allocation7 + $0x98] sm:$0xf0] }
  0x44   : > { %v4343_v5 = vor.u32 %v5220_v61, %v4340_v62  ;;  %v1197_v11 = vld [vmem:[%s7399_s2 + $0xd8] sm:$0xff]  ;;  %v1200_v20 = vld [vmem:[%s7399_s2 + $0xf0] sm:$0xff]  ;;  %v1190_v37 = vld [vmem:[%s7399_s2 + $0xa0] sm:$0xff] }
  0x45   : > { %v1201_v19 = vld [vmem:[%s7399_s2 + $0xf8] sm:$0xff]  ;;  %v4348_v26 = vld [vmem:[#allocation7 + $0xa8] sm:$0xf0] }
  0x46   : > { %1244 = vperm.xlu2 %5934, %v1178_v9   ;;  %v1196_v61 = vld [vmem:[%s7399_s2 + $0xd0] sm:$0xff] }
  0x47   : > { %1249 = vperm.xlu0 %5932, %v1179_v1  }
  0x4a   : > { %1254 = vperm.xlu1 %5933, %v1180_v2   ;;  %v4339_v2 = vor.u32 %v5221_v60, %v4338_v59 }
  0x4c   : > { %763 = vmatmul.bf16.gmra.mxu0 %v4275_v47 }
  0x4d   : > { %852 = vmatmul.bf16.gmra.mxu1 %v4279_v48 }
  0x4e   : > { %941 = vmatmul.bf16.gmra.mxu2 %v4275_v47  ;;  %1259 = vperm.xlu2 %5934, %v1181_v18   ;;  %v1191_v47 = vld [vmem:[%s7399_s2 + $0xa8] sm:$0xff] }
  0x4f   : > { %1030 = vmatmul.bf16.gmra.mxu3 %v4279_v48  ;;  %1264 = vperm.xlu0 %5932, %v1182_v10   ;;  %v1198_v10 = vld [vmem:[%s7399_s2 + $0xe0] sm:$0xff] }
  0x52   : > { %1269 = vperm.xlu1 %5933, %v1183_v17  }
  0x56   : > { %1274 = vperm.xlu2 %5934, %v1184_v33  }
  0x57   : > { %1279 = vperm.xlu0 %5932, %v1185_v25   ;;  %v5222_v25 = vld [vmem:[#allocation7 + $0xa4] sm:$0xf] }
  0x58   : > { %v4351_v33 = vor.u32 %v5222_v25, %v4348_v26 }
  0x5a   : > { %1284 = vperm.xlu1 %5933, %v1186_v32  }
  0x5c   : > { %768 = vmatmul.bf16.gmra.mxu0 %v4283_v54 }
  0x5d   : > { %857 = vmatmul.bf16.gmra.mxu1 %v4287_v55 }
  0x5e   : > { %946 = vmatmul.bf16.gmra.mxu2 %v4283_v54 }
  0x5f   : > { %1035 = vmatmul.bf16.gmra.mxu3 %v4287_v55  ;;  %1294 = vperm.xlu0 %5932, %v1188_v35   ;;  %v1195_v55 = vld [vmem:[%s7399_s2 + $0xc8] sm:$0xff] }
  0x62   : > { %1299 = vperm.xlu1 %5933, %v1189_v34  }
  0x67   : > { %1309 = vperm.xlu0 %5932, %v1191_v47  }
  0x6a   : > { %1314 = vperm.xlu1 %5933, %v1192_v46  }
  0x6c   : > { %773 = vmatmul.bf16.gmra.mxu0 %v4291_v63 }
  0x6d   : > { %862 = vmatmul.bf16.gmra.mxu1 %v4295_v0 }
  0x6e   : > { %951 = vmatmul.bf16.gmra.mxu2 %v4291_v63 }
  0x6f   : > { %1040 = vmatmul.bf16.gmra.mxu3 %v4295_v0  ;;  %1324 = vperm.xlu0 %5932, %v1194_v56  }
  0x72   : > { %1329 = vperm.xlu1 %5933, %v1195_v55  }
  0x77   : > { %1339 = vperm.xlu0 %5932, %v1197_v11   ;;  %v5226_v11 = vld [vmem:[#allocation7 + $0xc4] sm:$0xf] }
  0x7a   : > { %1344 = vperm.xlu1 %5933, %v1198_v10   ;;  %v5227_v10 = vld [vmem:[#allocation7 + $0xc4] sm:$0xf0] }
  0x7c   : > { %778 = vmatmul.bf16.gmra.mxu0 %v4299_v7 }
  0x7d   : > { %867 = vmatmul.bf16.gmra.mxu1 %v4303_v8 }
  0x7e   : > { %956 = vmatmul.bf16.gmra.mxu2 %v4299_v7 }
  0x7f   : > { %1045 = vmatmul.bf16.gmra.mxu3 %v4303_v8  ;;  %v1187_v8 = vld [vmem:[%s7399_s2 + $0x88] sm:$0xff]  ;;  %1354 = vperm.xlu0 %5932, %v1200_v20  }
  0x80   : > { %1289 = vperm.xlu2 %5934, %v1187_v8  }
  0x82   : > { %1359 = vperm.xlu1 %5933, %v1201_v19  }
  0x88   : > { %1304 = vperm.xlu2 %5934, %v1190_v37  }
  0x8c   : > { %783 = vmatmul.bf16.gmra.mxu0 %v4307_v15 }
  0x8d   : > { %872 = vmatmul.bf16.gmra.mxu1 %v4311_v16 }
  0x8e   : > { %961 = vmatmul.bf16.gmra.mxu2 %v4307_v15 }
  0x8f   : > { %1050 = vmatmul.bf16.gmra.mxu3 %v4311_v16 }
  0x90   : > { %v1225_v29 = vpop.permute.xlu2 %1224 }
  0x9c   : > { %788 = vmatmul.bf16.gmra.mxu0 %v4315_v23 }
  0x9d   : > { %877 = vmatmul.bf16.gmra.mxu1 %v4319_v24 }
  0x9e   : > { %966 = vmatmul.bf16.gmra.mxu2 %v4315_v23  ;;  %v4346_v23 = vld [vmem:[#allocation7 + $0xa0] sm:$0xf] }
  0x9f   : > { %1055 = vmatmul.bf16.gmra.mxu3 %v4319_v24  ;;  %v5223_v24 = vld [vmem:[#allocation7 + $0xa4] sm:$0xf0] }
  0xa1   : > { %v1205_v40 = vpop.permute.xlu0 %1204 }
  0xa4   : > { %v1215_v1 = vpop.permute.xlu1 %1214 }
  0xa9   : > { %v1210_v53 = vpop.permute.xlu0 %1209 }
  0xac   : > { %793 = vmatmul.bf16.gmra.mxu0 %v4323_v30  ;;  %v1220_v17 = vpop.permute.xlu1 %1219 }
  0xad   : > { %882 = vmatmul.bf16.gmra.mxu1 %v4327_v31 }
  0xae   : > { %971 = vmatmul.bf16.gmra.mxu2 %v4323_v30  ;;  %v4347_v30 = vor.u32 %v5223_v24, %v4346_v23 }
  0xaf   : > { %1060 = vmatmul.bf16.gmra.mxu3 %v4327_v31 }
  0xb1   : > { %v1235_v62 = vpop.permute.xlu0 %1234 }
  0xb9   : > { %v759_v42 = vpop.f32.mrf.mxu0 }
  0xba   : > { %v848_v44 = vpop.f32.mrf.mxu1 }
  0xbb   : > { %v849_v45 = vadd.f32 %v848_v44, %v759_v42 }
  0xbc   : > { %798 = vmatmul.bf16.gmra.mxu0 %v4331_v41 }
  0xbd   : > { %1106 = vst [vmem:[#allocation2 + $0xb0] sm:$0xff] %v849_v45  ;;  %887 = vmatmul.bf16.gmra.mxu1 %v4335_v43  ;;  %v1362_v57 = vmul.f32 %v1205_v40, %v849_v45  ;;  %v1193_v45 = vld [vmem:[%s7399_s2 + $0xb8] sm:$0xff] }
  0xbe   : > { %976 = vmatmul.bf16.gmra.mxu2 %v4331_v41  ;;  %1319 = vperm.xlu2 %5934, %v1193_v45  }
  0xbf   : > { %1065 = vmatmul.bf16.gmra.mxu3 %v4335_v43  ;;  %v1230_v43 = vpop.permute.xlu2 %1229 }
  0xc1   : > { %v937_v48 = vpop.f32.mrf.mxu2  ;;  %v761_v50 = vpop.f32.mrf.mxu0 }
  0xc2   : > { %v1026_v49 = vpop.f32.mrf.mxu3  ;;  %v850_v52 = vpop.f32.mrf.mxu1 }
  0xc3   : > { %v1027_v51 = vadd.f32 %v1026_v49, %v937_v48  ;;  %v851_v54 = vadd.f32 %v850_v52, %v761_v50  ;;  %v4354_v48 = vld [vmem:[#allocation7 + $0xb0] sm:$0xf]  ;;  %v5225_v49 = vld [vmem:[#allocation7 + $0xb4] sm:$0xf0]  ;;  %v5224_v50 = vld [vmem:[#allocation7 + $0xb4] sm:$0xf] }
  0xc5   : > { %1107 = vst [vmem:[#allocation2 + $0x1b0] sm:$0xff] %v1027_v51  ;;  %v1363_v58 = vmul.f32 %v1210_v53, %v851_v54  ;;  %v4356_v51 = vld [vmem:[#allocation7 + $0xb8] sm:$0xf0] }
  0xc6   : > { %1108 = vst [vmem:[#allocation2 + $0xd8] sm:$0xff] %v851_v54  ;;  %v4355_v54 = vor.u32 %v5225_v49, %v4354_v48  ;;  %1334 = vperm.xlu2 %5934, %v1196_v61  }
  0xc7   : > { %v5438_v63 = vpack.c.bf16 %v1363_v58, %v1362_v57  ;;  %v4359_v57 = vor.u32 %v5224_v50, %v4356_v51 }
  0xc9   : > { %v939_v0 = vpop.f32.mrf.mxu2  ;;  %5439 = vst [vmem:[#allocation3 + $0x68] sm:$0xff] %v5438_v63   ;;  %v764_v4 = vpop.f32.mrf.mxu0 }
  0xca   : > { %v1028_v3 = vpop.f32.mrf.mxu3  ;;  %v853_v7 = vpop.f32.mrf.mxu1 }
  0xcb   : > { %v1029_v6 = vadd.f32 %v1028_v3, %v939_v0  ;;  %v854_v9 = vadd.f32 %v853_v7, %v764_v4  ;;  %v1240_v4 = vpop.permute.xlu1 %1239 }
  0xcc   : > { %803 = vmatmul.bf16.gmra.mxu0 %v4339_v2 }
  0xcd   : > { %1109 = vst [vmem:[#allocation2 + $0x18] sm:$0xff] %v1029_v6  ;;  %892 = vmatmul.bf16.gmra.mxu1 %v4343_v5  ;;  %v1364_v21 = vmul.f32 %v1215_v1, %v854_v9  ;;  %v1199_v6 = vld [vmem:[%s7399_s2 + $0xe8] sm:$0xff] }
  0xce   : > { %1110 = vst [vmem:[#allocation2 + $0x50] sm:$0xff] %v854_v9  ;;  %981 = vmatmul.bf16.gmra.mxu2 %v4339_v2  ;;  %v4362_v9 = vld [vmem:[#allocation7 + $0xc0] sm:$0xf]  ;;  %1349 = vperm.xlu2 %5934, %v1199_v6  }
  0xcf   : > { %1070 = vmatmul.bf16.gmra.mxu3 %v4343_v5 }
  0xd1   : > { %v942_v12 = vpop.f32.mrf.mxu2  ;;  %v766_v14 = vpop.f32.mrf.mxu0 }
  0xd2   : > { %v1031_v13 = vpop.f32.mrf.mxu3  ;;  %v855_v16 = vpop.f32.mrf.mxu1 }
  0xd3   : > { %v1032_v15 = vadd.f32 %v1031_v13, %v942_v12  ;;  %v856_v18 = vadd.f32 %v855_v16, %v766_v14  ;;  %v4364_v12 = vld [vmem:[#allocation7 + $0xc8] sm:$0xf0]  ;;  %v1255_v45 = vpop.permute.xlu1 %1254 }
  0xd5   : > { %1111 = vst [vmem:[#allocation2 + $0x168] sm:$0xff] %v1032_v15  ;;  %v1365_v22 = vmul.f32 %v1220_v17, %v856_v18  ;;  %v4363_v15 = vor.u32 %v5227_v10, %v4362_v9 }
  0xd6   : > { %1112 = vst [vmem:[#allocation2 + $0x130] sm:$0xff] %v856_v18  ;;  %v4367_v18 = vor.u32 %v5226_v11, %v4364_v12 }
  0xd7   : > { %v5443_v27 = vpack.c.bf16 %v1365_v22, %v1364_v21  ;;  %v1245_v22 = vpop.permute.xlu2 %1244 }
  0xd9   : > { %v944_v28 = vpop.f32.mrf.mxu2  ;;  %5755 = vst [vmem:[#allocation3 + $0x50] sm:$0xff] %v5443_v27   ;;  %v769_v32 = vpop.f32.mrf.mxu0 }
  0xda   : > { %v1033_v31 = vpop.f32.mrf.mxu3  ;;  %v858_v35 = vpop.f32.mrf.mxu1 }
  0xdb   : > { %v1034_v34 = vadd.f32 %v1033_v31, %v944_v28  ;;  %v859_v36 = vadd.f32 %v858_v35, %v769_v32  ;;  %v1250_v28 = vpop.permute.xlu0 %1249  ;;  %v4370_v32 = vld [vmem:[#allocation7 + $0xd0] sm:$0xf]  ;;  %v4372_v35 = vld [vmem:[#allocation7 + $0xd8] sm:$0xf0]  ;;  %v1270_v10 = vpop.permute.xlu1 %1269 }
  0xdc   : > { %808 = vmatmul.bf16.gmra.mxu0 %v4347_v30 }
  0xdd   : > { %1113 = vst [vmem:[#allocation2 + $0x48] sm:$0xff] %v1034_v34  ;;  %897 = vmatmul.bf16.gmra.mxu1 %v4351_v33  ;;  %v1366_v46 = vmul.f32 %v1225_v29, %v859_v36  ;;  %v5228_v34 = vld [vmem:[#allocation7 + $0xd4] sm:$0xf] }
  0xde   : > { %1114 = vst [vmem:[#allocation2 + $0x180] sm:$0xff] %v859_v36  ;;  %986 = vmatmul.bf16.gmra.mxu2 %v4347_v30 }
  0xdf   : > { %1075 = vmatmul.bf16.gmra.mxu3 %v4351_v33  ;;  %v5229_v33 = vld [vmem:[#allocation7 + $0xd4] sm:$0xf0]  ;;  %v1260_v51 = vpop.permute.xlu2 %1259 }
  0xe1   : > { %v947_v38 = vpop.f32.mrf.mxu2  ;;  %v771_v40 = vpop.f32.mrf.mxu0 }
  0xe2   : > { %v1036_v39 = vpop.f32.mrf.mxu3  ;;  %v860_v42 = vpop.f32.mrf.mxu1 }
  0xe3   : > { %v1037_v41 = vadd.f32 %v1036_v39, %v947_v38  ;;  %v861_v44 = vadd.f32 %v860_v42, %v771_v40  ;;  %v4371_v38 = vor.u32 %v5229_v33, %v4370_v32 }
  0xe5   : > { %1115 = vst [vmem:[#allocation2 + $0x110] sm:$0xff] %v1037_v41  ;;  %v1367_v47 = vmul.f32 %v1230_v43, %v861_v44  ;;  %v4375_v41 = vor.u32 %v5228_v34, %v4372_v35 }
  0xe6   : > { %1116 = vst [vmem:[#allocation2 + $0x118] sm:$0xff] %v861_v44 }
  0xe7   : > { %v5448_v52 = vpack.c.bf16 %v1367_v47, %v1366_v46 }
  0xe9   : > { %v949_v53 = vpop.f32.mrf.mxu2  ;;  %5756 = vst [vmem:[#allocation3 + $0x70] sm:$0xff] %v5448_v52   ;;  %v774_v56 = vpop.f32.mrf.mxu0 }
  0xea   : > { %v1038_v55 = vpop.f32.mrf.mxu3  ;;  %v863_v59 = vpop.f32.mrf.mxu1 }
  0xeb   : > { %v1039_v58 = vadd.f32 %v1038_v55, %v949_v53  ;;  %v864_v60 = vadd.f32 %v863_v59, %v774_v56  ;;  %v4378_v55 = vld [vmem:[#allocation7 + $0xe0] sm:$0xf]  ;;  %v5231_v56 = vld [vmem:[#allocation7 + $0xe4] sm:$0xf0] }
  0xec   : > { %813 = vmatmul.bf16.gmra.mxu0 %v4355_v54  ;;  %v4379_v61 = vor.u32 %v5231_v56, %v4378_v55 }
  0xed   : > { %1117 = vst [vmem:[#allocation2 + $0x98] sm:$0xff] %v1039_v58  ;;  %902 = vmatmul.bf16.gmra.mxu1 %v4359_v57  ;;  %v1368_v7 = vmul.f32 %v1235_v62, %v864_v60  ;;  %v4380_v58 = vld [vmem:[#allocation7 + $0xe8] sm:$0xf0] }
  0xee   : > { %1118 = vst [vmem:[#allocation2 + $0x120] sm:$0xff] %v864_v60  ;;  %991 = vmatmul.bf16.gmra.mxu2 %v4355_v54 }
  0xef   : > { %1080 = vmatmul.bf16.gmra.mxu3 %v4359_v57  ;;  %v5230_v57 = vld [vmem:[#allocation7 + $0xe4] sm:$0xf] }
  0xf1   : > { %v952_v63 = vpop.f32.mrf.mxu2  ;;  %v776_v1 = vpop.f32.mrf.mxu0 }
  0xf2   : > { %v1041_v0 = vpop.f32.mrf.mxu3  ;;  %v865_v3 = vpop.f32.mrf.mxu1 }
  0xf3   : > { %v1042_v2 = vadd.f32 %v1041_v0, %v952_v63  ;;  %v866_v5 = vadd.f32 %v865_v3, %v776_v1  ;;  %v4383_v0 = vor.u32 %v5230_v57, %v4380_v58 }
  0xf5   : > { %1119 = vst [vmem:[#allocation2 + $0x150] sm:$0xff] %v1042_v2  ;;  %v1369_v8 = vmul.f32 %v1240_v4, %v866_v5  ;;  %v1265_v4 = vpop.permute.xlu0 %1264 }
  0xf6   : > { %1120 = vst [vmem:[#allocation2 + $0x108] sm:$0xff] %v866_v5 }
  0xf7   : > { %v5453_v13 = vpack.c.bf16 %v1369_v8, %v1368_v7 }
  0xf9   : > { %v954_v14 = vpop.f32.mrf.mxu2  ;;  %5757 = vst [vmem:[#allocation3 + $0x60] sm:$0xff] %v5453_v13   ;;  %v779_v17 = vpop.f32.mrf.mxu0 }
  0xfa   : > { %v1043_v16 = vpop.f32.mrf.mxu3  ;;  %v868_v20 = vpop.f32.mrf.mxu1 }
  0xfb   : > { %v1044_v19 = vadd.f32 %v1043_v16, %v954_v14  ;;  %v869_v21 = vadd.f32 %v868_v20, %v779_v17  ;;  %v4386_v14 = vld [vmem:[#allocation7 + $0xf0] sm:$0xf]  ;;  %v5232_v16 = vld [vmem:[#allocation7 + $0xf4] sm:$0xf]  ;;  %v4388_v17 = vld [vmem:[#allocation7 + $0xf8] sm:$0xf0] }
  0xfc   : > { %818 = vmatmul.bf16.gmra.mxu0 %v4363_v15 }
  0xfd   : > { %1121 = vst [vmem:[#allocation2 + $0x60] sm:$0xff] %v1044_v19  ;;  %907 = vmatmul.bf16.gmra.mxu1 %v4367_v18  ;;  %v1370_v30 = vmul.f32 %v1245_v22, %v869_v21  ;;  %v1280_v33 = vpop.permute.xlu0 %1279 }
  0xfe   : > { %1122 = vst [vmem:[#allocation2 + $0xe0] sm:$0xff] %v869_v21  ;;  %996 = vmatmul.bf16.gmra.mxu2 %v4363_v15  ;;  %v5233_v15 = vld [vmem:[#allocation7 + $0xf4] sm:$0xf0] }
  0xff   : > { %1085 = vmatmul.bf16.gmra.mxu3 %v4367_v18  ;;  %v4387_v20 = vor.u32 %v5233_v15, %v4386_v14 }
 0x101   : > { %v957_v23 = vpop.f32.mrf.mxu2  ;;  %v781_v25 = vpop.f32.mrf.mxu0 }
 0x102   : > { %v1046_v24 = vpop.f32.mrf.mxu3  ;;  %v870_v27 = vpop.f32.mrf.mxu1 }
 0x103   : > { %v1047_v26 = vadd.f32 %v1046_v24, %v957_v23  ;;  %v871_v29 = vadd.f32 %v870_v27, %v781_v25  ;;  %v4391_v23 = vor.u32 %v5232_v16, %v4388_v17  ;;  %v1275_v27 = vpop.permute.xlu2 %1274 }
 0x105   : > { %1123 = vst [vmem:[#allocation2 + $0x188] sm:$0xff] %v1047_v26  ;;  %v1371_v31 = vmul.f32 %v1250_v28, %v871_v29 }
 0x106   : > { %1124 = vst [vmem:[#allocation2 + $0x138] sm:$0xff] %v871_v29 }
 0x107   : > { %v5458_v36 = vpack.c.bf16 %v1371_v31, %v1370_v30 }
 0x109   : > { %v959_v37 = vpop.f32.mrf.mxu2  ;;  %5758 = vst [vmem:[#allocation3 + $0x8] sm:$0xff] %v5458_v36   ;;  %v784_v40 = vpop.f32.mrf.mxu0 }
 0x10a   : > { %v1048_v39 = vpop.f32.mrf.mxu3  ;;  %v873_v43 = vpop.f32.mrf.mxu1 }
 0x10b   : > { %v1049_v42 = vadd.f32 %v1048_v39, %v959_v37  ;;  %v874_v44 = vadd.f32 %v873_v43, %v784_v40 }
 0x10c   : > { %823 = vmatmul.bf16.gmra.mxu0 %v4371_v38 }
 0x10d   : > { %1125 = vst [vmem:[#allocation2 + $0x140] sm:$0xff] %v1049_v42  ;;  %912 = vmatmul.bf16.gmra.mxu1 %v4375_v41  ;;  %v1372_v53 = vmul.f32 %v1255_v45, %v874_v44 }
 0x10e   : > { %1126 = vst [vmem:[#allocation2 + $0x80] sm:$0xff] %v874_v44  ;;  %1001 = vmatmul.bf16.gmra.mxu2 %v4371_v38  ;;  %v1285_v44 = vpop.permute.xlu1 %1284 }
 0x10f   : > { %1090 = vmatmul.bf16.gmra.mxu3 %v4375_v41 }
 0x111   : > { %v962_v46 = vpop.f32.mrf.mxu2  ;;  %v786_v48 = vpop.f32.mrf.mxu0 }
 0x112   : > { %v1051_v47 = vpop.f32.mrf.mxu3  ;;  %v875_v50 = vpop.f32.mrf.mxu1 }
 0x113   : > { %v1052_v49 = vadd.f32 %v1051_v47, %v962_v46  ;;  %v876_v52 = vadd.f32 %v875_v50, %v786_v48  ;;  %v1290_v50 = vpop.permute.xlu2 %1289 }
 0x115   : > { %1127 = vst [vmem:[#allocation2 + $0x1a8] sm:$0xff] %v1052_v49  ;;  %v1373_v54 = vmul.f32 %v1260_v51, %v876_v52 }
 0x116   : > { %1128 = vst [vmem:[#allocation2 + $0x1b8] sm:$0xff] %v876_v52 }
 0x117   : > { %v5463_v59 = vpack.c.bf16 %v1373_v54, %v1372_v53 }
 0x119   : > { %v964_v60 = vpop.f32.mrf.mxu2  ;;  %5759 = vst [vmem:[#allocation3 + $0x58] sm:$0xff] %v5463_v59   ;;  %v789_v63 = vpop.f32.mrf.mxu0 }
 0x11a   : > { %v1053_v62 = vpop.f32.mrf.mxu3  ;;  %v878_v2 = vpop.f32.mrf.mxu1 }
 0x11b   : > { %v1054_v1 = vadd.f32 %v1053_v62, %v964_v60  ;;  %v879_v3 = vadd.f32 %v878_v2, %v789_v63 }
 0x11c   : > { %828 = vmatmul.bf16.gmra.mxu0 %v4379_v61 }
 0x11d   : > { %1129 = vst [vmem:[#allocation2 + $0x28] sm:$0xff] %v1054_v1  ;;  %917 = vmatmul.bf16.gmra.mxu1 %v4383_v0  ;;  %v1374_v12 = vmul.f32 %v1265_v4, %v879_v3  ;;  %v1295_v4 = vpop.permute.xlu0 %1294 }
 0x11e   : > { %1130 = vst [vmem:[#allocation2 + $0x1e8] sm:$0xff] %v879_v3  ;;  %1006 = vmatmul.bf16.gmra.mxu2 %v4379_v61  ;;  %v1300_v3 = vpop.permute.xlu1 %1299 }
 0x11f   : > { %1095 = vmatmul.bf16.gmra.mxu3 %v4383_v0 }
 0x121   : > { %v967_v5 = vpop.f32.mrf.mxu2  ;;  %v791_v7 = vpop.f32.mrf.mxu0 }
 0x122   : > { %v1056_v6 = vpop.f32.mrf.mxu3  ;;  %v880_v9 = vpop.f32.mrf.mxu1 }
 0x123   : > { %v1057_v8 = vadd.f32 %v1056_v6, %v967_v5  ;;  %v881_v11 = vadd.f32 %v880_v9, %v791_v7 }
 0x125   : > { %1131 = vst [vmem:[#allocation2 + $0xf8] sm:$0xff] %v1057_v8  ;;  %v1375_v13 = vmul.f32 %v1270_v10, %v881_v11 }
 0x126   : > { %1132 = vst [vmem:[#allocation2 + $0x160] sm:$0xff] %v881_v11 }
 0x127   : > { %v5468_v18 = vpack.c.bf16 %v1375_v13, %v1374_v12 }
 0x129   : > { %v969_v19 = vpop.f32.mrf.mxu2  ;;  %5760 = vst [vmem:[#allocation3 + $0x18] sm:$0xff] %v5468_v18   ;;  %v794_v22 = vpop.f32.mrf.mxu0 }
 0x12a   : > { %v1058_v21 = vpop.f32.mrf.mxu3  ;;  %v883_v25 = vpop.f32.mrf.mxu1 }
 0x12b   : > { %v1059_v24 = vadd.f32 %v1058_v21, %v969_v19  ;;  %v884_v26 = vadd.f32 %v883_v25, %v794_v22  ;;  %v1305_v21 = vpop.permute.xlu2 %1304 }
 0x12c   : > { %833 = vmatmul.bf16.gmra.mxu0 %v4387_v20 }
 0x12d   : > { %1133 = vst [vmem:[#allocation2 + $0x30] sm:$0xff] %v1059_v24  ;;  %922 = vmatmul.bf16.gmra.mxu1 %v4391_v23  ;;  %v1376_v35 = vmul.f32 %v1275_v27, %v884_v26 }
 0x12e   : > { %1134 = vst [vmem:[#allocation2 + $0x1e0] sm:$0xff] %v884_v26  ;;  %1011 = vmatmul.bf16.gmra.mxu2 %v4387_v20  ;;  %v1310_v20 = vpop.permute.xlu0 %1309 }
 0x12f   : > { %1100 = vmatmul.bf16.gmra.mxu3 %v4391_v23 }
 0x131   : > { %v972_v28 = vpop.f32.mrf.mxu2  ;;  %v796_v30 = vpop.f32.mrf.mxu0 }
 0x132   : > { %v1061_v29 = vpop.f32.mrf.mxu3  ;;  %v885_v32 = vpop.f32.mrf.mxu1 }
 0x133   : > { %v1062_v31 = vadd.f32 %v1061_v29, %v972_v28  ;;  %v886_v34 = vadd.f32 %v885_v32, %v796_v30 }
 0x135   : > { %1135 = vst [vmem:[#allocation2] sm:$0xff] %v1062_v31  ;;  %v1377_v36 = vmul.f32 %v1280_v33, %v886_v34 }
 0x136   : > { %1136 = vst [vmem:[#allocation2 + $0xf0] sm:$0xff] %v886_v34 }
 0x137   : > { %v5473_v37 = vpack.c.bf16 %v1377_v36, %v1376_v35 }
 0x139   : > { %v974_v38 = vpop.f32.mrf.mxu2  ;;  %5761 = vst [vmem:[#allocation3 + $0x30] sm:$0xff] %v5473_v37   ;;  %v799_v40 = vpop.f32.mrf.mxu0 }
 0x13a   : > { %v1063_v39 = vpop.f32.mrf.mxu3  ;;  %v888_v42 = vpop.f32.mrf.mxu1 }
 0x13b   : > { %v1064_v41 = vadd.f32 %v1063_v39, %v974_v38  ;;  %v889_v43 = vadd.f32 %v888_v42, %v799_v40  ;;  %v1315_v37 = vpop.permute.xlu1 %1314  ;;  %v1320_v38 = vpop.permute.xlu2 %1319 }
 0x13d   : > { %1137 = vst [vmem:[#allocation2 + $0x8] sm:$0xff] %v1064_v41  ;;  %v1378_v52 = vmul.f32 %v1285_v44, %v889_v43 }
 0x13e   : > { %1138 = vst [vmem:[#allocation2 + $0x148] sm:$0xff] %v889_v43 }
 0x141   : > { %v977_v45 = vpop.f32.mrf.mxu2  ;;  %v801_v47 = vpop.f32.mrf.mxu0 }
 0x142   : > { %v1066_v46 = vpop.f32.mrf.mxu3  ;;  %v890_v49 = vpop.f32.mrf.mxu1 }
 0x143   : > { %v1067_v48 = vadd.f32 %v1066_v46, %v977_v45  ;;  %v891_v51 = vadd.f32 %v890_v49, %v801_v47 }
 0x145   : > { %1139 = vst [vmem:[#allocation2 + $0x1d0] sm:$0xff] %v1067_v48  ;;  %v1379_v53 = vmul.f32 %v1290_v50, %v891_v51 }
 0x146   : > { %1140 = vst [vmem:[#allocation2 + $0x100] sm:$0xff] %v891_v51 }
 0x147   : > { %v5478_v54 = vpack.c.bf16 %v1379_v53, %v1378_v52 }
 0x149   : > { %v979_v55 = vpop.f32.mrf.mxu2  ;;  %5762 = vst [vmem:[#allocation3 + $0x48] sm:$0xff] %v5478_v54   ;;  %v804_v57 = vpop.f32.mrf.mxu0 }
 0x14a   : > { %v1068_v56 = vpop.f32.mrf.mxu3  ;;  %v893_v59 = vpop.f32.mrf.mxu1 }
 0x14b   : > { %v1069_v58 = vadd.f32 %v1068_v56, %v979_v55  ;;  %v894_v60 = vadd.f32 %v893_v59, %v804_v57  ;;  %v1330_v54 = vpop.permute.xlu1 %1329  ;;  %v1325_v55 = vpop.permute.xlu0 %1324 }
 0x14d   : > { %1141 = vst [vmem:[#allocation2 + $0xc8] sm:$0xff] %v1069_v58  ;;  %v1380_v5 = vmul.f32 %v1295_v4, %v894_v60 }
 0x14e   : > { %1142 = vst [vmem:[#allocation2 + $0x40] sm:$0xff] %v894_v60 }
 0x151   : > { %v982_v61 = vpop.f32.mrf.mxu2  ;;  %v806_v63 = vpop.f32.mrf.mxu0 }
 0x152   : > { %v1071_v62 = vpop.f32.mrf.mxu3  ;;  %v895_v1 = vpop.f32.mrf.mxu1 }
 0x153   : > { %v1072_v0 = vadd.f32 %v1071_v62, %v982_v61  ;;  %v896_v2 = vadd.f32 %v895_v1, %v806_v63 }
 0x155   : > { %1143 = vst [vmem:[#allocation2 + $0x1f8] sm:$0xff] %v1072_v0  ;;  %v1381_v6 = vmul.f32 %v1300_v3, %v896_v2 }
 0x156   : > { %1144 = vst [vmem:[#allocation2 + $0x20] sm:$0xff] %v896_v2 }
 0x157   : > { %v5483_v7 = vpack.c.bf16 %v1381_v6, %v1380_v5 }
 0x159   : > { %v984_v8 = vpop.f32.mrf.mxu2  ;;  %5763 = vst [vmem:[#allocation3 + $0x20] sm:$0xff] %v5483_v7   ;;  %v809_v10 = vpop.f32.mrf.mxu0 }
 0x15a   : > { %v1073_v9 = vpop.f32.mrf.mxu3  ;;  %v898_v12 = vpop.f32.mrf.mxu1 }
 0x15b   : > { %v1074_v11 = vadd.f32 %v1073_v9, %v984_v8  ;;  %v899_v13 = vadd.f32 %v898_v12, %v809_v10  ;;  %v1340_v7 = vpop.permute.xlu0 %1339  ;;  %v1335_v8 = vpop.permute.xlu2 %1334 }
 0x15d   : > { %1145 = vst [vmem:[#allocation2 + $0x128] sm:$0xff] %v1074_v11  ;;  %v1382_v22 = vmul.f32 %v1305_v21, %v899_v13 }
 0x15e   : > { %1146 = vst [vmem:[#allocation2 + $0x1a0] sm:$0xff] %v899_v13 }
 0x161   : > { %v987_v14 = vpop.f32.mrf.mxu2  ;;  %v811_v16 = vpop.f32.mrf.mxu0 }
 0x162   : > { %v1076_v15 = vpop.f32.mrf.mxu3  ;;  %v900_v18 = vpop.f32.mrf.mxu1 }
 0x163   : > { %v1077_v17 = vadd.f32 %v1076_v15, %v987_v14  ;;  %v901_v19 = vadd.f32 %v900_v18, %v811_v16 }
 0x165   : > { %1147 = vst [vmem:[#allocation2 + $0x1f0] sm:$0xff] %v1077_v17  ;;  %v1383_v23 = vmul.f32 %v1310_v20, %v901_v19 }
 0x166   : > { %1148 = vst [vmem:[#allocation2 + $0xe8] sm:$0xff] %v901_v19 }
 0x167   : > { %v5488_v24 = vpack.c.bf16 %v1383_v23, %v1382_v22 }
 0x169   : > { %v989_v25 = vpop.f32.mrf.mxu2  ;;  %5764 = vst [vmem:[#allocation3 + $0x10] sm:$0xff] %v5488_v24   ;;  %v814_v27 = vpop.f32.mrf.mxu0 }
 0x16a   : > { %v1078_v26 = vpop.f32.mrf.mxu3  ;;  %v903_v29 = vpop.f32.mrf.mxu1 }
 0x16b   : > { %v1079_v28 = vadd.f32 %v1078_v26, %v989_v25  ;;  %v904_v30 = vadd.f32 %v903_v29, %v814_v27  ;;  %v1345_v24 = vpop.permute.xlu1 %1344  ;;  %v1350_v25 = vpop.permute.xlu2 %1349 }
 0x16d   : > { %1149 = vst [vmem:[#allocation2 + $0x78] sm:$0xff] %v1079_v28  ;;  %v1384_v39 = vmul.f32 %v1315_v37, %v904_v30 }
 0x16e   : > { %1150 = vst [vmem:[#allocation2 + $0x70] sm:$0xff] %v904_v30 }
 0x171   : > { %v992_v31 = vpop.f32.mrf.mxu2  ;;  %v816_v33 = vpop.f32.mrf.mxu0 }
 0x172   : > { %v1081_v32 = vpop.f32.mrf.mxu3  ;;  %v905_v35 = vpop.f32.mrf.mxu1 }
 0x173   : > { %v1082_v34 = vadd.f32 %v1081_v32, %v992_v31  ;;  %v906_v36 = vadd.f32 %v905_v35, %v816_v33 }
 0x175   : > { %1151 = vst [vmem:[#allocation2 + $0x90] sm:$0xff] %v1082_v34  ;;  %v1385_v40 = vmul.f32 %v1320_v38, %v906_v36 }
 0x176   : > { %1152 = vst [vmem:[#allocation2 + $0x1d8] sm:$0xff] %v906_v36 }
 0x177   : > { %v5493_v41 = vpack.c.bf16 %v1385_v40, %v1384_v39 }
 0x179   : > { %v994_v42 = vpop.f32.mrf.mxu2  ;;  %5765 = vst [vmem:[#allocation3 + $0x40] sm:$0xff] %v5493_v41   ;;  %v819_v44 = vpop.f32.mrf.mxu0 }
 0x17a   : > { %v1083_v43 = vpop.f32.mrf.mxu3  ;;  %v908_v46 = vpop.f32.mrf.mxu1 }
 0x17b   : > { %v1084_v45 = vadd.f32 %v1083_v43, %v994_v42  ;;  %v909_v47 = vadd.f32 %v908_v46, %v819_v44  ;;  %v1360_v41 = vpop.permute.xlu1 %1359  ;;  %v1355_v42 = vpop.permute.xlu0 %1354 }
 0x17d   : > { %1153 = vst [vmem:[#allocation2 + $0xd0] sm:$0xff] %v1084_v45  ;;  %v1386_v56 = vmul.f32 %v1325_v55, %v909_v47 }
 0x17e   : > { %1154 = vst [vmem:[#allocation2 + $0xb8] sm:$0xff] %v909_v47 }
 0x181   : > { %v997_v48 = vpop.f32.mrf.mxu2  ;;  %v821_v50 = vpop.f32.mrf.mxu0 }
 0x182   : > { %v1086_v49 = vpop.f32.mrf.mxu3  ;;  %v910_v52 = vpop.f32.mrf.mxu1 }
 0x183   : > { %v1087_v51 = vadd.f32 %v1086_v49, %v997_v48  ;;  %v911_v53 = vadd.f32 %v910_v52, %v821_v50 }
 0x185   : > { %1155 = vst [vmem:[#allocation2 + $0x88] sm:$0xff] %v1087_v51  ;;  %v1387_v57 = vmul.f32 %v1330_v54, %v911_v53 }
 0x186   : > { %1156 = vst [vmem:[#allocation2 + $0xa8] sm:$0xff] %v911_v53 }
 0x187   : > { %v5498_v58 = vpack.c.bf16 %v1387_v57, %v1386_v56 }
 0x189   : > { %v999_v59 = vpop.f32.mrf.mxu2  ;;  %5766 = vst [vmem:[#allocation3] sm:$0xff] %v5498_v58   ;;  %v824_v61 = vpop.f32.mrf.mxu0 }
 0x18a   : > { %v1088_v60 = vpop.f32.mrf.mxu3  ;;  %v913_v63 = vpop.f32.mrf.mxu1 }
 0x18b   : > { %v1089_v62 = vadd.f32 %v1088_v60, %v999_v59  ;;  %v914_v0 = vadd.f32 %v913_v63, %v824_v61 }
 0x18d   : > { %1157 = vst [vmem:[#allocation2 + $0x1c8] sm:$0xff] %v1089_v62  ;;  %v1388_v9 = vmul.f32 %v1335_v8, %v914_v0 }
 0x18e   : > { %1158 = vst [vmem:[#allocation2 + $0x170] sm:$0xff] %v914_v0 }
 0x191   : > { %v1002_v1 = vpop.f32.mrf.mxu2  ;;  %v826_v3 = vpop.f32.mrf.mxu0 }
 0x192   : > { %v1091_v2 = vpop.f32.mrf.mxu3  ;;  %v915_v5 = vpop.f32.mrf.mxu1 }
 0x193   : > { %v1092_v4 = vadd.f32 %v1091_v2, %v1002_v1  ;;  %v916_v6 = vadd.f32 %v915_v5, %v826_v3 }
 0x195   : > { %1159 = vst [vmem:[#allocation2 + $0x178] sm:$0xff] %v1092_v4  ;;  %v1389_v10 = vmul.f32 %v1340_v7, %v916_v6 }
 0x196   : > { %1160 = vst [vmem:[#allocation2 + $0x68] sm:$0xff] %v916_v6 }
 0x197   : > { %v5503_v11 = vpack.c.bf16 %v1389_v10, %v1388_v9 }
 0x199   : > { %v1004_v12 = vpop.f32.mrf.mxu2  ;;  %5767 = vst [vmem:[#allocation3 + $0x78] sm:$0xff] %v5503_v11   ;;  %v829_v14 = vpop.f32.mrf.mxu0 }
 0x19a   : > { %v1093_v13 = vpop.f32.mrf.mxu3  ;;  %v918_v16 = vpop.f32.mrf.mxu1 }
 0x19b   : > { %v1094_v15 = vadd.f32 %v1093_v13, %v1004_v12  ;;  %v919_v17 = vadd.f32 %v918_v16, %v829_v14 }
 0x19d   : > { %1161 = vst [vmem:[#allocation2 + $0x190] sm:$0xff] %v1094_v15  ;;  %v1390_v26 = vmul.f32 %v1345_v24, %v919_v17 }
 0x19e   : > { %1162 = vst [vmem:[#allocation2 + $0x198] sm:$0xff] %v919_v17 }
 0x1a1   : > { %v1007_v18 = vpop.f32.mrf.mxu2  ;;  %v831_v20 = vpop.f32.mrf.mxu0 }
 0x1a2   : > { %v1096_v19 = vpop.f32.mrf.mxu3  ;;  %v920_v22 = vpop.f32.mrf.mxu1 }
 0x1a3   : > { %v1097_v21 = vadd.f32 %v1096_v19, %v1007_v18  ;;  %v921_v23 = vadd.f32 %v920_v22, %v831_v20 }
 0x1a5   : > { %1163 = vst [vmem:[#allocation2 + $0x38] sm:$0xff] %v1097_v21  ;;  %v1391_v27 = vmul.f32 %v1350_v25, %v921_v23 }
 0x1a6   : > { %1164 = vst [vmem:[#allocation2 + $0xc0] sm:$0xff] %v921_v23 }
 0x1a7   : > { %v5508_v28 = vpack.c.bf16 %v1391_v27, %v1390_v26 }
 0x1a9   : > { %v1009_v29 = vpop.f32.mrf.mxu2  ;;  %5768 = vst [vmem:[#allocation3 + $0x38] sm:$0xff] %v5508_v28   ;;  %v834_v31 = vpop.f32.mrf.mxu0 }
 0x1aa   : > { %v1098_v30 = vpop.f32.mrf.mxu3  ;;  %v923_v33 = vpop.f32.mrf.mxu1 }
 0x1ab   : > { %v1099_v32 = vadd.f32 %v1098_v30, %v1009_v29  ;;  %v924_v34 = vadd.f32 %v923_v33, %v834_v31 }
 0x1ad   : > { %1165 = vst [vmem:[#allocation2 + $0x1c0] sm:$0xff] %v1099_v32  ;;  %v1392_v43 = vmul.f32 %v1355_v42, %v924_v34 }
 0x1ae   : > { %1166 = vst [vmem:[#allocation2 + $0x158] sm:$0xff] %v924_v34 }
 0x1b1   : > { %v1012_v35 = vpop.f32.mrf.mxu2  ;;  %v836_v37 = vpop.f32.mrf.mxu0 }
 0x1b2   : > { %v1101_v36 = vpop.f32.mrf.mxu3  ;;  %v925_v39 = vpop.f32.mrf.mxu1 }
 0x1b3   : > { %v1102_v38 = vadd.f32 %v1101_v36, %v1012_v35  ;;  %v926_v40 = vadd.f32 %v925_v39, %v836_v37 }
 0x1b5   : > { %1167 = vst [vmem:[#allocation2 + $0x10] sm:$0xff] %v1102_v38  ;;  %v1393_v44 = vmul.f32 %v1360_v41, %v926_v40 }
 0x1b6   : > { %1168 = vst [vmem:[#allocation2 + $0x58] sm:$0xff] %v926_v40 }
 0x1b7   : > { %v5513_v45 = vpack.c.bf16 %v1393_v44, %v1392_v43 }
 0x1b9   : > { %v1014_v46 = vpop.f32.mrf.mxu2  ;;  %5769 = vst [vmem:[#allocation3 + $0x28] sm:$0xff] %v5513_v45  }
 0x1ba   : > { %v1103_v47 = vpop.f32.mrf.mxu3 }
 0x1bb   : > { %v1104_v48 = vadd.f32 %v1103_v47, %v1014_v46 }
 0x1bd   : > { %1169 = vst [vmem:[#allocation2 + $0xa0] sm:$0xff] %v1104_v48 }
 0x1be PF: > { %p4520_p8 = scmp.ne.s32.totalorder %s6087_s27, 0 }
 0x1c0   : > { %1460 = sbr.rel (%p4520_p8) target bundleno = 759 (0x2f7), region = 72 }
 0x1c5   : > { %v6318_v49 = vld [vmem:[%s7399_s2 + $0x20] sm:$0xff]  ;;  %v6323_v50 = vld [vmem:[%s7399_s2 + $0x10] sm:$0xff]  ;;  %v6105_v52 = vmov 0   ;;  %v5305_v53 = vld [vmem:[#allocation3 + $0x30] sm:$0xff] }
 0x1c6   : > { %v6328_v51 = vld [vmem:[%s7399_s2] sm:$0xff]  ;;  %5937 = vset.pattern.permute.xlu2 %v6105_v52  ;;  %5936 = vset.pattern.permute.xlu1 %v6105_v52  ;;  %v5313_v54 = vld [vmem:[#allocation3 + $0x28] sm:$0xff]  ;;  %v6336_v57 = vld [vmem:[%s7399_s2 + $0x28] sm:$0xff] }
 0x1c7   : > { %5935 = vset.pattern.permute.xlu0 %v6105_v52  ;;  %2083 = vperm.xlu2 %5937, %v6318_v49   ;;  %v5304_v55 = vld [vmem:[#allocation3 + $0x18] sm:$0xff]  ;;  %v6341_v58 = vld [vmem:[%s7399_s2 + $0x18] sm:$0xff]  ;;  %v6346_v59 = vld [vmem:[%s7399_s2 + $0x8] sm:$0xff] }
 0x1c8   : > { %2073 = vperm.xlu1 %5936, %v6323_v50   ;;  %2063 = vperm.xlu0 %5935, %v6328_v51   ;;  %v5312_v56 = vld [vmem:[#allocation3 + $0x38] sm:$0xff]  ;;  %v5302_v62 = vld [vmem:[#allocation3 + $0x8] sm:$0xff]  ;;  %v5310_v63 = vld [vmem:[#allocation3] sm:$0xff] }
 0x1c9   : > { %1781 = vmatpush.bf16.msra.mxu0 %v5305_v53  ;;  %5815 = vmatpush.bf16.msra.mxu2 %v5305_v53  ;;  %v5303_v60 = vld [vmem:[#allocation3 + $0x58] sm:$0xff]  ;;  %v6359_v1 = vld [vmem:[%s7399_s2 + $0x38] sm:$0xff]  ;;  %v6364_v2 = vld [vmem:[%s7399_s2 + $0x30] sm:$0xff] }
 0x1ca   : > { %1870 = vmatpush.bf16.msra.mxu1 %v5313_v54  ;;  %5823 = vmatpush.bf16.msra.mxu3 %v5313_v54  ;;  %v5311_v61 = vld [vmem:[#allocation3 + $0x78] sm:$0xff]  ;;  %v5301_v3 = vld [vmem:[#allocation3 + $0x60] sm:$0xff]  ;;  %v5300_v5 = vld [vmem:[#allocation3 + $0x70] sm:$0xff] }
 0x1cb   : > { %v6354_v0 = vld [vmem:[%s7399_s2 + $0x40] sm:$0xff]  ;;  %v5309_v4 = vld [vmem:[#allocation3 + $0x40] sm:$0xff]  ;;  %v5308_v6 = vld [vmem:[#allocation3 + $0x10] sm:$0xff] }
 0x1cc   : > { %v6372_v7 = vld [vmem:[%s7399_s2 + $0x58] sm:$0xff]  ;;  %v6377_v8 = vld [vmem:[%s7399_s2 + $0x50] sm:$0xff]  ;;  %v6382_v9 = vld [vmem:[%s7399_s2 + $0x48] sm:$0xff] }
 0x1cd   : > { %1782 = vmatpush.bf16.msra.mxu0 %v5304_v55  ;;  %5816 = vmatpush.bf16.msra.mxu2 %v5304_v55  ;;  %v5299_v10 = vld [vmem:[#allocation3 + $0x50] sm:$0xff]  ;;  %v5307_v11 = vld [vmem:[#allocation3 + $0x20] sm:$0xff]  ;;  %v5298_v12 = vld [vmem:[#allocation3 + $0x68] sm:$0xff] }
 0x1ce   : > { %1871 = vmatpush.bf16.msra.mxu1 %v5312_v56  ;;  %5824 = vmatpush.bf16.msra.mxu3 %v5312_v56  ;;  %v5306_v13 = vld [vmem:[#allocation3 + $0x48] sm:$0xff]  ;;  %v4523_v14 = vld [vmem:[%s7397_s0] sm:$0xf]  ;;  %v5267_v15 = vld [vmem:[%s7397_s0 + $0x4] sm:$0xf0] }
 0x1cf   : > { %2088 = vperm.xlu2 %5937, %v6336_v57   ;;  %v4587_v16 = vld [vmem:[%s7397_s0 + $0x80] sm:$0xf]  ;;  %v5283_v17 = vld [vmem:[%s7397_s0 + $0x84] sm:$0xf0]  ;;  %v5266_v18 = vld [vmem:[%s7397_s0 + $0x4] sm:$0xf]  ;;  %v4524_v25 = vor.u32 %v5267_v15, %v4523_v14 }
 0x1d0   : > { %2078 = vperm.xlu1 %5936, %v6341_v58   ;;  %2068 = vperm.xlu0 %5935, %v6346_v59   ;;  %v4525_v19 = vld [vmem:[%s7397_s0 + $0x8] sm:$0xf0]  ;;  %v5282_v20 = vld [vmem:[%s7397_s0 + $0x84] sm:$0xf]  ;;  %v6414_v22 = vld [vmem:[%s7399_s2 + $0x70] sm:$0xff]  ;;  %v4588_v26 = vor.u32 %v5283_v17, %v4587_v16 }
 0x1d1   : > { %1783 = vmatpush.bf16.msra.mxu0 %v5303_v60  ;;  %5817 = vmatpush.bf16.msra.mxu2 %v5303_v60  ;;  %v4589_v21 = vld [vmem:[%s7397_s0 + $0x88] sm:$0xf0]  ;;  %v6424_v24 = vld [vmem:[%s7399_s2 + $0x60] sm:$0xff]  ;;  %v4528_v27 = vor.u32 %v5266_v18, %v4525_v19  ;;  %v6442_v31 = vld [vmem:[%s7399_s2 + $0x78] sm:$0xff] }
 0x1d2   : > { %1872 = vmatpush.bf16.msra.mxu1 %v5311_v61  ;;  %5825 = vmatpush.bf16.msra.mxu3 %v5311_v61  ;;  %v6419_v23 = vld [vmem:[%s7399_s2 + $0x68] sm:$0xff]  ;;  %v4592_v28 = vor.u32 %v5282_v20, %v4589_v21  ;;  %v6437_v30 = vld [vmem:[%s7399_s2 + $0x80] sm:$0xff]  ;;  %v4531_v32 = vld [vmem:[%s7397_s0 + $0x10] sm:$0xf] }
 0x1d3   : > { %v6432_v29 = vld [vmem:[%s7399_s2 + $0x88] sm:$0xff]  ;;  %v5269_v33 = vld [vmem:[%s7397_s0 + $0x14] sm:$0xf0]  ;;  %v4595_v34 = vld [vmem:[%s7397_s0 + $0x90] sm:$0xf] }
 0x1d4   : > { %v5285_v35 = vld [vmem:[%s7397_s0 + $0x94] sm:$0xf0]  ;;  %v5268_v36 = vld [vmem:[%s7397_s0 + $0x14] sm:$0xf]  ;;  %v4533_v37 = vld [vmem:[%s7397_s0 + $0x18] sm:$0xf0]  ;;  %v4532_v43 = vor.u32 %v5269_v33, %v4531_v32 }
 0x1d5   : > { %1784 = vmatpush.bf16.msra.mxu0 %v5302_v62  ;;  %5818 = vmatpush.bf16.msra.mxu2 %v5302_v62  ;;  %v5284_v38 = vld [vmem:[%s7397_s0 + $0x94] sm:$0xf]  ;;  %v4597_v39 = vld [vmem:[%s7397_s0 + $0x98] sm:$0xf0]  ;;  %v6474_v40 = vld [vmem:[%s7399_s2 + $0xa0] sm:$0xff]  ;;  %v4596_v44 = vor.u32 %v5285_v35, %v4595_v34  ;;  %v4536_v45 = vor.u32 %v5268_v36, %v4533_v37  ;;  %v6106_v36 = vmov 2  }
 0x1d6   : > { %1873 = vmatpush.bf16.msra.mxu1 %v5310_v63  ;;  %5826 = vmatpush.bf16.msra.mxu3 %v5310_v63  ;;  %v6479_v41 = vld [vmem:[%s7399_s2 + $0x98] sm:$0xff]  ;;  %v6484_v42 = vld [vmem:[%s7399_s2 + $0x90] sm:$0xff]  ;;  %v4600_v46 = vor.u32 %v5284_v38, %v4597_v39  ;;  %v6502_v52 = vld [vmem:[%s7399_s2 + $0xa8] sm:$0xff] }
 0x1d7   : > { %2103 = vperm.xlu2 %5937, %v6354_v0   ;;  %v6492_v47 = vld [vmem:[%s7399_s2 + $0xb8] sm:$0xff]  ;;  %v6497_v48 = vld [vmem:[%s7399_s2 + $0xb0] sm:$0xff]  ;;  %v4539_v53 = vld [vmem:[%s7397_s0 + $0x20] sm:$0xf] }
 0x1d8   : > { %2098 = vperm.xlu1 %5936, %v6359_v1   ;;  %2093 = vperm.xlu0 %5935, %v6364_v2   ;;  %v5271_v54 = vld [vmem:[%s7397_s0 + $0x24] sm:$0xf0]  ;;  %v4603_v55 = vld [vmem:[%s7397_s0 + $0xa0] sm:$0xf]  ;;  %v5270_v60 = vld [vmem:[%s7397_s0 + $0x24] sm:$0xf] }
 0x1d9   : > { %1785 = vmatpush.bf16.msra.mxu0 %v5301_v3  ;;  %5819 = vmatpush.bf16.msra.mxu2 %v5301_v3  ;;  %v5287_v56 = vld [vmem:[%s7397_s0 + $0xa4] sm:$0xf0]  ;;  %v4541_v61 = vld [vmem:[%s7397_s0 + $0x28] sm:$0xf0]  ;;  %v5286_v62 = vld [vmem:[%s7397_s0 + $0xa4] sm:$0xf] }
 0x1da   : > { %1874 = vmatpush.bf16.msra.mxu1 %v5309_v4  ;;  %5827 = vmatpush.bf16.msra.mxu3 %v5309_v4  ;;  %v4605_v63 = vld [vmem:[%s7397_s0 + $0xa8] sm:$0xf0]  ;;  %v6534_v3 = vld [vmem:[%s7399_s2 + $0xd0] sm:$0xff]  ;;  %v6557_v14 = vld [vmem:[%s7399_s2 + $0xe0] sm:$0xff] }
 0x1db   : > { %v6539_v4 = vld [vmem:[%s7399_s2 + $0xc8] sm:$0xff]  ;;  %v6562_v15 = vld [vmem:[%s7399_s2 + $0xd8] sm:$0xff]  ;;  %v4547_v16 = vld [vmem:[%s7397_s0 + $0x30] sm:$0xf] }
 0x1dc   : > { %v5273_v17 = vld [vmem:[%s7397_s0 + $0x34] sm:$0xf0]  ;;  %v4611_v18 = vld [vmem:[%s7397_s0 + $0xb0] sm:$0xf]  ;;  %v5272_v20 = vld [vmem:[%s7397_s0 + $0x34] sm:$0xf] }
 0x1dd   : > { %1786 = vmatpush.bf16.msra.mxu0 %v5300_v5  ;;  %5820 = vmatpush.bf16.msra.mxu2 %v5300_v5  ;;  %v6544_v5 = vld [vmem:[%s7399_s2 + $0xc0] sm:$0xff]  ;;  %v5289_v19 = vld [vmem:[%s7397_s0 + $0xb4] sm:$0xf0]  ;;  %v4549_v21 = vld [vmem:[%s7397_s0 + $0x38] sm:$0xf0]  ;;  %v4548_v32 = vor.u32 %v5273_v17, %v4547_v16 }
 0x1de   : > { %1875 = vmatpush.bf16.msra.mxu1 %v5308_v6  ;;  %5828 = vmatpush.bf16.msra.mxu3 %v5308_v6  ;;  %v4540_v6 = vor.u32 %v5271_v54, %v4539_v53  ;;  %v4612_v33 = vor.u32 %v5289_v19, %v4611_v18  ;;  %v4552_v34 = vor.u32 %v5272_v20, %v4549_v21  ;;  %v4555_v38 = vld [vmem:[%s7397_s0 + $0x40] sm:$0xf]  ;;  %v5275_v39 = vld [vmem:[%s7397_s0 + $0x44] sm:$0xf0] }
 0x1df   : > { %2118 = vperm.xlu2 %5937, %v6372_v7   ;;  %v4571_v18 = vld [vmem:[%s7397_s0 + $0x60] sm:$0xf]  ;;  %v5279_v19 = vld [vmem:[%s7397_s0 + $0x64] sm:$0xf0] }
 0x1e0   : > { %2113 = vperm.xlu1 %5936, %v6377_v8   ;;  %2108 = vperm.xlu0 %5935, %v6382_v9  }
 0x1e1   : > { %1787 = vmatpush.bf16.msra.mxu0 %v5299_v10  ;;  %5821 = vmatpush.bf16.msra.mxu2 %v5299_v10  ;;  %v4604_v10 = vor.u32 %v5287_v56, %v4603_v55 }
 0x1e2   : > { %1876 = vmatpush.bf16.msra.mxu1 %v5307_v11  ;;  %5829 = vmatpush.bf16.msra.mxu3 %v5307_v11  ;;  %v4544_v11 = vor.u32 %v5270_v60, %v4541_v61  ;;  %v4563_v60 = vld [vmem:[%s7397_s0 + $0x50] sm:$0xf]  ;;  %v5277_v61 = vld [vmem:[%s7397_s0 + $0x54] sm:$0xf0] }
 0x1e5   : > { %1788 = vmatpush.bf16.msra.mxu0 %v5298_v12  ;;  %5822 = vmatpush.bf16.msra.mxu2 %v5298_v12  ;;  %v4608_v12 = vor.u32 %v5286_v62, %v4605_v63  ;;  %v4627_v62 = vld [vmem:[%s7397_s0 + $0xd0] sm:$0xf]  ;;  %v5292_v63 = vld [vmem:[%s7397_s0 + $0xd4] sm:$0xf] }
 0x1e6   : > { %1877 = vmatpush.bf16.msra.mxu1 %v5306_v13  ;;  %5830 = vmatpush.bf16.msra.mxu3 %v5306_v13  ;;  %v6552_v13 = vld [vmem:[%s7399_s2 + $0xe8] sm:$0xff] }
 0x1e7   : > { %2133 = vperm.xlu2 %5937, %v6414_v22  }
 0x1e8   : > { %2128 = vperm.xlu1 %5936, %v6419_v23   ;;  %2123 = vperm.xlu0 %5935, %v6424_v24  }
 0x1e9   : > { %1789 = vmatmul.bf16.vlgmr.msra.gmra.mxu0 %v4524_v25  ;;  %1829 = vmatmul.bf16.vlgmr.msra.gmra.mxu2 %v4588_v26  ;;  %v5288_v25 = vld [vmem:[%s7397_s0 + $0xb4] sm:$0xf]  ;;  %v4613_v26 = vld [vmem:[%s7397_s0 + $0xb8] sm:$0xf0] }
 0x1ea   : > { %1878 = vmatmul.bf16.vlgmr.msra.gmra.mxu1 %v4528_v27  ;;  %1918 = vmatmul.bf16.vlgmr.msra.gmra.mxu3 %v4592_v28  ;;  %v6594_v27 = vld [vmem:[%s7399_s2 + $0xf8] sm:$0xff]  ;;  %v6599_v28 = vld [vmem:[%s7399_s2 + $0xf0] sm:$0xff]  ;;  %v4616_v35 = vor.u32 %v5288_v25, %v4613_v26  ;;  %v4573_v25 = vld [vmem:[%s7397_s0 + $0x68] sm:$0xf0] }
 0x1eb   : > { %v5294_v26 = vld [vmem:[%s7397_s0 + $0xe4] sm:$0xf] }
 0x1ef   : > { %2148 = vperm.xlu2 %5937, %v6432_v29  }
 0x1f0   : > { %2143 = vperm.xlu1 %5936, %v6437_v30   ;;  %2138 = vperm.xlu0 %5935, %v6442_v31  }
 0x1f7   : > { %2163 = vperm.xlu2 %5937, %v6474_v40  }
 0x1f8   : > { %2158 = vperm.xlu1 %5936, %v6479_v41   ;;  %2153 = vperm.xlu0 %5935, %v6484_v42  }
 0x1f9   : > { %1794 = vmatmul.bf16.gmra.mxu0 %v4532_v43  ;;  %1834 = vmatmul.bf16.gmra.mxu2 %v4596_v44  ;;  %v4557_v43 = vld [vmem:[%s7397_s0 + $0x48] sm:$0xf0]  ;;  %v5290_v44 = vld [vmem:[%s7397_s0 + $0xc4] sm:$0xf] }
 0x1fa   : > { %1883 = vmatmul.bf16.gmra.mxu1 %v4536_v45  ;;  %1923 = vmatmul.bf16.gmra.mxu3 %v4600_v46  ;;  %v4621_v45 = vld [vmem:[%s7397_s0 + $0xc8] sm:$0xf0]  ;;  %v4556_v46 = vor.u32 %v5275_v39, %v4555_v38  ;;  %v4579_v39 = vld [vmem:[%s7397_s0 + $0x70] sm:$0xf] }
 0x1fb   : > { %v4624_v55 = vor.u32 %v5290_v44, %v4621_v45  ;;  %v5296_v44 = vld [vmem:[%s7397_s0 + $0xf4] sm:$0xf]  ;;  %v4645_v45 = vld [vmem:[%s7397_s0 + $0xf8] sm:$0xf0] }
 0x1ff   : > { %2178 = vperm.xlu2 %5937, %v6492_v47  }
 0x200   : > { %2173 = vperm.xlu1 %5936, %v6497_v48   ;;  %2168 = vperm.xlu0 %5935, %v6502_v52  }
 0x207   : > { %2193 = vperm.xlu2 %5937, %v6534_v3  }
 0x208   : > { %2188 = vperm.xlu1 %5936, %v6539_v4   ;;  %2183 = vperm.xlu0 %5935, %v6544_v5  }
 0x209   : > { %1799 = vmatmul.bf16.gmra.mxu0 %v4540_v6  ;;  %1839 = vmatmul.bf16.gmra.mxu2 %v4604_v10  ;;  %v4629_v6 = vld [vmem:[%s7397_s0 + $0xd8] sm:$0xf0]  ;;  %v4564_v10 = vor.u32 %v5277_v61, %v4563_v60 }
 0x20a   : > { %1888 = vmatmul.bf16.gmra.mxu1 %v4544_v11  ;;  %1928 = vmatmul.bf16.gmra.mxu3 %v4608_v12 }
 0x20f   : > { %2208 = vperm.xlu2 %5937, %v6552_v13  }
 0x210   : > { %2203 = vperm.xlu1 %5936, %v6557_v14   ;;  %2198 = vperm.xlu0 %5935, %v6562_v15  }
 0x217   : > { %5938 = vset.pattern.permute.xlu2 %v6106_v36 }
 0x218   : > { %2218 = vperm.xlu1 %5936, %v6594_v27   ;;  %2213 = vperm.xlu0 %5935, %v6599_v28  }
 0x219   : > { %1804 = vmatmul.bf16.gmra.mxu0 %v4548_v32  ;;  %1844 = vmatmul.bf16.gmra.mxu2 %v4612_v33  ;;  %v4637_v32 = vld [vmem:[%s7397_s0 + $0xe8] sm:$0xf0]  ;;  %v4572_v33 = vor.u32 %v5279_v19, %v4571_v18 }
 0x21a   : > { %1893 = vmatmul.bf16.gmra.mxu1 %v4552_v34  ;;  %1933 = vmatmul.bf16.gmra.mxu3 %v4616_v35 }
 0x21b   : > { %2254 = vperm.xlu2 %5938, %v6328_v51   ;;  %v4619_v51 = vld [vmem:[%s7397_s0 + $0xc0] sm:$0xf] }
 0x220   : > { %5940 = vset.pattern.permute.xlu1 %v6106_v36  ;;  %5939 = vset.pattern.permute.xlu0 %v6106_v36 }
 0x221   : > { %2262 = vperm.xlu1 %5940, %v6323_v50   ;;  %2258 = vperm.xlu0 %5939, %v6346_v59   ;;  %v6606_v37 = vpop.permute.xlu2 %2083  ;;  %v5291_v50 = vld [vmem:[%s7397_s0 + $0xc4] sm:$0xf0]  ;;  %v5274_v59 = vld [vmem:[%s7397_s0 + $0x44] sm:$0xf] }
 0x222   : > { %v4620_v53 = vor.u32 %v5291_v50, %v4619_v51  ;;  %v4560_v54 = vor.u32 %v5274_v59, %v4557_v43  ;;  %v5281_v51 = vld [vmem:[%s7397_s0 + $0x74] sm:$0xf0]  ;;  %v4581_v43 = vld [vmem:[%s7397_s0 + $0x78] sm:$0xf0] }
 0x223   : > { %2266 = vperm.xlu2 %5938, %v6341_v58  }
 0x229   : > { %1809 = vmatmul.bf16.gmra.mxu0 %v4556_v46  ;;  %1849 = vmatmul.bf16.gmra.mxu2 %v4620_v53  ;;  %v6633_v56 = vpop.permute.xlu2 %2088  ;;  %v4580_v46 = vor.u32 %v5281_v51, %v4579_v39 }
 0x22a   : > { %1898 = vmatmul.bf16.gmra.mxu1 %v4560_v54  ;;  %1938 = vmatmul.bf16.gmra.mxu3 %v4624_v55 }
 0x22b   : > { %2270 = vperm.xlu1 %5940, %v6318_v49   ;;  %2274 = vperm.xlu2 %5938, %v6336_v57   ;;  %v5293_v49 = vld [vmem:[%s7397_s0 + $0xd4] sm:$0xf0]  ;;  %v5276_v57 = vld [vmem:[%s7397_s0 + $0x54] sm:$0xf] }
 0x22c   : > { %2278 = vperm.xlu0 %5939, %v6364_v2   ;;  %v4565_v2 = vld [vmem:[%s7397_s0 + $0x58] sm:$0xf0]  ;;  %v4628_v11 = vor.u32 %v5293_v49, %v4627_v62 }
 0x22d   : > { %v4568_v12 = vor.u32 %v5276_v57, %v4565_v2 }
 0x231   : > { %v6638_v58 = vpop.permute.xlu2 %2103 }
 0x233   : > { %2282 = vperm.xlu1 %5940, %v6359_v1   ;;  %2286 = vperm.xlu2 %5938, %v6354_v0   ;;  %v4632_v1 = vor.u32 %v5292_v63, %v4629_v6 }
 0x234   : > { %2290 = vperm.xlu0 %5939, %v6382_v9  }
 0x239   : > { %1814 = vmatmul.bf16.gmra.mxu0 %v4564_v10  ;;  %1854 = vmatmul.bf16.gmra.mxu2 %v4628_v11  ;;  %v6667_v0 = vpop.permute.xlu2 %2118 }
 0x23a   : > { %1903 = vmatmul.bf16.gmra.mxu1 %v4568_v12  ;;  %1943 = vmatmul.bf16.gmra.mxu3 %v4632_v1  ;;  %v6669_v16 = vpop.permute.xlu1 %2073  ;;  %v6671_v17 = vpop.permute.xlu0 %2063 }
 0x23b   : > { %2294 = vperm.xlu1 %5940, %v6377_v8   ;;  %2298 = vperm.xlu2 %5938, %v6372_v7   ;;  %v4635_v7 = vld [vmem:[%s7397_s0 + $0xe0] sm:$0xf]  ;;  %v5295_v8 = vld [vmem:[%s7397_s0 + $0xe4] sm:$0xf0] }
 0x23c   : > { %2302 = vperm.xlu0 %5939, %v6424_v24   ;;  %v5278_v24 = vld [vmem:[%s7397_s0 + $0x64] sm:$0xf]  ;;  %v4636_v34 = vor.u32 %v5295_v8, %v4635_v7  ;;  %v1998_v8 = vld [vmem:[#allocation2 + $0x1b0] sm:$0xff] }
 0x23d   : > { %v4576_v35 = vor.u32 %v5278_v24, %v4573_v25  ;;  %v6791_v25 = vld [vmem:[%s7402_s5] ss:$0 sm:$0xff] }
 0x241   : > { %v6676_v9 = vpop.permute.xlu2 %2133 }
 0x242   : > { %v6684_v20 = vpop.permute.xlu1 %2078  ;;  %v6686_v21 = vpop.permute.xlu0 %2068 }
 0x243   : > { %2306 = vperm.xlu1 %5940, %v6419_v23   ;;  %2310 = vperm.xlu2 %5938, %v6414_v22   ;;  %v4640_v23 = vor.u32 %v5294_v26, %v4637_v32 }
 0x244   : > { %2314 = vperm.xlu0 %5939, %v6442_v31  }
 0x249   : > { %1819 = vmatmul.bf16.gmra.mxu0 %v4572_v33  ;;  %1859 = vmatmul.bf16.gmra.mxu2 %v4636_v34  ;;  %v6709_v22 = vpop.permute.xlu2 %2148 }
 0x24a   : > { %1908 = vmatmul.bf16.gmra.mxu1 %v4576_v35  ;;  %1948 = vmatmul.bf16.gmra.mxu3 %v4640_v23  ;;  %v6711_v36 = vpop.permute.xlu1 %2098  ;;  %v6713_v38 = vpop.permute.xlu0 %2093 }
 0x24b   : > { %2318 = vperm.xlu1 %5940, %v6437_v30   ;;  %2322 = vperm.xlu2 %5938, %v6432_v29   ;;  %v4643_v29 = vld [vmem:[%s7397_s0 + $0xf0] sm:$0xf]  ;;  %v5297_v30 = vld [vmem:[%s7397_s0 + $0xf4] sm:$0xf0] }
 0x24c   : > { %2326 = vperm.xlu0 %5939, %v6484_v42   ;;  %v5280_v42 = vld [vmem:[%s7397_s0 + $0x74] sm:$0xf]  ;;  %v4644_v53 = vor.u32 %v5297_v30, %v4643_v29 }
 0x24d   : > { %v4584_v54 = vor.u32 %v5280_v42, %v4581_v43 }
 0x251   : > { %v6718_v31 = vpop.permute.xlu2 %2163 }
 0x252   : > { %v6726_v50 = vpop.permute.xlu1 %2113  ;;  %v6728_v59 = vpop.permute.xlu0 %2108 }
 0x253   : > { %2330 = vperm.xlu1 %5940, %v6479_v41   ;;  %2334 = vperm.xlu2 %5938, %v6474_v40   ;;  %v4648_v41 = vor.u32 %v5296_v44, %v4645_v45 }
 0x254   : > { %2338 = vperm.xlu0 %5939, %v6502_v52  }
 0x259   : > { %1824 = vmatmul.bf16.gmra.mxu0 %v4580_v46  ;;  %1864 = vmatmul.bf16.gmra.mxu2 %v4644_v53  ;;  %v6751_v40 = vpop.permute.xlu2 %2178 }
 0x25a   : > { %1913 = vmatmul.bf16.gmra.mxu1 %v4584_v54  ;;  %1953 = vmatmul.bf16.gmra.mxu3 %v4648_v41  ;;  %v6753_v55 = vpop.permute.xlu1 %2128  ;;  %v6755_v60 = vpop.permute.xlu0 %2123  ;;  %v2004_v54 = vld [vmem:[#allocation2 + $0x48] sm:$0xff] }
 0x25b   : > { %2342 = vperm.xlu1 %5940, %v6497_v48   ;;  %2346 = vperm.xlu2 %5938, %v6492_v47  }
 0x25c   : > { %2350 = vperm.xlu0 %5939, %v6544_v5  }
 0x261   : > { %v6760_v52 = vpop.permute.xlu2 %2193 }
 0x262   : > { %v2144_v61 = vpop.permute.xlu1 %2143  ;;  %v6762_v62 = vpop.permute.xlu0 %2138 }
 0x263   : > { %7410 = vst [vmem:[#allocation17_spill] sm:$0xff] %v6762_v62  ;;  %2354 = vperm.xlu1 %5940, %v6539_v4   ;;  %2358 = vperm.xlu2 %5938, %v6534_v3  }
 0x264   : > { %2362 = vperm.xlu0 %5939, %v6562_v15  }
 0x266   : > { %v1790_v49 = vpop.f32.mrf.mxu0 }
 0x267   : > { %v1879_v57 = vpop.f32.mrf.mxu1 }
 0x268   : > { %v1880_v10 = vadd.f32 %v1879_v57, %v1790_v49 }
 0x269   : > { %v6773_v47 = vpop.permute.xlu2 %2208 }
 0x26a   : > { %v6767_v2 = vpop.permute.xlu1 %2158  ;;  %v6769_v48 = vpop.permute.xlu0 %2153 }
 0x26b   : > { %2366 = vperm.xlu1 %5940, %v6557_v14   ;;  %2370 = vperm.xlu2 %5938, %v6552_v13   ;;  %v1997_v14 = vld [vmem:[#allocation2 + $0xb0] sm:$0xff] }
 0x26c   : > { %2374 = vperm.xlu0 %5939, %v6599_v28   ;;  %v1830_v5 = vpop.f32.mrf.mxu2  ;;  %v2221_v28 = vmul.f32 %v6671_v17, %v1880_v10  ;;  %v2003_v17 = vld [vmem:[#allocation2 + $0x130] sm:$0xff] }
 0x26d   : > { %v1919_v4 = vpop.f32.mrf.mxu3 }
 0x26e   : > { %v1920_v63 = vadd.f32 %v1919_v4, %v1830_v5  ;;  %v1792_v3 = vpop.f32.mrf.mxu0 }
 0x26f   : > { %v1881_v6 = vpop.f32.mrf.mxu1 }
 0x270   : > { %v6776_v15 = vmul.f32 %v2144_v61, %v1920_v63 }
 0x272   : > { %v6778_v11 = vpop.permute.xlu1 %2173  ;;  %v6780_v12 = vpop.permute.xlu0 %2168 }
 0x273   : > { %2378 = vperm.xlu1 %5940, %v6594_v27  }
 0x274   : > { %v6783_v13 = vpop.f32.mrf.mxu2 }
 0x275   : > { %v2255_v1 = vpop.permute.xlu2 %2254  ;;  %v6785_v18 = vpop.f32.mrf.mxu3 }
 0x276   : > { %v2381_v19 = vmul.f32 %v2255_v1, %v1997_v14  ;;  %v1795_v7 = vpop.f32.mrf.mxu0 }
 0x277   : > { %v1884_v24 = vpop.f32.mrf.mxu1 }
 0x278   : > { %v2413_v26 = vsub.f32 %v2221_v28, %v2381_v19 }
 0x27a   : > { %v2445_v32 = vadd.f32 %v2413_v26, %v1998_v8  ;;  %v6793_v27 = vpop.permute.xlu1 %2188  ;;  %v6795_v33 = vpop.permute.xlu0 %2183  ;;  %v2007_v8 = vld [vmem:[#allocation2 + $0x118] sm:$0xff] }
 0x27c   : > { %v6798_v34 = vadd.f32 %v6791_v25, %v2445_v32  ;;  %v6800_v35 = vpop.f32.mrf.mxu2 }
 0x27d   : > { %v2267_v23 = vpop.permute.xlu2 %2266  ;;  %v6802_v39 = vpop.f32.mrf.mxu3 }
 0x27e   : > { %v7406_v51 = vmax.f32 %v6798_v34, 0.0  ;;  %v1797_v29 = vpop.f32.mrf.mxu0  ;;  %v2384_v43 = vmul.f32 %v2267_v23, %v2003_v17  ;;  %v1882_v23 = vadd.f32 %v1881_v6, %v1792_v3  ;;  %v2002_v3 = vld [vmem:[#allocation2 + $0x168] sm:$0xff] }
 0x27f   : > { %v1886_v30 = vpop.f32.mrf.mxu1 }
 0x280   : > { %v2611_v42 = vmul.f32 0.1, %v7406_v51  ;;  %v1887_v44 = vadd.f32 %v1886_v30, %v1797_v29  ;;  %v1885_v30 = vadd.f32 %v1884_v24, %v1795_v7  ;;  %v2000_v7 = vld [vmem:[#allocation2 + $0x18] sm:$0xff] }
 0x282   : > { %2644 = vst [vmem:[#allocation4 + $0x18] sm:$0xff] %v2611_v42  ;;  %v2224_v45 = vmul.f32 %v6684_v20, %v1887_v44  ;;  %v6808_v46 = vpop.permute.xlu1 %2203  ;;  %v6810_v53 = vpop.permute.xlu0 %2198  ;;  %v2001_v44 = vld [vmem:[#allocation2 + $0x50] sm:$0xff] }
 0x283   : > { %7411 = vst [vmem:[#allocation18_spill] sm:$0xff] %v6808_v46 }
 0x284   : > { %v2416_v41 = vsub.f32 %v2224_v45, %v2384_v43  ;;  %v6812_v61 = vpop.f32.mrf.mxu2  ;;  %v1999_v45 = vld [vmem:[#allocation2 + $0xd8] sm:$0xff] }
 0x285   : > { %v2275_v49 = vpop.permute.xlu2 %2274  ;;  %v6814_v57 = vpop.f32.mrf.mxu3 }
 0x286   : > { %v2448_v5 = vadd.f32 %v2416_v41, %v2004_v54  ;;  %v1800_v4 = vpop.f32.mrf.mxu0  ;;  %v2386_v42 = vmul.f32 %v2275_v49, %v2007_v8  ;;  %v2222_v41 = vmul.f32 %v6686_v21, %v1882_v23 }
 0x287   : > { %v1889_v63 = vpop.f32.mrf.mxu1 }
 0x288   : > { %v2484_v10 = vadd.f32 %v6791_v25, %v2448_v5  ;;  %v2008_v5 = vld [vmem:[#allocation2 + $0x98] sm:$0xff] }
 0x28a   : > { %v2516_v14 = vmax.f32 %v2484_v10, 0.0  ;;  %v6817_v1 = vpop.permute.xlu1 %2218  ;;  %v6819_v20 = vpop.permute.xlu0 %2213 }
 0x28b   : > { %7412 = vst [vmem:[#allocation19_spill] sm:$0xff] %v6817_v1  ;;  %v2223_v1 = vmul.f32 %v6669_v16, %v1885_v30  ;;  %v1890_v30 = vadd.f32 %v1889_v63, %v1800_v4 }
 0x28c   : > { %7413 = vst [vmem:[#allocation20_spill] sm:$0xff] %v6819_v20  ;;  %v2614_v28 = vmul.f32 0.1, %v2516_v14  ;;  %v6821_v19 = vpop.f32.mrf.mxu2 }
 0x28d   : > { %v6823_v26 = vpop.permute.xlu2 %2286  ;;  %v6825_v32 = vpop.f32.mrf.mxu3 }
 0x28e   : > { %2647 = vst [vmem:[#allocation4] sm:$0xff] %v2614_v28  ;;  %v1802_v17 = vpop.f32.mrf.mxu0 }
 0x28f   : > { %v1891_v29 = vpop.f32.mrf.mxu1 }
 0x290   : > { %v1892_v43 = vadd.f32 %v1891_v29, %v1802_v17 }
 0x292   : > { %v2226_v54 = vmul.f32 %v6633_v56, %v1892_v43 }
 0x293   : > { %v2263_v10 = vpop.permute.xlu1 %2262  ;;  %v2259_v51 = vpop.permute.xlu0 %2258 }
 0x294   : > { %v2418_v62 = vsub.f32 %v2226_v54, %v2386_v42  ;;  %v2383_v20 = vmul.f32 %v2263_v10, %v2001_v44  ;;  %v2382_v28 = vmul.f32 %v2259_v51, %v1999_v45  ;;  %v6830_v46 = vpop.f32.mrf.mxu2 }
 0x295   : > { %v6832_v6 = vpop.permute.xlu2 %2298  ;;  %v6834_v24 = vpop.f32.mrf.mxu3 }
 0x296   : > { %v2450_v49 = vadd.f32 %v2418_v62, %v2008_v5  ;;  %v2415_v56 = vsub.f32 %v2223_v1, %v2383_v20  ;;  %v2414_v8 = vsub.f32 %v2222_v41, %v2382_v28  ;;  %v1805_v21 = vpop.f32.mrf.mxu0  ;;  %v2005_v1 = vld [vmem:[#allocation2 + $0x180] sm:$0xff]  ;;  %v2225_v28 = vmul.f32 %v6606_v37, %v1890_v30 }
 0x297   : > { %v1894_v17 = vpop.f32.mrf.mxu1  ;;  %v2009_v20 = vld [vmem:[#allocation2 + $0x120] sm:$0xff] }
 0x298   : > { %v6837_v23 = vadd.f32 %v6791_v25, %v2450_v49  ;;  %v2447_v16 = vadd.f32 %v2415_v56, %v2002_v3  ;;  %v2446_v29 = vadd.f32 %v2414_v8, %v2000_v7  ;;  %v1895_v44 = vadd.f32 %v1894_v17, %v1805_v21 }
 0x299   : > { %v7414_v3 = vmax.f32 %v6798_v34, 0.0  ;;  %v1922_v34 = vadd.f32 %v6785_v18, %v6783_v13 }
 0x29a   : > { %v2518_v51 = vmax.f32 %v6837_v23, 0.0  ;;  %v2483_v42 = vadd.f32 %v6791_v25, %v2447_v16  ;;  %v2482_v43 = vadd.f32 %v6791_v25, %v2446_v29  ;;  %v2227_v21 = vmul.f32 %v6713_v38, %v1895_v44  ;;  %v2031_v38 = vld [vmem:[#allocation2 + $0x100] sm:$0xff] }
 0x29c   : > { %v2616_v45 = vmul.f32 0.1, %v2518_v51  ;;  %v2515_v54 = vmax.f32 %v2483_v42, 0.0  ;;  %v2514_v62 = vmax.f32 %v2482_v43, 0.0  ;;  %v6842_v41 = vpop.f32.mrf.mxu2  ;;  %v2006_v42 = vld [vmem:[#allocation2 + $0x110] sm:$0xff] }
 0x29d   : > { %v2271_v5 = vpop.permute.xlu1 %2270  ;;  %v6844_v10 = vpop.permute.xlu2 %2310  ;;  %v2010_v43 = vld [vmem:[#allocation2 + $0x150] sm:$0xff] }
 0x29e   : > { %2649 = vst [vmem:[#allocation4 + $0xc0] sm:$0xff] %v2616_v45  ;;  %v5523_v4 = vpack.c.bf16 %v2516_v14, %v2515_v54  ;;  %v2613_v63 = vmul.f32 0.1, %v2515_v54  ;;  %v5518_v7 = vpack.c.bf16 %v2514_v62, %v7414_v3  ;;  %v2279_v49 = vpop.permute.xlu0 %2278  ;;  %v6849_v56 = vpop.f32.mrf.mxu3  ;;  %v2612_v8 = vmul.f32 0.1, %v2514_v62  ;;  %v2011_v62 = vld [vmem:[#allocation2 + $0x108] sm:$0xff] }
 0x29f   : > { %v2385_v17 = vmul.f32 %v2271_v5, %v2005_v1  ;;  %v2387_v23 = vmul.f32 %v2279_v49, %v2009_v20  ;;  %v1807_v16 = vpop.f32.mrf.mxu0  ;;  %v1896_v29 = vpop.f32.mrf.mxu1  ;;  %v2013_v49 = vld [vmem:[#allocation2 + $0xe0] sm:$0xff] }
 0x2a0   : > { %5770 = vst [vmem:[#allocation5 + $0x8] sm:$0xff] %v5523_v4   ;;  %v1897_v30 = vadd.f32 %v1896_v29, %v1807_v16 }
 0x2a1   : > { %2646 = vst [vmem:[#allocation4 + $0x8] sm:$0xff] %v2613_v63  ;;  %v2417_v37 = vsub.f32 %v2225_v28, %v2385_v17  ;;  %v2419_v14 = vsub.f32 %v2227_v21, %v2387_v23  ;;  %v2238_v28 = vmul.f32 %v6709_v22, %v1922_v34  ;;  %v2012_v17 = vld [vmem:[#allocation2 + $0x60] sm:$0xff]  ;;  %v2032_v23 = vld [vmem:[#allocation2 + $0xc8] sm:$0xff]  ;;  %v2389_v22 = vmul.f32 %v6823_v26, %v2013_v49 }
 0x2a2   : > { %5519 = vst [vmem:[#allocation5 + $0x20] sm:$0xff] %v5518_v7   ;;  %v2228_v63 = vmul.f32 %v6711_v36, %v1897_v30 }
 0x2a3   : > { %2645 = vst [vmem:[#allocation4 + $0x70] sm:$0xff] %v2612_v8  ;;  %v2449_v45 = vadd.f32 %v2417_v37, %v2006_v42  ;;  %v2451_v54 = vadd.f32 %v2419_v14, %v2010_v43 }
 0x2a4   : > { %v1847_v44 = vpop.f32.mrf.mxu2 }
 0x2a5   : > { %v2485_v1 = vadd.f32 %v6791_v25, %v2449_v45  ;;  %v2487_v20 = vadd.f32 %v6791_v25, %v2451_v54  ;;  %v2283_v5 = vpop.permute.xlu1 %2282  ;;  %v2323_v4 = vpop.permute.xlu2 %2322 }
 0x2a6   : > { %v2388_v3 = vmul.f32 %v2283_v5, %v2011_v62  ;;  %v2398_v13 = vmul.f32 %v2323_v4, %v2031_v38  ;;  %v2291_v18 = vpop.permute.xlu0 %2290  ;;  %v1936_v7 = vpop.f32.mrf.mxu3  ;;  %v1930_v62 = vadd.f32 %v6825_v32, %v6821_v19  ;;  %v2014_v38 = vld [vmem:[#allocation2 + $0x188] sm:$0xff]  ;;  %v2037_v5 = vld [vmem:[#allocation2 + $0x1a0] sm:$0xff] }
 0x2a7   : > { %v2517_v8 = vmax.f32 %v2485_v1, 0.0  ;;  %v2519_v21 = vmax.f32 %v2487_v20, 0.0  ;;  %v1810_v16 = vpop.f32.mrf.mxu0  ;;  %v1899_v29 = vpop.f32.mrf.mxu1 }
 0x2a8   : > { %v2420_v42 = vsub.f32 %v2228_v63, %v2388_v3  ;;  %v2430_v43 = vsub.f32 %v2238_v28, %v2398_v13  ;;  %v1900_v37 = vadd.f32 %v1899_v29, %v1810_v16  ;;  %v2241_v13 = vmul.f32 %v6718_v31, %v1930_v62  ;;  %v2016_v62 = vld [vmem:[#allocation2 + $0x140] sm:$0xff] }
 0x2a9   : > { %v5528_v14 = vpack.c.bf16 %v2518_v51, %v2517_v8  ;;  %v2615_v45 = vmul.f32 0.1, %v2517_v8  ;;  %v2617_v54 = vmul.f32 0.1, %v2519_v21 }
 0x2aa   : > { %v2452_v36 = vadd.f32 %v2420_v42, %v2012_v17  ;;  %v2462_v34 = vadd.f32 %v2430_v43, %v2032_v23  ;;  %v2229_v30 = vmul.f32 %v6638_v58, %v1900_v37  ;;  %v2015_v42 = vld [vmem:[#allocation2 + $0x138] sm:$0xff]  ;;  %v2038_v37 = vld [vmem:[#allocation2 + $0x1f0] sm:$0xff] }
 0x2ab   : > { %5771 = vst [vmem:[#allocation5 + $0x28] sm:$0xff] %v5528_v14  }
 0x2ac   : > { %2648 = vst [vmem:[#allocation4 + $0x38] sm:$0xff] %v2615_v45  ;;  %v2488_v1 = vadd.f32 %v6791_v25, %v2452_v36  ;;  %v6864_v20 = vadd.f32 %v6791_v25, %v2462_v34  ;;  %v2421_v51 = vsub.f32 %v2229_v30, %v2389_v22  ;;  %v6866_v4 = vpop.f32.mrf.mxu2  ;;  %v2390_v36 = vmul.f32 %v2291_v18, %v2015_v42  ;;  %v2043_v30 = vld [vmem:[#allocation2 + $0x1d8] sm:$0xff] }
 0x2ad   : > { %2650 = vst [vmem:[#allocation4 + $0xa0] sm:$0xff] %v2617_v54  ;;  %v2295_v26 = vpop.permute.xlu1 %2294  ;;  %v2335_v28 = vpop.permute.xlu2 %2334  ;;  %v1937_v54 = vadd.f32 %v1936_v7, %v1847_v44 }
 0x2ae   : > { %v2520_v63 = vmax.f32 %v2488_v1, 0.0  ;;  %v2530_v58 = vmax.f32 %v6864_v20, 0.0  ;;  %v2453_v3 = vadd.f32 %v2421_v51, %v2014_v38  ;;  %v6869_v19 = vpop.permute.xlu0 %2302  ;;  %v6871_v32 = vpop.f32.mrf.mxu3  ;;  %v2401_v49 = vmul.f32 %v2335_v28, %v2037_v5 }
 0x2af   : > { %v1812_v8 = vpop.f32.mrf.mxu0  ;;  %v1901_v17 = vpop.f32.mrf.mxu1  ;;  %v2244_v44 = vmul.f32 %v6751_v40, %v1937_v54  ;;  %v2018_v54 = vld [vmem:[#allocation2 + $0x1a8] sm:$0xff]  ;;  %v1940_v20 = vadd.f32 %v6871_v32, %v6866_v4 }
 0x2b0   : > { %v5533_v23 = vpack.c.bf16 %v2520_v63, %v2519_v21  ;;  %v2618_v16 = vmul.f32 0.1, %v2520_v63  ;;  %v2628_v29 = vmul.f32 0.1, %v2530_v58  ;;  %v2489_v43 = vadd.f32 %v6791_v25, %v2453_v3  ;;  %v2017_v63 = vld [vmem:[#allocation2 + $0x80] sm:$0xff] }
 0x2b1   : > { %v2433_v14 = vsub.f32 %v2241_v13, %v2401_v49  ;;  %v1902_v45 = vadd.f32 %v1901_v17, %v1812_v8  ;;  %v2044_v49 = vld [vmem:[#allocation2 + $0xd0] sm:$0xff]  ;;  %v2391_v42 = vmul.f32 %v2295_v26, %v2017_v63 }
 0x2b2   : > { %5772 = vst [vmem:[#allocation5 + $0x30] sm:$0xff] %v5533_v23   ;;  %v2521_v22 = vmax.f32 %v2489_v43, 0.0 }
 0x2b3   : > { %2651 = vst [vmem:[#allocation4 + $0xa8] sm:$0xff] %v2618_v16  ;;  %v2465_v31 = vadd.f32 %v2433_v14, %v2038_v37  ;;  %v2230_v34 = vmul.f32 %v6728_v59, %v1902_v45  ;;  %v1925_v14 = vadd.f32 %v6802_v39, %v6800_v35 }
 0x2b4   : > { %2661 = vst [vmem:[#allocation4 + $0xd8] sm:$0xff] %v2628_v29  ;;  %v2619_v21 = vmul.f32 0.1, %v2521_v22  ;;  %v6878_v38 = vpop.f32.mrf.mxu2 }
 0x2b5   : > { %v6881_v1 = vadd.f32 %v6791_v25, %v2465_v31  ;;  %v2422_v51 = vsub.f32 %v2230_v34, %v2390_v36  ;;  %v6883_v5 = vpop.permute.xlu1 %2306  ;;  %v2347_v28 = vpop.permute.xlu2 %2346  ;;  %v2029_v36 = vld [vmem:[#allocation2 + $0x148] sm:$0xff] }
 0x2b6   : > { %2652 = vst [vmem:[#allocation4 + $0x48] sm:$0xff] %v2619_v21  ;;  %v2404_v18 = vmul.f32 %v2347_v28, %v2043_v30  ;;  %v6886_v7 = vpop.permute.xlu0 %2314  ;;  %v6888_v59 = vpop.f32.mrf.mxu3  ;;  %v2049_v30 = vld [vmem:[#allocation2 + $0x170] sm:$0xff]  ;;  %v2033_v21 = vld [vmem:[#allocation2 + $0x40] sm:$0xff] }
 0x2b7   : > { %v2533_v3 = vmax.f32 %v6881_v1, 0.0  ;;  %v2454_v13 = vadd.f32 %v2422_v51, %v2016_v62  ;;  %v1815_v8 = vpop.f32.mrf.mxu0  ;;  %v1904_v17 = vpop.f32.mrf.mxu1 }
 0x2b8   : > { %v2436_v23 = vsub.f32 %v2244_v44, %v2404_v18  ;;  %v1905_v16 = vadd.f32 %v1904_v17, %v1815_v8  ;;  %v2030_v8 = vld [vmem:[#allocation2 + $0x1d0] sm:$0xff] }
 0x2b9   : > { %v2631_v29 = vmul.f32 0.1, %v2533_v3  ;;  %v2490_v40 = vadd.f32 %v6791_v25, %v2454_v13  ;;  %v2239_v13 = vmul.f32 %v6769_v48, %v1925_v14  ;;  %v1927_v48 = vadd.f32 %v6814_v57, %v6812_v61 }
 0x2ba   : > { %v2468_v43 = vadd.f32 %v2436_v23, %v2044_v49  ;;  %v2231_v37 = vmul.f32 %v6726_v50, %v1905_v16  ;;  %v2019_v49 = vld [vmem:[#allocation2 + $0x1b8] sm:$0xff] }
 0x2bb   : > { %2664 = vst [vmem:[#allocation4 + $0x50] sm:$0xff] %v2631_v29  ;;  %v2522_v45 = vmax.f32 %v2490_v40, 0.0 }
 0x2bc   : > { %v6898_v31 = vadd.f32 %v6791_v25, %v2468_v43  ;;  %v2423_v34 = vsub.f32 %v2231_v37, %v2391_v42  ;;  %v1855_v62 = vpop.f32.mrf.mxu2  ;;  %v2034_v37 = vld [vmem:[#allocation2 + $0x1f8] sm:$0xff] }
 0x2bd   : > { %v5538_v51 = vpack.c.bf16 %v2522_v45, %v2521_v22  ;;  %v2620_v28 = vmul.f32 0.1, %v2522_v45  ;;  %v2319_v26 = vpop.permute.xlu1 %2318  ;;  %v2359_v44 = vpop.permute.xlu2 %2358 }
 0x2be   : > { %v2536_v50 = vmax.f32 %v6898_v31, 0.0  ;;  %v2455_v18 = vadd.f32 %v2423_v34, %v2018_v54  ;;  %v2397_v63 = vmul.f32 %v2319_v26, %v2029_v36  ;;  %v2327_v35 = vpop.permute.xlu0 %2326  ;;  %v1944_v39 = vpop.f32.mrf.mxu3  ;;  %v2407_v17 = vmul.f32 %v2359_v44, %v2049_v30  ;;  %v2020_v26 = vld [vmem:[#allocation2 + $0x28] sm:$0xff]  ;;  %v2035_v44 = vld [vmem:[#allocation2 + $0x20] sm:$0xff] }
 0x2bf   : > { %5773 = vst [vmem:[#allocation5 + $0x50] sm:$0xff] %v5538_v51   ;;  %v2399_v23 = vmul.f32 %v2327_v35, %v2033_v21  ;;  %v1945_v16 = vadd.f32 %v1944_v39, %v1855_v62  ;;  %v1817_v29 = vpop.f32.mrf.mxu0  ;;  %v1906_v40 = vpop.f32.mrf.mxu1  ;;  %v2392_v36 = vmul.f32 %v6832_v6, %v2019_v49  ;;  %v2050_v21 = vld [vmem:[#allocation2 + $0x178] sm:$0xff]  ;;  %v1932_v51 = vadd.f32 %v6834_v24, %v6830_v46 }
 0x2c0   : > { %2653 = vst [vmem:[#allocation4 + $0x68] sm:$0xff] %v2620_v28  ;;  %v2634_v22 = vmul.f32 0.1, %v2536_v50  ;;  %v2491_v42 = vadd.f32 %v6791_v25, %v2455_v18  ;;  %v2429_v43 = vsub.f32 %v6776_v15, %v2397_v63  ;;  %v1907_v45 = vadd.f32 %v1906_v40, %v1817_v29  ;;  %v2036_v29 = vld [vmem:[#allocation2 + $0x128] sm:$0xff] }
 0x2c1   : > { %v2431_v14 = vsub.f32 %v2239_v13, %v2399_v23  ;;  %v2247_v54 = vmul.f32 %v6760_v52, %v1945_v16  ;;  %v2039_v52 = vld [vmem:[#allocation2 + $0xe8] sm:$0xff] }
 0x2c2   : > { %2667 = vst [vmem:[#allocation4 + $0x40] sm:$0xff] %v2634_v22  ;;  %v2523_v34 = vmax.f32 %v2491_v42, 0.0  ;;  %v2461_v30 = vadd.f32 %v2429_v43, %v2030_v8  ;;  %v2232_v62 = vmul.f32 %v6667_v0, %v1907_v45  ;;  %v2240_v0 = vmul.f32 %v6767_v2, %v1927_v48  ;;  %v2021_v43 = vld [vmem:[#allocation2 + $0x1e8] sm:$0xff] }
 0x2c3   : > { %v2463_v15 = vadd.f32 %v2431_v14, %v2034_v37  ;;  %v2439_v28 = vsub.f32 %v2247_v54, %v2407_v17  ;;  %v2242_v17 = vmul.f32 %v6780_v12, %v1932_v51  ;;  %v2040_v14 = vld [vmem:[#allocation2 + $0x78] sm:$0xff] }
 0x2c4   : > { %v2621_v18 = vmul.f32 0.1, %v2523_v34  ;;  %v2497_v61 = vadd.f32 %v6791_v25, %v2461_v30  ;;  %v2424_v57 = vsub.f32 %v2232_v62, %v2392_v36  ;;  %v6914_v63 = vpop.f32.mrf.mxu2  ;;  %v1935_v30 = vadd.f32 %v6849_v56, %v6842_v41 }
 0x2c5   : > { %v6917_v6 = vadd.f32 %v6791_v25, %v2463_v15  ;;  %v2471_v35 = vadd.f32 %v2439_v28, %v2050_v21  ;;  %v2331_v39 = vpop.permute.xlu1 %2330  ;;  %v2393_v15 = vmul.f32 %v6869_v19, %v2021_v43  ;;  %v2046_v43 = vld [vmem:[#allocation2 + $0x88] sm:$0xff] }
 0x2c6   : > { %2654 = vst [vmem:[#allocation4 + $0x88] sm:$0xff] %v2621_v18  ;;  %v2529_v46 = vmax.f32 %v2497_v61, 0.0  ;;  %v2456_v24 = vadd.f32 %v2424_v57, %v2020_v26  ;;  %v2400_v13 = vmul.f32 %v2331_v39, %v2035_v44  ;;  %v2339_v49 = vpop.permute.xlu0 %2338  ;;  %v1946_v8 = vpop.f32.mrf.mxu3  ;;  %v2041_v26 = vld [vmem:[#allocation2 + $0x70] sm:$0xff]  ;;  %v2045_v61 = vld [vmem:[#allocation2 + $0xb8] sm:$0xff]  ;;  %v2243_v32 = vmul.f32 %v6778_v11, %v1935_v30  ;;  %v2047_v30 = vld [vmem:[#allocation2 + $0xa8] sm:$0xff] }
 0x2c7   : > { %v2531_v23 = vmax.f32 %v6917_v6, 0.0  ;;  %v6923_v16 = vadd.f32 %v6791_v25, %v2471_v35  ;;  %v2402_v40 = vmul.f32 %v2339_v49, %v2039_v52  ;;  %v1820_v22 = vpop.f32.mrf.mxu0  ;;  %v1909_v42 = vpop.f32.mrf.mxu1  ;;  %v2022_v52 = vld [vmem:[#allocation2 + $0xf8] sm:$0xff] }
 0x2c8   : > { %v5558_v2 = vpack.c.bf16 %v2530_v58, %v2529_v46  ;;  %v2627_v37 = vmul.f32 0.1, %v2529_v46  ;;  %v2492_v45 = vadd.f32 %v6791_v25, %v2456_v24  ;;  %v2432_v48 = vsub.f32 %v2240_v0, %v2400_v13  ;;  %v2042_v13 = vld [vmem:[#allocation2 + $0x90] sm:$0xff] }
 0x2c9   : > { %v2629_v54 = vmul.f32 0.1, %v2531_v23  ;;  %v2539_v12 = vmax.f32 %v6923_v16, 0.0  ;;  %v2434_v36 = vsub.f32 %v2242_v17, %v2402_v40  ;;  %v1910_v51 = vadd.f32 %v1909_v42, %v1820_v22 }
 0x2ca   : > { %5777 = vst [vmem:[#allocation5 + $0x58] sm:$0xff] %v5558_v2   ;;  %v2524_v21 = vmax.f32 %v2492_v45, 0.0  ;;  %v2464_v62 = vadd.f32 %v2432_v48, %v2036_v29  ;;  %v2245_v46 = vmul.f32 %v6795_v33, %v1940_v20  ;;  %v2023_v2 = vld [vmem:[#allocation2 + $0x160] sm:$0xff]  ;;  %v1947_v33 = vadd.f32 %v1946_v8, %v6914_v63  ;;  %v2051_v8 = vld [vmem:[#allocation2 + $0x68] sm:$0xff] }
 0x2cb   : > { %2660 = vst [vmem:[#allocation4 + $0x20] sm:$0xff] %v2627_v37  ;;  %v2637_v58 = vmul.f32 0.1, %v2539_v12  ;;  %v2466_v28 = vadd.f32 %v2434_v36, %v2040_v14  ;;  %v2233_v56 = vmul.f32 %v6755_v60, %v1910_v51  ;;  %v1942_v60 = vadd.f32 %v6888_v59, %v6878_v38  ;;  %v2055_v38 = vld [vmem:[#allocation2 + $0xc0] sm:$0xff]  ;;  %v2371_v59 = vpop.permute.xlu2 %2370 }
 0x2cc   : > { %2662 = vst [vmem:[#allocation4 + $0xf8] sm:$0xff] %v2629_v54  ;;  %v5543_v44 = vpack.c.bf16 %v2524_v21, %v2523_v34  ;;  %v2622_v18 = vmul.f32 0.1, %v2524_v21  ;;  %v2500_v41 = vadd.f32 %v6791_v25, %v2464_v62  ;;  %v1860_v57 = vpop.f32.mrf.mxu2  ;;  %v2394_v21 = vmul.f32 %v6883_v5, %v2023_v2  ;;  %v2026_v2 = vld [vmem:[#allocation2] sm:$0xff] }
 0x2cd   : > { %2670 = vst [vmem:[#allocation4 + $0xe8] sm:$0xff] %v2637_v58  ;;  %v2502_v19 = vadd.f32 %v6791_v25, %v2466_v28  ;;  %v2343_v4 = vpop.permute.xlu1 %2342  ;;  %v2425_v35 = vsub.f32 %v2233_v56, %v2393_v15  ;;  %v2246_v51 = vmul.f32 %v6793_v27, %v1942_v60  ;;  %v2410_v15 = vmul.f32 %v2371_v59, %v2055_v38  ;;  %v2024_v28 = vld [vmem:[#allocation2 + $0x30] sm:$0xff] }
 0x2ce   : > { %5774 = vst [vmem:[#allocation5 + $0x60] sm:$0xff] %v5543_v44   ;;  %v2532_v6 = vmax.f32 %v2500_v41, 0.0  ;;  %v2403_v39 = vmul.f32 %v2343_v4, %v2041_v26  ;;  %v2351_v0 = vpop.permute.xlu0 %2350  ;;  %v1949_v34 = vpop.f32.mrf.mxu3  ;;  %v2248_v20 = vmul.f32 %v6810_v53, %v1947_v33  ;;  %v2025_v53 = vld [vmem:[#allocation2 + $0x1e0] sm:$0xff]  ;;  %v2052_v60 = vld [vmem:[#allocation2 + $0x190] sm:$0xff] }
 0x2cf   : > { %2655 = vst [vmem:[#allocation4 + $0x28] sm:$0xff] %v2622_v18  ;;  %v2534_v24 = vmax.f32 %v2502_v19, 0.0  ;;  %v2405_v49 = vmul.f32 %v2351_v0, %v2045_v61  ;;  %v1822_v17 = vpop.f32.mrf.mxu0  ;;  %v1911_v29 = vpop.f32.mrf.mxu1  ;;  %v2457_v11 = vadd.f32 %v2425_v35, %v2022_v52  ;;  %v1950_v19 = vadd.f32 %v1949_v34, %v1860_v57  ;;  %v2048_v52 = vld [vmem:[#allocation2 + $0x1c8] sm:$0xff] }
 0x2d0   : > { %v5563_v40 = vpack.c.bf16 %v2532_v6, %v2531_v23  ;;  %v2630_v22 = vmul.f32 0.1, %v2532_v6  ;;  %v2435_v42 = vsub.f32 %v2243_v32, %v2403_v39  ;;  %v1912_v23 = vadd.f32 %v1911_v29, %v1822_v17  ;;  %v2056_v29 = vld [vmem:[#allocation2 + $0x1c0] sm:$0xff] }
 0x2d1   : > { %v5568_v37 = vpack.c.bf16 %v2534_v24, %v2533_v3  ;;  %v2632_v45 = vmul.f32 0.1, %v2534_v24  ;;  %v2437_v48 = vsub.f32 %v2245_v46, %v2405_v49  ;;  %v6947_v14 = vadd.f32 %v6791_v25, %v2457_v11  ;;  %v2053_v11 = vld [vmem:[#allocation2 + $0x198] sm:$0xff] }
 0x2d2   : > { %5778 = vst [vmem:[#allocation5 + $0x40] sm:$0xff] %v5563_v40   ;;  %v2467_v54 = vadd.f32 %v2435_v42, %v2042_v13  ;;  %v2234_v63 = vmul.f32 %v6753_v55, %v1912_v23  ;;  %v2395_v40 = vmul.f32 %v6844_v10, %v2025_v53 }
 0x2d3   : > { %2663 = vst [vmem:[#allocation4 + $0x10] sm:$0xff] %v2630_v22  ;;  %v2469_v36 = vadd.f32 %v2437_v48, %v2046_v43  ;;  %v2525_v1 = vmax.f32 %v6947_v14, 0.0 }
 0x2d4   : > { %5779 = vst [vmem:[#allocation5] sm:$0xff] %v5568_v37   ;;  %v2503_v3 = vadd.f32 %v6791_v25, %v2467_v54  ;;  %v1862_v62 = vpop.f32.mrf.mxu2  ;;  %v2426_v18 = vsub.f32 %v2234_v63, %v2394_v21 }
 0x2d5   : > { %2665 = vst [vmem:[#allocation4 + $0x80] sm:$0xff] %v2632_v45  ;;  %v6956_v58 = vadd.f32 %v6791_v25, %v2469_v36  ;;  %v2355_v5 = vpop.permute.xlu1 %2354  ;;  %v2623_v26 = vmul.f32 0.1, %v2525_v1  ;;  %v7415_v45 = vld [vmem:[#allocation18_spill] sm:$0xff] }
 0x2d6   : > { %v2535_v44 = vmax.f32 %v2503_v3, 0.0  ;;  %v2406_v41 = vmul.f32 %v2355_v5, %v2047_v30  ;;  %v2363_v56 = vpop.permute.xlu0 %2362  ;;  %v1951_v61 = vpop.f32.mrf.mxu3  ;;  %v2458_v0 = vadd.f32 %v2426_v18, %v2024_v28  ;;  %v2249_v33 = vmul.f32 %v7415_v45, %v1950_v19 }
 0x2d7   : > { %v2537_v55 = vmax.f32 %v6956_v58, 0.0  ;;  %v2408_v27 = vmul.f32 %v2363_v56, %v2051_v8  ;;  %v1952_v4 = vadd.f32 %v1951_v61, %v1862_v62  ;;  %v1825_v32 = vpop.f32.mrf.mxu0  ;;  %v1914_v6 = vpop.f32.mrf.mxu1  ;;  %2656 = vst [vmem:[#allocation4 + $0xb8] sm:$0xff] %v2623_v26  ;;  %v2054_v8 = vld [vmem:[#allocation2 + $0x38] sm:$0xff]  ;;  %v2027_v26 = vld [vmem:[#allocation2 + $0xf0] sm:$0xff] }
 0x2d8   : > { %v5573_v35 = vpack.c.bf16 %v2536_v50, %v2535_v44  ;;  %v2633_v39 = vmul.f32 0.1, %v2535_v44  ;;  %v2438_v46 = vsub.f32 %v2246_v51, %v2406_v41  ;;  %v1915_v17 = vadd.f32 %v1914_v6, %v1825_v32  ;;  %v7416_v61 = vld [vmem:[#allocation20_spill] sm:$0xff] }
 0x2d9   : > { %v2635_v24 = vmul.f32 0.1, %v2537_v55  ;;  %v2440_v13 = vsub.f32 %v2248_v20, %v2408_v27  ;;  %v2250_v49 = vmul.f32 %v6773_v47, %v1952_v4  ;;  %v2494_v57 = vadd.f32 %v6791_v25, %v2458_v0  ;;  %v2057_v47 = vld [vmem:[#allocation2 + $0x158] sm:$0xff]  ;;  %v2058_v4 = vld [vmem:[#allocation2 + $0x10] sm:$0xff] }
 0x2da   : > { %5780 = vst [vmem:[#allocation5 + $0x38] sm:$0xff] %v5573_v35   ;;  %v2470_v34 = vadd.f32 %v2438_v46, %v2048_v52  ;;  %v2235_v50 = vmul.f32 %v6676_v9, %v1915_v17  ;;  %v2396_v32 = vmul.f32 %v6886_v7, %v2027_v26  ;;  %v2059_v35 = vld [vmem:[#allocation2 + $0x58] sm:$0xff]  ;;  %v2028_v46 = vld [vmem:[#allocation2 + $0x8] sm:$0xff] }
 0x2db   : > { %2666 = vst [vmem:[#allocation4 + $0xc8] sm:$0xff] %v2633_v39  ;;  %v2472_v22 = vadd.f32 %v2440_v13, %v2052_v60  ;;  %v2442_v31 = vsub.f32 %v2250_v49, %v2410_v15  ;;  %v2526_v42 = vmax.f32 %v2494_v57, 0.0 }
 0x2dc   : > { %2668 = vst [vmem:[#allocation4 + $0xf0] sm:$0xff] %v2635_v24  ;;  %v2506_v43 = vadd.f32 %v6791_v25, %v2470_v34  ;;  %v1865_v37 = vpop.f32.mrf.mxu2  ;;  %v2427_v59 = vsub.f32 %v2235_v50, %v2395_v40 }
 0x2dd   : > { %v2508_v48 = vadd.f32 %v6791_v25, %v2472_v22  ;;  %v2474_v38 = vadd.f32 %v2442_v31, %v2056_v29  ;;  %v2367_v10 = vpop.permute.xlu1 %2366  ;;  %v5548_v14 = vpack.c.bf16 %v2526_v42, %v2525_v1  ;;  %v2624_v54 = vmul.f32 0.1, %v2526_v42  ;;  %v7418_v31 = vld [vmem:[#allocation19_spill] sm:$0xff] }
 0x2de   : > { %v2538_v23 = vmax.f32 %v2506_v43, 0.0  ;;  %v2409_v36 = vmul.f32 %v2367_v10, %v2053_v11  ;;  %v2375_v9 = vpop.permute.xlu0 %2374  ;;  %v1954_v30 = vpop.f32.mrf.mxu3  ;;  %v2459_v63 = vadd.f32 %v2427_v59, %v2026_v2  ;;  %v2060_v43 = vld [vmem:[#allocation2 + $0xa0] sm:$0xff] }
 0x2df   : > { %v2540_v21 = vmax.f32 %v2508_v48, 0.0  ;;  %v2510_v3 = vadd.f32 %v6791_v25, %v2474_v38  ;;  %v2411_v62 = vmul.f32 %v2375_v9, %v2057_v47  ;;  %v1827_v51 = vpop.f32.mrf.mxu0  ;;  %v1916_v15 = vpop.f32.mrf.mxu1  ;;  %5775 = vst [vmem:[#allocation5 + $0x10] sm:$0xff] %v5548_v14   ;;  %v1955_v5 = vadd.f32 %v1954_v30, %v1865_v37 }
 0x2e0   : > { %v5578_v20 = vpack.c.bf16 %v2538_v23, %v2537_v55  ;;  %v2636_v58 = vmul.f32 0.1, %v2538_v23  ;;  %v2441_v28 = vsub.f32 %v2249_v33, %v2409_v36  ;;  %2657 = vst [vmem:[#allocation4 + $0x90] sm:$0xff] %v2624_v54  ;;  %v2495_v41 = vadd.f32 %v6791_v25, %v2459_v63 }
 0x2e1   : > { %v5583_v1 = vpack.c.bf16 %v2540_v21, %v2539_v12  ;;  %v2638_v44 = vmul.f32 0.1, %v2540_v21  ;;  %v2542_v18 = vmax.f32 %v2510_v3, 0.0  ;;  %v2251_v19 = vmul.f32 %v7416_v61, %v1955_v5  ;;  %v7417_v12 = vld [vmem:[#allocation17_spill] sm:$0xff] }
 0x2e2   : > { %5781 = vst [vmem:[#allocation5 + $0x70] sm:$0xff] %v5578_v20   ;;  %v2473_v56 = vadd.f32 %v2441_v28, %v2054_v8  ;;  %v1917_v52 = vadd.f32 %v1916_v15, %v1827_v51  ;;  %v2527_v55 = vmax.f32 %v2495_v41, 0.0 }
 0x2e3   : > { %2669 = vst [vmem:[#allocation4 + $0xd0] sm:$0xff] %v2636_v58  ;;  %v2640_v27 = vmul.f32 0.1, %v2542_v18  ;;  %v2443_v16 = vsub.f32 %v2251_v19, %v2411_v62 }
 0x2e4   : > { %5782 = vst [vmem:[#allocation5 + $0x78] sm:$0xff] %v5583_v1   ;;  %v2509_v6 = vadd.f32 %v6791_v25, %v2473_v56  ;;  %v2236_v53 = vmul.f32 %v7417_v12, %v1917_v52  ;;  %v1867_v39 = vpop.f32.mrf.mxu2  ;;  %v2625_v0 = vmul.f32 0.1, %v2527_v55 }
 0x2e5   : > { %2671 = vst [vmem:[#allocation4 + $0x60] sm:$0xff] %v2638_v44  ;;  %v2379_v60 = vpop.permute.xlu1 %2378  ;;  %v2475_v13 = vadd.f32 %v2443_v16, %v2058_v4 }
 0x2e6   : > { %2673 = vst [vmem:[#allocation4 + $0x58] sm:$0xff] %v2640_v27  ;;  %v2541_v24 = vmax.f32 %v2509_v6, 0.0  ;;  %v2428_v49 = vsub.f32 %v2236_v53, %v2396_v32  ;;  %v1956_v17 = vpop.f32.mrf.mxu3  ;;  %v2412_v57 = vmul.f32 %v2379_v60, %v2059_v35 }
 0x2e7   : > { %2658 = vst [vmem:[#allocation4 + $0xe0] sm:$0xff] %v2625_v0  ;;  %v1957_v7 = vadd.f32 %v1956_v17, %v1867_v39  ;;  %v2511_v40 = vadd.f32 %v6791_v25, %v2475_v13 }
 0x2e8   : > { %v5588_v34 = vpack.c.bf16 %v2542_v18, %v2541_v24  ;;  %v2639_v29 = vmul.f32 0.1, %v2541_v24  ;;  %v2460_v22 = vadd.f32 %v2428_v49, %v2028_v46 }
 0x2e9   : > { %v2252_v50 = vmul.f32 %v7418_v31, %v1957_v7  ;;  %v2543_v11 = vmax.f32 %v2511_v40, 0.0 }
 0x2ea   : > { %5783 = vst [vmem:[#allocation5 + $0x18] sm:$0xff] %v5588_v34   ;;  %v2496_v42 = vadd.f32 %v6791_v25, %v2460_v22 }
 0x2eb   : > { %2672 = vst [vmem:[#allocation4 + $0xb0] sm:$0xff] %v2639_v29  ;;  %v2444_v2 = vsub.f32 %v2252_v50, %v2412_v57  ;;  %v2641_v47 = vmul.f32 0.1, %v2543_v11 }
 0x2ec   : > { %v2528_v37 = vmax.f32 %v2496_v42, 0.0 }
 0x2ed   : > { %v2476_v45 = vadd.f32 %v2444_v2, %v2060_v43  ;;  %2674 = vst [vmem:[#allocation4 + $0x98] sm:$0xff] %v2641_v47 }
 0x2ee   : > { %v5553_v33 = vpack.c.bf16 %v2528_v37, %v2527_v55  ;;  %v2626_v48 = vmul.f32 0.1, %v2528_v37 }
 0x2ef   : > { %v2512_v38 = vadd.f32 %v6791_v25, %v2476_v45 }
 0x2f0   : > { %5776 = vst [vmem:[#allocation5 + $0x48] sm:$0xff] %v5553_v33  }
 0x2f1   : > { %2659 = vst [vmem:[#allocation4 + $0x30] sm:$0xff] %v2626_v48  ;;  %v2544_v59 = vmax.f32 %v2512_v38, 0.0 }
 0x2f3   : > { %v5593_v10 = vpack.c.bf16 %v2544_v59, %v2543_v11  ;;  %v2642_v14 = vmul.f32 0.1, %v2544_v59 }
 0x2f5   : > { %5784 = vst [vmem:[#allocation5 + $0x68] sm:$0xff] %v5593_v10  }
 0x2f6   : > { %2675 = vst [vmem:[#allocation4 + $0x78] sm:$0xff] %v2642_v14 }
 0x2f7 PF: > { %p2677_p9 = scmp.lt.s32.totalorder %s6087_s27, 0  ;;  %s2678_s18 = ssub.s32 0, %s6087_s27 }
 0x2f8   : > { %s4713_s19 = smin.u32 %s6087_s27, %s2678_s18  ;;  %p2676_p11 = scmp.ge.s32.totalorder %s6087_s27, 1 }
 0x2f9   : > { %s2680_s20 = sand.u32 1, %s4713_s19  }
 0x2fa   : > { %s2681_s21 = ssub.s32 0, %s2680_s20 }
 0x2fb   : > { %s7424_s21 = smov (!%p2677_p9, %s2681_s21), %s2680_s20 }
 0x2fc   : > { %p4715_p10 = scmp.lt.s32.totalorder %s7424_s21, 0  ;;  %s2687_s22 = sadd.s32 2, %s7424_s21 }
 0x2fe   : > { %s7426_s22 = smov (!%p4715_p10, %s2687_s22), %s7424_s21 }
 0x2ff   : > { %p2689_p12 = scmp.eq.s32.totalorder %s7426_s22, 1 }
 0x301   : > { %p2690_p13 = pnand %p2689_p12, %p2676_p11 }
 0x303   : > { %2693 = sbr.rel (%p2690_p13) target bundleno = 1067 (0x42b), region = 76 }
 0x308   : > { %v5353_v25 = vld [vmem:[#allocation5 + $0x48] sm:$0xff]  ;;  %v5352_v23 = vld [vmem:[#allocation5 + $0x10] sm:$0xff]  ;;  %v5360_v36 = vld [vmem:[#allocation5 + $0x18] sm:$0xff] }
 0x309   : > { %v5361_v54 = vld [vmem:[#allocation5 + $0x68] sm:$0xff]  ;;  %3047 = vmatpush.bf16.msra.mxu0 %v5353_v25  ;;  %5831 = vmatpush.bf16.msra.mxu2 %v5353_v25  ;;  %v5351_v9 = vld [vmem:[#allocation5 + $0x60] sm:$0xff]  ;;  %v5359_v30 = vld [vmem:[#allocation5 + $0x78] sm:$0xff] }
 0x30a   : > { %3136 = vmatpush.bf16.msra.mxu1 %v5361_v54  ;;  %5839 = vmatpush.bf16.msra.mxu3 %v5361_v54  ;;  %v5350_v21 = vld [vmem:[#allocation5 + $0x50] sm:$0xff]  ;;  %v5357_v8 = vld [vmem:[#allocation5 + $0x38] sm:$0xff]  ;;  %v5348_v62 = vld [vmem:[#allocation5 + $0x28] sm:$0xff] }
 0x30b   : > { %v5358_v3 = vld [vmem:[#allocation5 + $0x70] sm:$0xff]  ;;  %v5356_v51 = vld [vmem:[#allocation5] sm:$0xff]  ;;  %v5347_v15 = vld [vmem:[#allocation5 + $0x8] sm:$0xff] }
 0x30c   : > { %v5349_v63 = vld [vmem:[#allocation5 + $0x30] sm:$0xff]  ;;  %v5355_v20 = vld [vmem:[#allocation5 + $0x40] sm:$0xff]  ;;  %v5354_v28 = vld [vmem:[#allocation5 + $0x58] sm:$0xff] }
 0x30d   : > { %3048 = vmatpush.bf16.msra.mxu0 %v5352_v23  ;;  %5832 = vmatpush.bf16.msra.mxu2 %v5352_v23  ;;  %v5346_v58 = vld [vmem:[#allocation5 + $0x20] sm:$0xff]  ;;  %v4718_v5 = vld [vmem:[%s7397_s0] sm:$0xf]  ;;  %v5314_v18 = vld [vmem:[%s7397_s0 + $0x4] sm:$0xf] }
 0x30e   : > { %3137 = vmatpush.bf16.msra.mxu1 %v5360_v36  ;;  %5840 = vmatpush.bf16.msra.mxu3 %v5360_v36  ;;  %v5315_v26 = vld [vmem:[%s7397_s0 + $0x4] sm:$0xf0]  ;;  %v4782_v1 = vld [vmem:[%s7397_s0 + $0x80] sm:$0xf]  ;;  %v4720_v41 = vld [vmem:[%s7397_s0 + $0x8] sm:$0xf0] }
 0x30f   : > { %v5331_v44 = vld [vmem:[%s7397_s0 + $0x84] sm:$0xf0]  ;;  %v5330_v56 = vld [vmem:[%s7397_s0 + $0x84] sm:$0xf]  ;;  %v4784_v61 = vld [vmem:[%s7397_s0 + $0x88] sm:$0xf0]  ;;  %v4719_v19 = vor.u32 %v5315_v26, %v4718_v5  ;;  %v4723_v27 = vor.u32 %v5314_v18, %v4720_v41 }
 0x310   : > { %v4783_v52 = vor.u32 %v5331_v44, %v4782_v1  ;;  %v4787_v55 = vor.u32 %v5330_v56, %v4784_v61  ;;  %v4726_v4 = vld [vmem:[%s7397_s0 + $0x10] sm:$0xf]  ;;  %v5317_v32 = vld [vmem:[%s7397_s0 + $0x14] sm:$0xf0]  ;;  %v5316_v12 = vld [vmem:[%s7397_s0 + $0x14] sm:$0xf] }
 0x311   : > { %3049 = vmatpush.bf16.msra.mxu0 %v5351_v9  ;;  %5833 = vmatpush.bf16.msra.mxu2 %v5351_v9  ;;  %v4790_v6 = vld [vmem:[%s7397_s0 + $0x90] sm:$0xf]  ;;  %v5333_v16 = vld [vmem:[%s7397_s0 + $0x94] sm:$0xf0]  ;;  %v4728_v53 = vld [vmem:[%s7397_s0 + $0x18] sm:$0xf0]  ;;  %v4727_v0 = vor.u32 %v5317_v32, %v4726_v4 }
 0x312   : > { %3138 = vmatpush.bf16.msra.mxu1 %v5359_v30  ;;  %5841 = vmatpush.bf16.msra.mxu3 %v5359_v30  ;;  %v5332_v35 = vld [vmem:[%s7397_s0 + $0x94] sm:$0xf]  ;;  %v4792_v39 = vld [vmem:[%s7397_s0 + $0x98] sm:$0xf0]  ;;  %v4791_v46 = vor.u32 %v5333_v16, %v4790_v6  ;;  %v4731_v60 = vor.u32 %v5316_v12, %v4728_v53  ;;  %v4734_v13 = vld [vmem:[%s7397_s0 + $0x20] sm:$0xf] }
 0x313   : > { %v4795_v24 = vor.u32 %v5332_v35, %v4792_v39  ;;  %v5319_v49 = vld [vmem:[%s7397_s0 + $0x24] sm:$0xf0]  ;;  %v4798_v17 = vld [vmem:[%s7397_s0 + $0xa0] sm:$0xf]  ;;  %v5318_v7 = vld [vmem:[%s7397_s0 + $0x24] sm:$0xf] }
 0x314   : > { %v5335_v57 = vld [vmem:[%s7397_s0 + $0xa4] sm:$0xf0]  ;;  %v4736_v34 = vld [vmem:[%s7397_s0 + $0x28] sm:$0xf0]  ;;  %v5334_v29 = vld [vmem:[%s7397_s0 + $0xa4] sm:$0xf]  ;;  %v4735_v22 = vor.u32 %v5319_v49, %v4734_v13 }
 0x315   : > { %3050 = vmatpush.bf16.msra.mxu0 %v5350_v21  ;;  %5834 = vmatpush.bf16.msra.mxu2 %v5350_v21  ;;  %v4800_v40 = vld [vmem:[%s7397_s0 + $0xa8] sm:$0xf0]  ;;  %v4799_v31 = vor.u32 %v5335_v57, %v4798_v17  ;;  %v4739_v50 = vor.u32 %v5318_v7, %v4736_v34  ;;  %v4742_v42 = vld [vmem:[%s7397_s0 + $0x30] sm:$0xf]  ;;  %v5321_v43 = vld [vmem:[%s7397_s0 + $0x34] sm:$0xf0] }
 0x316   : > { %3139 = vmatpush.bf16.msra.mxu1 %v5358_v3  ;;  %5842 = vmatpush.bf16.msra.mxu3 %v5358_v3  ;;  %v4803_v11 = vor.u32 %v5334_v29, %v4800_v40  ;;  %v4806_v2 = vld [vmem:[%s7397_s0 + $0xb0] sm:$0xf]  ;;  %v5337_v47 = vld [vmem:[%s7397_s0 + $0xb4] sm:$0xf0]  ;;  %v5320_v37 = vld [vmem:[%s7397_s0 + $0x34] sm:$0xf]  ;;  %v4743_v38 = vor.u32 %v5321_v43, %v4742_v42 }
 0x317   : > { %v4744_v45 = vld [vmem:[%s7397_s0 + $0x38] sm:$0xf0]  ;;  %v5336_v33 = vld [vmem:[%s7397_s0 + $0xb4] sm:$0xf]  ;;  %v4807_v59 = vor.u32 %v5337_v47, %v4806_v2  ;;  %v4750_v25 = vld [vmem:[%s7397_s0 + $0x40] sm:$0xf] }
 0x318   : > { %v4808_v48 = vld [vmem:[%s7397_s0 + $0xb8] sm:$0xf0]  ;;  %v4747_v10 = vor.u32 %v5320_v37, %v4744_v45  ;;  %v5323_v54 = vld [vmem:[%s7397_s0 + $0x44] sm:$0xf0]  ;;  %v4814_v23 = vld [vmem:[%s7397_s0 + $0xc0] sm:$0xf] }
 0x319   : > { %3051 = vmatpush.bf16.msra.mxu0 %v5349_v63  ;;  %5835 = vmatpush.bf16.msra.mxu2 %v5349_v63  ;;  %v4811_v14 = vor.u32 %v5336_v33, %v4808_v48  ;;  %v5339_v36 = vld [vmem:[%s7397_s0 + $0xc4] sm:$0xf0]  ;;  %v5322_v9 = vld [vmem:[%s7397_s0 + $0x44] sm:$0xf]  ;;  %v4752_v30 = vld [vmem:[%s7397_s0 + $0x48] sm:$0xf0]  ;;  %v4751_v63 = vor.u32 %v5323_v54, %v4750_v25 }
 0x31a   : > { %3140 = vmatpush.bf16.msra.mxu1 %v5357_v8  ;;  %5843 = vmatpush.bf16.msra.mxu3 %v5357_v8  ;;  %v5338_v21 = vld [vmem:[%s7397_s0 + $0xc4] sm:$0xf]  ;;  %v4816_v3 = vld [vmem:[%s7397_s0 + $0xc8] sm:$0xf0]  ;;  %v4815_v8 = vor.u32 %v5339_v36, %v4814_v23  ;;  %v5324_v5 = vld [vmem:[%s7397_s0 + $0x54] sm:$0xf] }
 0x31b   : > { %v4760_v26 = vld [vmem:[%s7397_s0 + $0x58] sm:$0xf0]  ;;  %v5340_v1 = vld [vmem:[%s7397_s0 + $0xd4] sm:$0xf]  ;;  %v5326_v4 = vld [vmem:[%s7397_s0 + $0x64] sm:$0xf] }
 0x31c   : > { %v4824_v44 = vld [vmem:[%s7397_s0 + $0xd8] sm:$0xf0]  ;;  %v4763_v56 = vor.u32 %v5324_v5, %v4760_v26  ;;  %v4768_v32 = vld [vmem:[%s7397_s0 + $0x68] sm:$0xf0]  ;;  %v5342_v6 = vld [vmem:[%s7397_s0 + $0xe4] sm:$0xf] }
 0x31d   : > { %3052 = vmatpush.bf16.msra.mxu0 %v5348_v62  ;;  %5836 = vmatpush.bf16.msra.mxu2 %v5348_v62  ;;  %v4755_v62 = vor.u32 %v5322_v9, %v4752_v30  ;;  %v4827_v61 = vor.u32 %v5340_v1, %v4824_v44  ;;  %v4832_v16 = vld [vmem:[%s7397_s0 + $0xe8] sm:$0xf0]  ;;  %v4771_v35 = vor.u32 %v5326_v4, %v4768_v32  ;;  %v5328_v13 = vld [vmem:[%s7397_s0 + $0x74] sm:$0xf]  ;;  %v4776_v49 = vld [vmem:[%s7397_s0 + $0x78] sm:$0xf0] }
 0x31e   : > { %3141 = vmatpush.bf16.msra.mxu1 %v5356_v51  ;;  %5844 = vmatpush.bf16.msra.mxu3 %v5356_v51  ;;  %v4819_v51 = vor.u32 %v5338_v21, %v4816_v3  ;;  %v4835_v39 = vor.u32 %v5342_v6, %v4832_v16  ;;  %v5344_v17 = vld [vmem:[%s7397_s0 + $0xf4] sm:$0xf]  ;;  %v4840_v57 = vld [vmem:[%s7397_s0 + $0xf8] sm:$0xf0]  ;;  %v4779_v29 = vor.u32 %v5328_v13, %v4776_v49  ;;  %v2775_v33 = vld [vmem:[#allocation4 + $0x20] sm:$0xff] }
 0x31f   : > { %v4843_v40 = vor.u32 %v5344_v17, %v4840_v57  ;;  %v2760_v42 = vld [vmem:[#allocation4 + $0x70] sm:$0xff]  ;;  %v2777_v5 = vld [vmem:[#allocation4 + $0xf8] sm:$0xff]  ;;  %v2780_v49 = vld [vmem:[#allocation4 + $0x80] sm:$0xff] }
 0x320   : > { %v2778_v44 = vld [vmem:[#allocation4 + $0x10] sm:$0xff]  ;;  %v2763_v6 = vld [vmem:[#allocation4 + $0x38] sm:$0xff] }
 0x321   : > { %3053 = vmatpush.bf16.msra.mxu0 %v5347_v15  ;;  %5837 = vmatpush.bf16.msra.mxu2 %v5347_v15  ;;  %v4758_v15 = vld [vmem:[%s7397_s0 + $0x50] sm:$0xf] }
 0x322   : > { %3142 = vmatpush.bf16.msra.mxu1 %v5355_v20  ;;  %5845 = vmatpush.bf16.msra.mxu3 %v5355_v20  ;;  %v5325_v20 = vld [vmem:[%s7397_s0 + $0x54] sm:$0xf0] }
 0x323   : > { %v4759_v18 = vor.u32 %v5325_v20, %v4758_v15 }
 0x325   : > { %3054 = vmatpush.bf16.msra.mxu0 %v5346_v58  ;;  %5838 = vmatpush.bf16.msra.mxu2 %v5346_v58  ;;  %v4822_v58 = vld [vmem:[%s7397_s0 + $0xd0] sm:$0xf] }
 0x326   : > { %3143 = vmatpush.bf16.msra.mxu1 %v5354_v28  ;;  %5846 = vmatpush.bf16.msra.mxu3 %v5354_v28  ;;  %v5341_v28 = vld [vmem:[%s7397_s0 + $0xd4] sm:$0xf0] }
 0x327   : > { %v4823_v41 = vor.u32 %v5341_v28, %v4822_v58 }
 0x328   : > { %3055 = vmatmul.bf16.vlgmr.msra.gmra.mxu0 %v4719_v19  ;;  %3095 = vmatmul.bf16.vlgmr.msra.gmra.mxu2 %v4783_v52  ;;  %v4766_v19 = vld [vmem:[%s7397_s0 + $0x60] sm:$0xf]  ;;  %v5327_v52 = vld [vmem:[%s7397_s0 + $0x64] sm:$0xf0] }
 0x329   : > { %3144 = vmatmul.bf16.vlgmr.msra.gmra.mxu1 %v4723_v27  ;;  %3184 = vmatmul.bf16.vlgmr.msra.gmra.mxu3 %v4787_v55  ;;  %v4830_v27 = vld [vmem:[%s7397_s0 + $0xe0] sm:$0xf]  ;;  %v5343_v55 = vld [vmem:[%s7397_s0 + $0xe4] sm:$0xf0]  ;;  %v4767_v12 = vor.u32 %v5327_v52, %v4766_v19 }
 0x32a   : > { %v4831_v53 = vor.u32 %v5343_v55, %v4830_v27 }
 0x338   : > { %3060 = vmatmul.bf16.gmra.mxu0 %v4727_v0  ;;  %3100 = vmatmul.bf16.gmra.mxu2 %v4791_v46  ;;  %v4774_v0 = vld [vmem:[%s7397_s0 + $0x70] sm:$0xf]  ;;  %v5329_v46 = vld [vmem:[%s7397_s0 + $0x74] sm:$0xf0] }
 0x339   : > { %3149 = vmatmul.bf16.gmra.mxu1 %v4731_v60  ;;  %3189 = vmatmul.bf16.gmra.mxu3 %v4795_v24  ;;  %v4838_v60 = vld [vmem:[%s7397_s0 + $0xf0] sm:$0xf]  ;;  %v5345_v24 = vld [vmem:[%s7397_s0 + $0xf4] sm:$0xf0]  ;;  %v4775_v7 = vor.u32 %v5329_v46, %v4774_v0 }
 0x33a   : > { %v4839_v34 = vor.u32 %v5345_v24, %v4838_v60  ;;  %v2779_v60 = vld [vmem:[#allocation4 + $0x50] sm:$0xff] }
 0x348   : > { %3065 = vmatmul.bf16.gmra.mxu0 %v4735_v22  ;;  %3105 = vmatmul.bf16.gmra.mxu2 %v4799_v31 }
 0x349   : > { %3154 = vmatmul.bf16.gmra.mxu1 %v4739_v50  ;;  %3194 = vmatmul.bf16.gmra.mxu3 %v4803_v11  ;;  %v2759_v50 = vld [vmem:[#allocation4 + $0x18] sm:$0xff] }
 0x358   : > { %3070 = vmatmul.bf16.gmra.mxu0 %v4743_v38  ;;  %3110 = vmatmul.bf16.gmra.mxu2 %v4807_v59  ;;  %v2776_v59 = vld [vmem:[#allocation4 + $0xd8] sm:$0xff] }
 0x359   : > { %3159 = vmatmul.bf16.gmra.mxu1 %v4747_v10  ;;  %3199 = vmatmul.bf16.gmra.mxu3 %v4811_v14 }
 0x368   : > { %3075 = vmatmul.bf16.gmra.mxu0 %v4751_v63  ;;  %3115 = vmatmul.bf16.gmra.mxu2 %v4815_v8  ;;  %v2761_v63 = vld [vmem:[#allocation4 + $0x8] sm:$0xff] }
 0x369   : > { %3164 = vmatmul.bf16.gmra.mxu1 %v4755_v62  ;;  %3204 = vmatmul.bf16.gmra.mxu3 %v4819_v51  ;;  %v2762_v62 = vld [vmem:[#allocation4] sm:$0xff] }
 0x378   : > { %3080 = vmatmul.bf16.gmra.mxu0 %v4759_v18  ;;  %3120 = vmatmul.bf16.gmra.mxu2 %v4823_v41 }
 0x379   : > { %3169 = vmatmul.bf16.gmra.mxu1 %v4763_v56  ;;  %3209 = vmatmul.bf16.gmra.mxu3 %v4827_v61 }
 0x388   : > { %3085 = vmatmul.bf16.gmra.mxu0 %v4767_v12  ;;  %3125 = vmatmul.bf16.gmra.mxu2 %v4831_v53  ;;  %v2764_v12 = vld [vmem:[#allocation4 + $0xc0] sm:$0xff] }
 0x389   : > { %3174 = vmatmul.bf16.gmra.mxu1 %v4771_v35  ;;  %3214 = vmatmul.bf16.gmra.mxu3 %v4835_v39 }
 0x398   : > { %3090 = vmatmul.bf16.gmra.mxu0 %v4775_v7  ;;  %3130 = vmatmul.bf16.gmra.mxu2 %v4839_v34 }
 0x399   : > { %3179 = vmatmul.bf16.gmra.mxu1 %v4779_v29  ;;  %3219 = vmatmul.bf16.gmra.mxu3 %v4843_v40 }
 0x3a5   : > { %v3056_v22 = vpop.f32.mrf.mxu0 }
 0x3a6   : > { %v3145_v31 = vpop.f32.mrf.mxu1  ;;  %v3057_v43 = vadd.f32 %v3056_v22, %v2759_v50 }
 0x3a8   : > { %v3146_v48 = vadd.f32 %v3145_v31, %v3057_v43 }
 0x3ab   : > { %v3096_v11 = vpop.f32.mrf.mxu2 }
 0x3ac   : > { %v3185_v2 = vpop.f32.mrf.mxu3  ;;  %v3097_v10 = vadd.f32 %v3096_v11, %v2775_v33 }
 0x3ad   : > { %v3058_v47 = vpop.f32.mrf.mxu0 }
 0x3ae   : > { %v3059_v37 = vadd.f32 %v3058_v47, %v2760_v42  ;;  %v3147_v45 = vpop.f32.mrf.mxu1  ;;  %v3186_v9 = vadd.f32 %v3185_v2, %v3097_v10  ;;  %v2765_v42 = vld [vmem:[#allocation4 + $0xa0] sm:$0xff]  ;;  %v2766_v2 = vld [vmem:[#allocation4 + $0xa8] sm:$0xff] }
 0x3b0   : > { %v3148_v38 = vadd.f32 %v3147_v45, %v3059_v37 }
 0x3b2   : > { %v5598_v14 = vpack.c.bf16 %v3148_v38, %v3146_v48  ;;  %v2781_v38 = vld [vmem:[#allocation4 + $0xc8] sm:$0xff] }
 0x3b3   : > { %v3098_v25 = vpop.f32.mrf.mxu2 }
 0x3b4   : > { %5599 = vst [vmem:[#allocation6 + $0x38] sm:$0xff] %v5598_v14   ;;  %v3099_v54 = vadd.f32 %v3098_v25, %v2776_v59  ;;  %v3187_v23 = vpop.f32.mrf.mxu3  ;;  %v2782_v14 = vld [vmem:[#allocation4 + $0x40] sm:$0xff] }
 0x3b5   : > { %v3061_v36 = vpop.f32.mrf.mxu0 }
 0x3b6   : > { %v3188_v30 = vadd.f32 %v3187_v23, %v3099_v54  ;;  %v3150_v21 = vpop.f32.mrf.mxu1  ;;  %v3062_v51 = vadd.f32 %v3061_v36, %v2761_v63 }
 0x3b8   : > { %v5638_v3 = vpack.c.bf16 %v3188_v30, %v3186_v9  ;;  %v3151_v26 = vadd.f32 %v3150_v21, %v3062_v51 }
 0x3ba   : > { %5792 = vst [vmem:[#allocation6 + $0x8] sm:$0xff] %v5638_v3  }
 0x3bb   : > { %v3101_v8 = vpop.f32.mrf.mxu2 }
 0x3bc   : > { %v3190_v15 = vpop.f32.mrf.mxu3  ;;  %v3102_v18 = vadd.f32 %v3101_v8, %v2777_v5 }
 0x3bd   : > { %v3063_v20 = vpop.f32.mrf.mxu0 }
 0x3be   : > { %v3064_v58 = vadd.f32 %v3063_v20, %v2762_v62  ;;  %v3152_v28 = vpop.f32.mrf.mxu1  ;;  %v3191_v27 = vadd.f32 %v3190_v15, %v3102_v18  ;;  %v2767_v62 = vld [vmem:[#allocation4 + $0x48] sm:$0xff] }
 0x3bf   : > { %v2768_v15 = vld [vmem:[#allocation4 + $0x68] sm:$0xff] }
 0x3c0   : > { %v3153_v1 = vadd.f32 %v3152_v28, %v3064_v58 }
 0x3c2   : > { %v5603_v41 = vpack.c.bf16 %v3153_v1, %v3151_v26  ;;  %v2783_v1 = vld [vmem:[#allocation4 + $0xf0] sm:$0xff] }
 0x3c3   : > { %v3103_v56 = vpop.f32.mrf.mxu2 }
 0x3c4   : > { %5785 = vst [vmem:[#allocation6 + $0x30] sm:$0xff] %v5603_v41   ;;  %v3104_v61 = vadd.f32 %v3103_v56, %v2778_v44  ;;  %v3192_v19 = vpop.f32.mrf.mxu3  ;;  %v2784_v41 = vld [vmem:[#allocation4 + $0xd0] sm:$0xff] }
 0x3c5   : > { %v3066_v52 = vpop.f32.mrf.mxu0 }
 0x3c6   : > { %v3193_v55 = vadd.f32 %v3192_v19, %v3104_v61  ;;  %v3155_v4 = vpop.f32.mrf.mxu1  ;;  %v3067_v53 = vadd.f32 %v3066_v52, %v2763_v6 }
 0x3c8   : > { %v5643_v32 = vpack.c.bf16 %v3193_v55, %v3191_v27  ;;  %v3156_v24 = vadd.f32 %v3155_v4, %v3067_v53 }
 0x3ca   : > { %5793 = vst [vmem:[#allocation6 + $0x78] sm:$0xff] %v5643_v32  }
 0x3cb   : > { %v3106_v16 = vpop.f32.mrf.mxu2 }
 0x3cc   : > { %v3195_v35 = vpop.f32.mrf.mxu3  ;;  %v3107_v17 = vadd.f32 %v3106_v16, %v2779_v60 }
 0x3cd   : > { %v3068_v39 = vpop.f32.mrf.mxu0 }
 0x3ce   : > { %v3069_v0 = vadd.f32 %v3068_v39, %v2764_v12  ;;  %v3157_v46 = vpop.f32.mrf.mxu1  ;;  %v3196_v22 = vadd.f32 %v3195_v35, %v3107_v17  ;;  %v2769_v12 = vld [vmem:[#allocation4 + $0x88] sm:$0xff] }
 0x3cf   : > { %v2770_v35 = vld [vmem:[#allocation4 + $0x28] sm:$0xff] }
 0x3d0   : > { %v3158_v13 = vadd.f32 %v3157_v46, %v3069_v0 }
 0x3d2   : > { %v5608_v57 = vpack.c.bf16 %v3158_v13, %v3156_v24  ;;  %v2785_v13 = vld [vmem:[#allocation4 + $0xe8] sm:$0xff] }
 0x3d3   : > { %v3108_v7 = vpop.f32.mrf.mxu2 }
 0x3d4   : > { %5786 = vst [vmem:[#allocation6 + $0x58] sm:$0xff] %v5608_v57   ;;  %v3109_v34 = vadd.f32 %v3108_v7, %v2780_v49  ;;  %v3197_v29 = vpop.f32.mrf.mxu3  ;;  %v2786_v57 = vld [vmem:[#allocation4 + $0x60] sm:$0xff] }
 0x3d5   : > { %v3071_v40 = vpop.f32.mrf.mxu0 }
 0x3d6   : > { %v3198_v31 = vadd.f32 %v3197_v29, %v3109_v34  ;;  %v3160_v50 = vpop.f32.mrf.mxu1  ;;  %v3072_v47 = vadd.f32 %v3071_v40, %v2765_v42 }
 0x3d8   : > { %v5648_v11 = vpack.c.bf16 %v3198_v31, %v3196_v22  ;;  %v3161_v59 = vadd.f32 %v3160_v50, %v3072_v47 }
 0x3da   : > { %5794 = vst [vmem:[#allocation6 + $0x50] sm:$0xff] %v5648_v11  }
 0x3db   : > { %v3111_v43 = vpop.f32.mrf.mxu2 }
 0x3dc   : > { %v3200_v37 = vpop.f32.mrf.mxu3  ;;  %v3112_v25 = vadd.f32 %v3111_v43, %v2781_v38 }
 0x3dd   : > { %v3073_v45 = vpop.f32.mrf.mxu0 }
 0x3de   : > { %v3074_v33 = vadd.f32 %v3073_v45, %v2766_v2  ;;  %v3162_v48 = vpop.f32.mrf.mxu1  ;;  %v3201_v21 = vadd.f32 %v3200_v37, %v3112_v25  ;;  %v2771_v2 = vld [vmem:[#allocation4 + $0xb8] sm:$0xff]  ;;  %v2772_v37 = vld [vmem:[#allocation4 + $0x90] sm:$0xff] }
 0x3e0   : > { %v3163_v10 = vadd.f32 %v3162_v48, %v3074_v33 }
 0x3e2   : > { %v5613_v54 = vpack.c.bf16 %v3163_v10, %v3161_v59  ;;  %v2787_v10 = vld [vmem:[#allocation4 + $0xb0] sm:$0xff] }
 0x3e3   : > { %v3113_v23 = vpop.f32.mrf.mxu2 }
 0x3e4   : > { %5787 = vst [vmem:[#allocation6 + $0x28] sm:$0xff] %v5613_v54   ;;  %v3114_v36 = vadd.f32 %v3113_v23, %v2782_v14  ;;  %v3202_v9 = vpop.f32.mrf.mxu3  ;;  %v2788_v54 = vld [vmem:[#allocation4 + $0x58] sm:$0xff] }
 0x3e5   : > { %v3076_v30 = vpop.f32.mrf.mxu0 }
 0x3e6   : > { %v3203_v3 = vadd.f32 %v3202_v9, %v3114_v36  ;;  %v3165_v63 = vpop.f32.mrf.mxu1  ;;  %v3077_v20 = vadd.f32 %v3076_v30, %v2767_v62 }
 0x3e8   : > { %v5653_v8 = vpack.c.bf16 %v3203_v3, %v3201_v21  ;;  %v3166_v44 = vadd.f32 %v3165_v63, %v3077_v20 }
 0x3ea   : > { %5795 = vst [vmem:[#allocation6 + $0x10] sm:$0xff] %v5653_v8  }
 0x3eb   : > { %v3116_v51 = vpop.f32.mrf.mxu2 }
 0x3ec   : > { %v3205_v58 = vpop.f32.mrf.mxu3  ;;  %v3117_v56 = vadd.f32 %v3116_v51, %v2783_v1 }
 0x3ed   : > { %v3078_v28 = vpop.f32.mrf.mxu0 }
 0x3ee   : > { %v3079_v5 = vadd.f32 %v3078_v28, %v2768_v15  ;;  %v3167_v26 = vpop.f32.mrf.mxu1  ;;  %v3206_v4 = vadd.f32 %v3205_v58, %v3117_v56  ;;  %v2773_v15 = vld [vmem:[#allocation4 + $0xe0] sm:$0xff]  ;;  %v2774_v58 = vld [vmem:[#allocation4 + $0x30] sm:$0xff] }
 0x3f0   : > { %v3168_v18 = vadd.f32 %v3167_v26, %v3079_v5 }
 0x3f2   : > { %v5618_v61 = vpack.c.bf16 %v3168_v18, %v3166_v44  ;;  %v2789_v44 = vld [vmem:[#allocation4 + $0x98] sm:$0xff] }
 0x3f3   : > { %v3118_v19 = vpop.f32.mrf.mxu2 }
 0x3f4   : > { %5788 = vst [vmem:[#allocation6 + $0x70] sm:$0xff] %v5618_v61   ;;  %v3119_v52 = vadd.f32 %v3118_v19, %v2784_v41  ;;  %v3207_v27 = vpop.f32.mrf.mxu3  ;;  %v2790_v61 = vld [vmem:[#allocation4 + $0x78] sm:$0xff] }
 0x3f5   : > { %v3081_v55 = vpop.f32.mrf.mxu0 }
 0x3f6   : > { %v3208_v32 = vadd.f32 %v3207_v27, %v3119_v52  ;;  %v3170_v6 = vpop.f32.mrf.mxu1  ;;  %v3082_v39 = vadd.f32 %v3081_v55, %v2769_v12 }
 0x3f8   : > { %v5658_v16 = vpack.c.bf16 %v3208_v32, %v3206_v4  ;;  %v3171_v49 = vadd.f32 %v3170_v6, %v3082_v39 }
 0x3fa   : > { %5796 = vst [vmem:[#allocation6] sm:$0xff] %v5658_v16  }
 0x3fb   : > { %v3121_v53 = vpop.f32.mrf.mxu2 }
 0x3fc   : > { %v3210_v0 = vpop.f32.mrf.mxu3  ;;  %v3122_v7 = vadd.f32 %v3121_v53, %v2785_v13 }
 0x3fd   : > { %v3083_v46 = vpop.f32.mrf.mxu0 }
 0x3fe   : > { %v3084_v60 = vadd.f32 %v3083_v46, %v2770_v35  ;;  %v3172_v24 = vpop.f32.mrf.mxu1  ;;  %v3211_v50 = vadd.f32 %v3210_v0, %v3122_v7 }
 0x400   : > { %v3173_v17 = vadd.f32 %v3172_v24, %v3084_v60 }
 0x402   : > { %v5623_v34 = vpack.c.bf16 %v3173_v17, %v3171_v49 }
 0x403   : > { %v3123_v29 = vpop.f32.mrf.mxu2 }
 0x404   : > { %5789 = vst [vmem:[#allocation6 + $0x40] sm:$0xff] %v5623_v34   ;;  %v3124_v40 = vadd.f32 %v3123_v29, %v2786_v57  ;;  %v3212_v22 = vpop.f32.mrf.mxu3 }
 0x405   : > { %v3086_v31 = vpop.f32.mrf.mxu0 }
 0x406   : > { %v3213_v11 = vadd.f32 %v3212_v22, %v3124_v40  ;;  %v3175_v42 = vpop.f32.mrf.mxu1  ;;  %v3087_v45 = vadd.f32 %v3086_v31, %v2771_v2 }
 0x408   : > { %v5663_v43 = vpack.c.bf16 %v3213_v11, %v3211_v50  ;;  %v3176_v14 = vadd.f32 %v3175_v42, %v3087_v45 }
 0x40a   : > { %5797 = vst [vmem:[#allocation6 + $0x60] sm:$0xff] %v5663_v43  }
 0x40b   : > { %v3126_v47 = vpop.f32.mrf.mxu2 }
 0x40c   : > { %v3215_v33 = vpop.f32.mrf.mxu3  ;;  %v3127_v23 = vadd.f32 %v3126_v47, %v2787_v10 }
 0x40d   : > { %v3088_v48 = vpop.f32.mrf.mxu0 }
 0x40e   : > { %v3089_v38 = vadd.f32 %v3088_v48, %v2772_v37  ;;  %v3177_v59 = vpop.f32.mrf.mxu1  ;;  %v3216_v63 = vadd.f32 %v3215_v33, %v3127_v23 }
 0x410   : > { %v3178_v25 = vadd.f32 %v3177_v59, %v3089_v38 }
 0x412   : > { %v5628_v36 = vpack.c.bf16 %v3178_v25, %v3176_v14 }
 0x413   : > { %v3128_v9 = vpop.f32.mrf.mxu2 }
 0x414   : > { %5790 = vst [vmem:[#allocation6 + $0x20] sm:$0xff] %v5628_v36   ;;  %v3129_v30 = vadd.f32 %v3128_v9, %v2788_v54  ;;  %v3217_v21 = vpop.f32.mrf.mxu3 }
 0x415   : > { %v3091_v3 = vpop.f32.mrf.mxu0 }
 0x416   : > { %v3218_v8 = vadd.f32 %v3217_v21, %v3129_v30  ;;  %v3180_v62 = vpop.f32.mrf.mxu1  ;;  %v3092_v28 = vadd.f32 %v3091_v3, %v2773_v15 }
 0x418   : > { %v5668_v51 = vpack.c.bf16 %v3218_v8, %v3216_v63  ;;  %v3181_v41 = vadd.f32 %v3180_v62, %v3092_v28 }
 0x41a   : > { %5798 = vst [vmem:[#allocation6 + $0x18] sm:$0xff] %v5668_v51  }
 0x41b   : > { %v3131_v20 = vpop.f32.mrf.mxu2 }
 0x41c   : > { %v3220_v5 = vpop.f32.mrf.mxu3  ;;  %v3132_v19 = vadd.f32 %v3131_v20, %v2789_v44 }
 0x41d   : > { %v3093_v26 = vpop.f32.mrf.mxu0 }
 0x41e   : > { %v3094_v1 = vadd.f32 %v3093_v26, %v2774_v58  ;;  %v3182_v18 = vpop.f32.mrf.mxu1  ;;  %v3221_v32 = vadd.f32 %v3220_v5, %v3132_v19 }
 0x420   : > { %v3183_v56 = vadd.f32 %v3182_v18, %v3094_v1 }
 0x422   : > { %v5633_v52 = vpack.c.bf16 %v3183_v56, %v3181_v41 }
 0x423   : > { %v3133_v27 = vpop.f32.mrf.mxu2 }
 0x424   : > { %5791 = vst [vmem:[#allocation6 + $0x68] sm:$0xff] %v5633_v52   ;;  %v3134_v55 = vadd.f32 %v3133_v27, %v2790_v61  ;;  %v3222_v4 = vpop.f32.mrf.mxu3 }
 0x426   : > { %v3223_v6 = vadd.f32 %v3222_v4, %v3134_v55 }
 0x428   : > { %v5673_v16 = vpack.c.bf16 %v3223_v6, %v3221_v32 }
 0x42a   : > { %5799 = vst [vmem:[#allocation6 + $0x48] sm:$0xff] %v5673_v16  }
 0x42b PF: > { %p3293_p0 = scmp.eq.s32.totalorder %s7426_s22, 0 }
 0x42d   : > { %p3294_p1 = pnand %p3293_p0, %p2676_p11 }
 0x42f   : > { %3297 = sbr.rel (%p3294_p1) target bundleno = 1367 (0x557), region = 80 }
 0x434   : > { %v5401_v12 = vld [vmem:[#allocation6 + $0x68] sm:$0xff]  ;;  %v5400_v35 = vld [vmem:[#allocation6 + $0x20] sm:$0xff]  ;;  %v5408_v39 = vld [vmem:[#allocation6 + $0x18] sm:$0xff] }
 0x435   : > { %v5409_v53 = vld [vmem:[#allocation6 + $0x48] sm:$0xff]  ;;  %3651 = vmatpush.bf16.msra.mxu0 %v5401_v12  ;;  %5847 = vmatpush.bf16.msra.mxu2 %v5401_v12  ;;  %v5399_v0 = vld [vmem:[#allocation6 + $0x40] sm:$0xff]  ;;  %v5398_v60 = vld [vmem:[#allocation6 + $0x70] sm:$0xff] }
 0x436   : > { %3740 = vmatpush.bf16.msra.mxu1 %v5409_v53  ;;  %5855 = vmatpush.bf16.msra.mxu3 %v5409_v53  ;;  %v5407_v46 = vld [vmem:[#allocation6 + $0x60] sm:$0xff]  ;;  %v5397_v13 = vld [vmem:[#allocation6 + $0x28] sm:$0xff]  ;;  %v5405_v49 = vld [vmem:[#allocation6 + $0x10] sm:$0xff] }
 0x437   : > { %v5406_v24 = vld [vmem:[#allocation6] sm:$0xff]  ;;  %v5396_v17 = vld [vmem:[#allocation6 + $0x58] sm:$0xff]  ;;  %v5404_v57 = vld [vmem:[#allocation6 + $0x50] sm:$0xff] }
 0x438   : > { %v5395_v7 = vld [vmem:[#allocation6 + $0x30] sm:$0xff]  ;;  %v5403_v34 = vld [vmem:[#allocation6 + $0x78] sm:$0xff]  ;;  %v5402_v40 = vld [vmem:[#allocation6 + $0x8] sm:$0xff] }
 0x439   : > { %3652 = vmatpush.bf16.msra.mxu0 %v5400_v35  ;;  %5848 = vmatpush.bf16.msra.mxu2 %v5400_v35  ;;  %v5394_v29 = vld [vmem:[#allocation6 + $0x38] sm:$0xff]  ;;  %v5363_v31 = vld [vmem:[%s7397_s0 + $0x4] sm:$0xf0]  ;;  %v4912_v43 = vld [vmem:[%s7397_s0 + $0x8] sm:$0xf0] }
 0x43a   : > { %3741 = vmatpush.bf16.msra.mxu1 %v5408_v39  ;;  %5856 = vmatpush.bf16.msra.mxu3 %v5408_v39  ;;  %v4910_v22 = vld [vmem:[%s7397_s0] sm:$0xf]  ;;  %v5379_v11 = vld [vmem:[%s7397_s0 + $0x84] sm:$0xf0]  ;;  %v5362_v42 = vld [vmem:[%s7397_s0 + $0x4] sm:$0xf] }
 0x43b   : > { %v4974_v50 = vld [vmem:[%s7397_s0 + $0x80] sm:$0xf]  ;;  %v5378_v2 = vld [vmem:[%s7397_s0 + $0x84] sm:$0xf]  ;;  %v4976_v47 = vld [vmem:[%s7397_s0 + $0x88] sm:$0xf0]  ;;  %v4911_v37 = vor.u32 %v5363_v31, %v4910_v22  ;;  %v4915_v33 = vor.u32 %v5362_v42, %v4912_v43 }
 0x43c   : > { %v4975_v45 = vor.u32 %v5379_v11, %v4974_v50  ;;  %v4979_v48 = vor.u32 %v5378_v2, %v4976_v47  ;;  %v4918_v38 = vld [vmem:[%s7397_s0 + $0x10] sm:$0xf]  ;;  %v5365_v59 = vld [vmem:[%s7397_s0 + $0x14] sm:$0xf0]  ;;  %v5364_v25 = vld [vmem:[%s7397_s0 + $0x14] sm:$0xf] }
 0x43d   : > { %3653 = vmatpush.bf16.msra.mxu0 %v5399_v0  ;;  %5849 = vmatpush.bf16.msra.mxu2 %v5399_v0  ;;  %v4982_v10 = vld [vmem:[%s7397_s0 + $0x90] sm:$0xf]  ;;  %v5381_v14 = vld [vmem:[%s7397_s0 + $0x94] sm:$0xf0]  ;;  %v4920_v54 = vld [vmem:[%s7397_s0 + $0x18] sm:$0xf0]  ;;  %v4919_v9 = vor.u32 %v5365_v59, %v4918_v38 }
 0x43e   : > { %3742 = vmatpush.bf16.msra.mxu1 %v5407_v46  ;;  %5857 = vmatpush.bf16.msra.mxu3 %v5407_v46  ;;  %v5380_v23 = vld [vmem:[%s7397_s0 + $0x94] sm:$0xf]  ;;  %v4984_v36 = vld [vmem:[%s7397_s0 + $0x98] sm:$0xf0]  ;;  %v4983_v30 = vor.u32 %v5381_v14, %v4982_v10  ;;  %v4923_v21 = vor.u32 %v5364_v25, %v4920_v54  ;;  %v4926_v63 = vld [vmem:[%s7397_s0 + $0x20] sm:$0xf] }
 0x43f   : > { %v4987_v3 = vor.u32 %v5380_v23, %v4984_v36  ;;  %v5367_v8 = vld [vmem:[%s7397_s0 + $0x24] sm:$0xf0]  ;;  %v4990_v62 = vld [vmem:[%s7397_s0 + $0xa0] sm:$0xf]  ;;  %v5366_v15 = vld [vmem:[%s7397_s0 + $0x24] sm:$0xf] }
 0x440   : > { %v5383_v51 = vld [vmem:[%s7397_s0 + $0xa4] sm:$0xf0]  ;;  %v4928_v20 = vld [vmem:[%s7397_s0 + $0x28] sm:$0xf0]  ;;  %v5382_v58 = vld [vmem:[%s7397_s0 + $0xa4] sm:$0xf]  ;;  %v4927_v5 = vor.u32 %v5367_v8, %v4926_v63 }
 0x441   : > { %3654 = vmatpush.bf16.msra.mxu0 %v5398_v60  ;;  %5850 = vmatpush.bf16.msra.mxu2 %v5398_v60  ;;  %v4992_v28 = vld [vmem:[%s7397_s0 + $0xa8] sm:$0xf0]  ;;  %v4991_v26 = vor.u32 %v5383_v51, %v4990_v62  ;;  %v4931_v1 = vor.u32 %v5366_v15, %v4928_v20  ;;  %v4934_v18 = vld [vmem:[%s7397_s0 + $0x30] sm:$0xf]  ;;  %v5369_v41 = vld [vmem:[%s7397_s0 + $0x34] sm:$0xf0] }
 0x442   : > { %3743 = vmatpush.bf16.msra.mxu1 %v5406_v24  ;;  %5858 = vmatpush.bf16.msra.mxu3 %v5406_v24  ;;  %v4995_v44 = vor.u32 %v5382_v58, %v4992_v28  ;;  %v4998_v56 = vld [vmem:[%s7397_s0 + $0xb0] sm:$0xf]  ;;  %v5385_v61 = vld [vmem:[%s7397_s0 + $0xb4] sm:$0xf0]  ;;  %v5368_v19 = vld [vmem:[%s7397_s0 + $0x34] sm:$0xf]  ;;  %v4935_v4 = vor.u32 %v5369_v41, %v4934_v18 }
 0x443   : > { %v4936_v52 = vld [vmem:[%s7397_s0 + $0x38] sm:$0xf0]  ;;  %v5384_v27 = vld [vmem:[%s7397_s0 + $0xb4] sm:$0xf]  ;;  %v4999_v32 = vor.u32 %v5385_v61, %v4998_v56  ;;  %v4942_v12 = vld [vmem:[%s7397_s0 + $0x40] sm:$0xf] }
 0x444   : > { %v5000_v55 = vld [vmem:[%s7397_s0 + $0xb8] sm:$0xf0]  ;;  %v4939_v6 = vor.u32 %v5368_v19, %v4936_v52  ;;  %v5371_v53 = vld [vmem:[%s7397_s0 + $0x44] sm:$0xf0]  ;;  %v5006_v35 = vld [vmem:[%s7397_s0 + $0xc0] sm:$0xf] }
 0x445   : > { %3655 = vmatpush.bf16.msra.mxu0 %v5397_v13  ;;  %5851 = vmatpush.bf16.msra.mxu2 %v5397_v13  ;;  %v5003_v16 = vor.u32 %v5384_v27, %v5000_v55  ;;  %v5387_v39 = vld [vmem:[%s7397_s0 + $0xc4] sm:$0xf0]  ;;  %v5370_v0 = vld [vmem:[%s7397_s0 + $0x44] sm:$0xf]  ;;  %v4944_v46 = vld [vmem:[%s7397_s0 + $0x48] sm:$0xf0]  ;;  %v4943_v13 = vor.u32 %v5371_v53, %v4942_v12 }
 0x446   : > { %3744 = vmatpush.bf16.msra.mxu1 %v5405_v49  ;;  %5859 = vmatpush.bf16.msra.mxu3 %v5405_v49  ;;  %v5386_v60 = vld [vmem:[%s7397_s0 + $0xc4] sm:$0xf]  ;;  %v5008_v24 = vld [vmem:[%s7397_s0 + $0xc8] sm:$0xf0]  ;;  %v5007_v49 = vor.u32 %v5387_v39, %v5006_v35  ;;  %v5372_v22 = vld [vmem:[%s7397_s0 + $0x54] sm:$0xf] }
 0x447   : > { %v4952_v31 = vld [vmem:[%s7397_s0 + $0x58] sm:$0xf0]  ;;  %v5388_v50 = vld [vmem:[%s7397_s0 + $0xd4] sm:$0xf]  ;;  %v5374_v38 = vld [vmem:[%s7397_s0 + $0x64] sm:$0xf] }
 0x448   : > { %v5016_v11 = vld [vmem:[%s7397_s0 + $0xd8] sm:$0xf0]  ;;  %v4955_v2 = vor.u32 %v5372_v22, %v4952_v31  ;;  %v4960_v59 = vld [vmem:[%s7397_s0 + $0x68] sm:$0xf0]  ;;  %v5390_v10 = vld [vmem:[%s7397_s0 + $0xe4] sm:$0xf] }
 0x449   : > { %3656 = vmatpush.bf16.msra.mxu0 %v5396_v17  ;;  %5852 = vmatpush.bf16.msra.mxu2 %v5396_v17  ;;  %v4947_v17 = vor.u32 %v5370_v0, %v4944_v46  ;;  %v5019_v47 = vor.u32 %v5388_v50, %v5016_v11  ;;  %v5024_v14 = vld [vmem:[%s7397_s0 + $0xe8] sm:$0xf0]  ;;  %v4963_v23 = vor.u32 %v5374_v38, %v4960_v59  ;;  %v5376_v63 = vld [vmem:[%s7397_s0 + $0x74] sm:$0xf]  ;;  %v4968_v8 = vld [vmem:[%s7397_s0 + $0x78] sm:$0xf0] }
 0x44a   : > { %3745 = vmatpush.bf16.msra.mxu1 %v5404_v57  ;;  %5860 = vmatpush.bf16.msra.mxu3 %v5404_v57  ;;  %v5011_v57 = vor.u32 %v5386_v60, %v5008_v24  ;;  %v5027_v36 = vor.u32 %v5390_v10, %v5024_v14  ;;  %v5392_v62 = vld [vmem:[%s7397_s0 + $0xf4] sm:$0xf]  ;;  %v5032_v51 = vld [vmem:[%s7397_s0 + $0xf8] sm:$0xf0]  ;;  %v4971_v58 = vor.u32 %v5376_v63, %v4968_v8  ;;  %v3379_v27 = vld [vmem:[#allocation4 + $0x20] sm:$0xff] }
 0x44b   : > { %v5035_v28 = vor.u32 %v5392_v62, %v5032_v51  ;;  %v3364_v18 = vld [vmem:[#allocation4 + $0x70] sm:$0xff]  ;;  %v3381_v22 = vld [vmem:[#allocation4 + $0xf8] sm:$0xff]  ;;  %v3384_v8 = vld [vmem:[#allocation4 + $0x80] sm:$0xff] }
 0x44c   : > { %v3382_v11 = vld [vmem:[#allocation4 + $0x10] sm:$0xff]  ;;  %v3367_v10 = vld [vmem:[#allocation4 + $0x38] sm:$0xff] }
 0x44d   : > { %3657 = vmatpush.bf16.msra.mxu0 %v5395_v7  ;;  %5853 = vmatpush.bf16.msra.mxu2 %v5395_v7  ;;  %v4950_v7 = vld [vmem:[%s7397_s0 + $0x50] sm:$0xf] }
 0x44e   : > { %3746 = vmatpush.bf16.msra.mxu1 %v5403_v34  ;;  %5861 = vmatpush.bf16.msra.mxu3 %v5403_v34  ;;  %v5373_v34 = vld [vmem:[%s7397_s0 + $0x54] sm:$0xf0] }
 0x44f   : > { %v4951_v42 = vor.u32 %v5373_v34, %v4950_v7 }
 0x451   : > { %3658 = vmatpush.bf16.msra.mxu0 %v5394_v29  ;;  %5854 = vmatpush.bf16.msra.mxu2 %v5394_v29  ;;  %v5014_v29 = vld [vmem:[%s7397_s0 + $0xd0] sm:$0xf] }
 0x452   : > { %3747 = vmatpush.bf16.msra.mxu1 %v5402_v40  ;;  %5862 = vmatpush.bf16.msra.mxu3 %v5402_v40  ;;  %v5389_v40 = vld [vmem:[%s7397_s0 + $0xd4] sm:$0xf0] }
 0x453   : > { %v5015_v43 = vor.u32 %v5389_v40, %v5014_v29 }
 0x454   : > { %3659 = vmatmul.bf16.vlgmr.msra.gmra.mxu0 %v4911_v37  ;;  %3699 = vmatmul.bf16.vlgmr.msra.gmra.mxu2 %v4975_v45  ;;  %v4958_v37 = vld [vmem:[%s7397_s0 + $0x60] sm:$0xf]  ;;  %v5375_v45 = vld [vmem:[%s7397_s0 + $0x64] sm:$0xf0] }
 0x455   : > { %3748 = vmatmul.bf16.vlgmr.msra.gmra.mxu1 %v4915_v33  ;;  %3788 = vmatmul.bf16.vlgmr.msra.gmra.mxu3 %v4979_v48  ;;  %v5022_v33 = vld [vmem:[%s7397_s0 + $0xe0] sm:$0xf]  ;;  %v5391_v48 = vld [vmem:[%s7397_s0 + $0xe4] sm:$0xf0]  ;;  %v4959_v25 = vor.u32 %v5375_v45, %v4958_v37 }
 0x456   : > { %v5023_v54 = vor.u32 %v5391_v48, %v5022_v33 }
 0x464   : > { %3664 = vmatmul.bf16.gmra.mxu0 %v4919_v9  ;;  %3704 = vmatmul.bf16.gmra.mxu2 %v4983_v30  ;;  %v4966_v9 = vld [vmem:[%s7397_s0 + $0x70] sm:$0xf]  ;;  %v5377_v30 = vld [vmem:[%s7397_s0 + $0x74] sm:$0xf0] }
 0x465   : > { %3753 = vmatmul.bf16.gmra.mxu1 %v4923_v21  ;;  %3793 = vmatmul.bf16.gmra.mxu3 %v4987_v3  ;;  %v5030_v21 = vld [vmem:[%s7397_s0 + $0xf0] sm:$0xf]  ;;  %v5393_v3 = vld [vmem:[%s7397_s0 + $0xf4] sm:$0xf0]  ;;  %v4967_v15 = vor.u32 %v5377_v30, %v4966_v9 }
 0x466   : > { %v5031_v20 = vor.u32 %v5393_v3, %v5030_v21  ;;  %v3383_v21 = vld [vmem:[#allocation4 + $0x50] sm:$0xff] }
 0x474   : > { %3669 = vmatmul.bf16.gmra.mxu0 %v4927_v5  ;;  %3709 = vmatmul.bf16.gmra.mxu2 %v4991_v26 }
 0x475   : > { %3758 = vmatmul.bf16.gmra.mxu1 %v4931_v1  ;;  %3798 = vmatmul.bf16.gmra.mxu3 %v4995_v44  ;;  %v3363_v1 = vld [vmem:[#allocation4 + $0x18] sm:$0xff] }
 0x484   : > { %3674 = vmatmul.bf16.gmra.mxu0 %v4935_v4  ;;  %3714 = vmatmul.bf16.gmra.mxu2 %v4999_v32  ;;  %v3380_v32 = vld [vmem:[#allocation4 + $0xd8] sm:$0xff] }
 0x485   : > { %3763 = vmatmul.bf16.gmra.mxu1 %v4939_v6  ;;  %3803 = vmatmul.bf16.gmra.mxu3 %v5003_v16 }
 0x494   : > { %3679 = vmatmul.bf16.gmra.mxu0 %v4943_v13  ;;  %3719 = vmatmul.bf16.gmra.mxu2 %v5007_v49  ;;  %v3365_v13 = vld [vmem:[#allocation4 + $0x8] sm:$0xff] }
 0x495   : > { %3768 = vmatmul.bf16.gmra.mxu1 %v4947_v17  ;;  %3808 = vmatmul.bf16.gmra.mxu3 %v5011_v57  ;;  %v3366_v17 = vld [vmem:[#allocation4] sm:$0xff] }
 0x4a4   : > { %3684 = vmatmul.bf16.gmra.mxu0 %v4951_v42  ;;  %3724 = vmatmul.bf16.gmra.mxu2 %v5015_v43 }
 0x4a5   : > { %3773 = vmatmul.bf16.gmra.mxu1 %v4955_v2  ;;  %3813 = vmatmul.bf16.gmra.mxu3 %v5019_v47 }
 0x4b4   : > { %3689 = vmatmul.bf16.gmra.mxu0 %v4959_v25  ;;  %3729 = vmatmul.bf16.gmra.mxu2 %v5023_v54  ;;  %v3368_v25 = vld [vmem:[#allocation4 + $0xc0] sm:$0xff] }
 0x4b5   : > { %3778 = vmatmul.bf16.gmra.mxu1 %v4963_v23  ;;  %3818 = vmatmul.bf16.gmra.mxu3 %v5027_v36 }
 0x4c4   : > { %3694 = vmatmul.bf16.gmra.mxu0 %v4967_v15  ;;  %3734 = vmatmul.bf16.gmra.mxu2 %v5031_v20 }
 0x4c5   : > { %3783 = vmatmul.bf16.gmra.mxu1 %v4971_v58  ;;  %3823 = vmatmul.bf16.gmra.mxu3 %v5035_v28 }
 0x4d1   : > { %v3660_v5 = vpop.f32.mrf.mxu0 }
 0x4d2   : > { %v3749_v26 = vpop.f32.mrf.mxu1  ;;  %v3661_v41 = vadd.f32 %v3660_v5, %v3363_v1 }
 0x4d4   : > { %v3750_v55 = vadd.f32 %v3749_v26, %v3661_v41 }
 0x4d7   : > { %v3700_v44 = vpop.f32.mrf.mxu2 }
 0x4d8   : > { %v3789_v56 = vpop.f32.mrf.mxu3  ;;  %v3701_v6 = vadd.f32 %v3700_v44, %v3379_v27 }
 0x4d9   : > { %v3662_v61 = vpop.f32.mrf.mxu0 }
 0x4da   : > { %v3663_v19 = vadd.f32 %v3662_v61, %v3364_v18  ;;  %v3751_v52 = vpop.f32.mrf.mxu1  ;;  %v3790_v0 = vadd.f32 %v3789_v56, %v3701_v6  ;;  %v3369_v18 = vld [vmem:[#allocation4 + $0xa0] sm:$0xff]  ;;  %v3370_v56 = vld [vmem:[#allocation4 + $0xa8] sm:$0xff] }
 0x4dc   : > { %v3752_v4 = vadd.f32 %v3751_v52, %v3663_v19 }
 0x4de   : > { %v5678_v16 = vpack.c.bf16 %v3752_v4, %v3750_v55  ;;  %v3385_v4 = vld [vmem:[#allocation4 + $0xc8] sm:$0xff] }
 0x4df   : > { %v3702_v12 = vpop.f32.mrf.mxu2 }
 0x4e0   : > { %5679 = vst [vmem:[#allocation5 + $0x20] sm:$0xff] %v5678_v16   ;;  %v3703_v53 = vadd.f32 %v3702_v12, %v3380_v32  ;;  %v3791_v35 = vpop.f32.mrf.mxu3  ;;  %v3386_v16 = vld [vmem:[#allocation4 + $0x40] sm:$0xff] }
 0x4e1   : > { %v3665_v39 = vpop.f32.mrf.mxu0 }
 0x4e2   : > { %v3792_v46 = vadd.f32 %v3791_v35, %v3703_v53  ;;  %v3754_v60 = vpop.f32.mrf.mxu1  ;;  %v3666_v57 = vadd.f32 %v3665_v39, %v3365_v13 }
 0x4e4   : > { %v5718_v24 = vpack.c.bf16 %v3792_v46, %v3790_v0  ;;  %v3755_v31 = vadd.f32 %v3754_v60, %v3666_v57 }
 0x4e6   : > { %5807 = vst [vmem:[#allocation5 + $0x58] sm:$0xff] %v5718_v24  }
 0x4e7   : > { %v3705_v49 = vpop.f32.mrf.mxu2 }
 0x4e8   : > { %v3794_v7 = vpop.f32.mrf.mxu3  ;;  %v3706_v42 = vadd.f32 %v3705_v49, %v3381_v22 }
 0x4e9   : > { %v3667_v34 = vpop.f32.mrf.mxu0 }
 0x4ea   : > { %v3668_v29 = vadd.f32 %v3667_v34, %v3366_v17  ;;  %v3756_v40 = vpop.f32.mrf.mxu1  ;;  %v3795_v33 = vadd.f32 %v3794_v7, %v3706_v42  ;;  %v3371_v17 = vld [vmem:[#allocation4 + $0x48] sm:$0xff] }
 0x4eb   : > { %v3372_v7 = vld [vmem:[#allocation4 + $0x68] sm:$0xff] }
 0x4ec   : > { %v3757_v50 = vadd.f32 %v3756_v40, %v3668_v29 }
 0x4ee   : > { %v5683_v43 = vpack.c.bf16 %v3757_v50, %v3755_v31  ;;  %v3387_v50 = vld [vmem:[#allocation4 + $0xf0] sm:$0xff] }
 0x4ef   : > { %v3707_v2 = vpop.f32.mrf.mxu2 }
 0x4f0   : > { %5800 = vst [vmem:[#allocation5 + $0x8] sm:$0xff] %v5683_v43   ;;  %v3708_v47 = vadd.f32 %v3707_v2, %v3382_v11  ;;  %v3796_v37 = vpop.f32.mrf.mxu3  ;;  %v3388_v43 = vld [vmem:[#allocation4 + $0xd0] sm:$0xff] }
 0x4f1   : > { %v3670_v45 = vpop.f32.mrf.mxu0 }
 0x4f2   : > { %v3797_v48 = vadd.f32 %v3796_v37, %v3708_v47  ;;  %v3759_v38 = vpop.f32.mrf.mxu1  ;;  %v3671_v54 = vadd.f32 %v3670_v45, %v3367_v10 }
 0x4f4   : > { %v5723_v59 = vpack.c.bf16 %v3797_v48, %v3795_v33  ;;  %v3760_v3 = vadd.f32 %v3759_v38, %v3671_v54 }
 0x4f6   : > { %5808 = vst [vmem:[#allocation5 + $0x40] sm:$0xff] %v5723_v59  }
 0x4f7   : > { %v3710_v14 = vpop.f32.mrf.mxu2 }
 0x4f8   : > { %v3799_v23 = vpop.f32.mrf.mxu3  ;;  %v3711_v62 = vadd.f32 %v3710_v14, %v3383_v21 }
 0x4f9   : > { %v3672_v36 = vpop.f32.mrf.mxu0 }
 0x4fa   : > { %v3673_v9 = vadd.f32 %v3672_v36, %v3368_v25  ;;  %v3761_v30 = vpop.f32.mrf.mxu1  ;;  %v3800_v5 = vadd.f32 %v3799_v23, %v3711_v62  ;;  %v3373_v25 = vld [vmem:[#allocation4 + $0x88] sm:$0xff] }
 0x4fb   : > { %v3374_v23 = vld [vmem:[#allocation4 + $0x28] sm:$0xff] }
 0x4fc   : > { %v3762_v63 = vadd.f32 %v3761_v30, %v3673_v9 }
 0x4fe   : > { %v5688_v51 = vpack.c.bf16 %v3762_v63, %v3760_v3  ;;  %v3389_v63 = vld [vmem:[#allocation4 + $0xe8] sm:$0xff] }
 0x4ff   : > { %v3712_v15 = vpop.f32.mrf.mxu2 }
 0x500   : > { %5801 = vst [vmem:[#allocation5 + $0x28] sm:$0xff] %v5688_v51   ;;  %v3713_v20 = vadd.f32 %v3712_v15, %v3384_v8  ;;  %v3801_v58 = vpop.f32.mrf.mxu3  ;;  %v3390_v51 = vld [vmem:[#allocation4 + $0x60] sm:$0xff] }
 0x501   : > { %v3675_v28 = vpop.f32.mrf.mxu0 }
 0x502   : > { %v3802_v26 = vadd.f32 %v3801_v58, %v3713_v20  ;;  %v3764_v1 = vpop.f32.mrf.mxu1  ;;  %v3676_v61 = vadd.f32 %v3675_v28, %v3369_v18 }
 0x504   : > { %v5728_v44 = vpack.c.bf16 %v3802_v26, %v3800_v5  ;;  %v3765_v32 = vadd.f32 %v3764_v1, %v3676_v61 }
 0x506   : > { %5809 = vst [vmem:[#allocation5] sm:$0xff] %v5728_v44  }
 0x507   : > { %v3715_v41 = vpop.f32.mrf.mxu2 }
 0x508   : > { %v3804_v19 = vpop.f32.mrf.mxu3  ;;  %v3716_v12 = vadd.f32 %v3715_v41, %v3385_v4 }
 0x509   : > { %v3677_v52 = vpop.f32.mrf.mxu0 }
 0x50a   : > { %v3678_v27 = vadd.f32 %v3677_v52, %v3370_v56  ;;  %v3766_v55 = vpop.f32.mrf.mxu1  ;;  %v3805_v60 = vadd.f32 %v3804_v19, %v3716_v12  ;;  %v3375_v56 = vld [vmem:[#allocation4 + $0xb8] sm:$0xff]  ;;  %v3376_v19 = vld [vmem:[#allocation4 + $0x90] sm:$0xff] }
 0x50c   : > { %v3767_v6 = vadd.f32 %v3766_v55, %v3678_v27 }
 0x50e   : > { %v5693_v53 = vpack.c.bf16 %v3767_v6, %v3765_v32  ;;  %v3391_v6 = vld [vmem:[#allocation4 + $0xb0] sm:$0xff] }
 0x50f   : > { %v3717_v35 = vpop.f32.mrf.mxu2 }
 0x510   : > { %5802 = vst [vmem:[#allocation5 + $0x30] sm:$0xff] %v5693_v53   ;;  %v3718_v39 = vadd.f32 %v3717_v35, %v3386_v16  ;;  %v3806_v0 = vpop.f32.mrf.mxu3  ;;  %v3392_v53 = vld [vmem:[#allocation4 + $0x58] sm:$0xff] }
 0x511   : > { %v3680_v46 = vpop.f32.mrf.mxu0 }
 0x512   : > { %v3807_v24 = vadd.f32 %v3806_v0, %v3718_v39  ;;  %v3769_v13 = vpop.f32.mrf.mxu1  ;;  %v3681_v34 = vadd.f32 %v3680_v46, %v3371_v17 }
 0x514   : > { %v5733_v49 = vpack.c.bf16 %v3807_v24, %v3805_v60  ;;  %v3770_v11 = vadd.f32 %v3769_v13, %v3681_v34 }
 0x516   : > { %5810 = vst [vmem:[#allocation5 + $0x38] sm:$0xff] %v5733_v49  }
 0x517   : > { %v3720_v57 = vpop.f32.mrf.mxu2 }
 0x518   : > { %v3809_v29 = vpop.f32.mrf.mxu3  ;;  %v3721_v2 = vadd.f32 %v3720_v57, %v3387_v50 }
 0x519   : > { %v3682_v40 = vpop.f32.mrf.mxu0 }
 0x51a   : > { %v3683_v22 = vadd.f32 %v3682_v40, %v3372_v7  ;;  %v3771_v31 = vpop.f32.mrf.mxu1  ;;  %v3810_v38 = vadd.f32 %v3809_v29, %v3721_v2  ;;  %v3377_v7 = vld [vmem:[#allocation4 + $0xe0] sm:$0xff]  ;;  %v3378_v29 = vld [vmem:[#allocation4 + $0x30] sm:$0xff] }
 0x51c   : > { %v3772_v42 = vadd.f32 %v3771_v31, %v3683_v22 }
 0x51e   : > { %v5698_v47 = vpack.c.bf16 %v3772_v42, %v3770_v11  ;;  %v3393_v11 = vld [vmem:[#allocation4 + $0x98] sm:$0xff] }
 0x51f   : > { %v3722_v37 = vpop.f32.mrf.mxu2 }
 0x520   : > { %5803 = vst [vmem:[#allocation5 + $0x50] sm:$0xff] %v5698_v47   ;;  %v3723_v45 = vadd.f32 %v3722_v37, %v3388_v43  ;;  %v3811_v33 = vpop.f32.mrf.mxu3  ;;  %v3394_v47 = vld [vmem:[#allocation4 + $0x78] sm:$0xff] }
 0x521   : > { %v3685_v48 = vpop.f32.mrf.mxu0 }
 0x522   : > { %v3812_v59 = vadd.f32 %v3811_v33, %v3723_v45  ;;  %v3774_v10 = vpop.f32.mrf.mxu1  ;;  %v3686_v36 = vadd.f32 %v3685_v48, %v3373_v25 }
 0x524   : > { %v5738_v14 = vpack.c.bf16 %v3812_v59, %v3810_v38  ;;  %v3775_v8 = vadd.f32 %v3774_v10, %v3686_v36 }
 0x526   : > { %5811 = vst [vmem:[#allocation5 + $0x70] sm:$0xff] %v5738_v14  }
 0x527   : > { %v3725_v54 = vpop.f32.mrf.mxu2 }
 0x528   : > { %v3814_v9 = vpop.f32.mrf.mxu3  ;;  %v3726_v15 = vadd.f32 %v3725_v54, %v3389_v63 }
 0x529   : > { %v3687_v30 = vpop.f32.mrf.mxu0 }
 0x52a   : > { %v3688_v21 = vadd.f32 %v3687_v30, %v3374_v23  ;;  %v3776_v3 = vpop.f32.mrf.mxu1  ;;  %v3815_v1 = vadd.f32 %v3814_v9, %v3726_v15 }
 0x52c   : > { %v3777_v62 = vadd.f32 %v3776_v3, %v3688_v21 }
 0x52e   : > { %v5703_v20 = vpack.c.bf16 %v3777_v62, %v3775_v8 }
 0x52f   : > { %v3727_v58 = vpop.f32.mrf.mxu2 }
 0x530   : > { %5804 = vst [vmem:[#allocation5 + $0x60] sm:$0xff] %v5703_v20   ;;  %v3728_v28 = vadd.f32 %v3727_v58, %v3390_v51  ;;  %v3816_v5 = vpop.f32.mrf.mxu3 }
 0x531   : > { %v3690_v26 = vpop.f32.mrf.mxu0 }
 0x532   : > { %v3817_v44 = vadd.f32 %v3816_v5, %v3728_v28  ;;  %v3779_v18 = vpop.f32.mrf.mxu1  ;;  %v3691_v52 = vadd.f32 %v3690_v26, %v3375_v56 }
 0x534   : > { %v5743_v41 = vpack.c.bf16 %v3817_v44, %v3815_v1  ;;  %v3780_v16 = vadd.f32 %v3779_v18, %v3691_v52 }
 0x536   : > { %5812 = vst [vmem:[#allocation5 + $0x78] sm:$0xff] %v5743_v41  }
 0x537   : > { %v3730_v61 = vpop.f32.mrf.mxu2 }
 0x538   : > { %v3819_v27 = vpop.f32.mrf.mxu3  ;;  %v3731_v35 = vadd.f32 %v3730_v61, %v3391_v6 }
 0x539   : > { %v3692_v55 = vpop.f32.mrf.mxu0 }
 0x53a   : > { %v3693_v4 = vadd.f32 %v3692_v55, %v3376_v19  ;;  %v3781_v32 = vpop.f32.mrf.mxu1  ;;  %v3820_v13 = vadd.f32 %v3819_v27, %v3731_v35 }
 0x53c   : > { %v3782_v12 = vadd.f32 %v3781_v32, %v3693_v4 }
 0x53e   : > { %v5708_v39 = vpack.c.bf16 %v3782_v12, %v3780_v16 }
 0x53f   : > { %v3732_v0 = vpop.f32.mrf.mxu2 }
 0x540   : > { %5805 = vst [vmem:[#allocation5 + $0x10] sm:$0xff] %v5708_v39   ;;  %v3733_v46 = vadd.f32 %v3732_v0, %v3392_v53  ;;  %v3821_v60 = vpop.f32.mrf.mxu3 }
 0x541   : > { %v3695_v24 = vpop.f32.mrf.mxu0 }
 0x542   : > { %v3822_v49 = vadd.f32 %v3821_v60, %v3733_v46  ;;  %v3784_v17 = vpop.f32.mrf.mxu1  ;;  %v3696_v40 = vadd.f32 %v3695_v24, %v3377_v7 }
 0x544   : > { %v5748_v57 = vpack.c.bf16 %v3822_v49, %v3820_v13  ;;  %v3785_v43 = vadd.f32 %v3784_v17, %v3696_v40 }
 0x546   : > { %5813 = vst [vmem:[#allocation5 + $0x18] sm:$0xff] %v5748_v57  }
 0x547   : > { %v3735_v34 = vpop.f32.mrf.mxu2 }
 0x548   : > { %v3824_v22 = vpop.f32.mrf.mxu3  ;;  %v3736_v37 = vadd.f32 %v3735_v34, %v3393_v11 }
 0x549   : > { %v3697_v31 = vpop.f32.mrf.mxu0 }
 0x54a   : > { %v3698_v50 = vadd.f32 %v3697_v31, %v3378_v29  ;;  %v3786_v42 = vpop.f32.mrf.mxu1  ;;  %v3825_v59 = vadd.f32 %v3824_v22, %v3736_v37 }
 0x54c   : > { %v3787_v2 = vadd.f32 %v3786_v42, %v3698_v50 }
 0x54e   : > { %v5713_v45 = vpack.c.bf16 %v3787_v2, %v3785_v43 }
 0x54f   : > { %v3737_v33 = vpop.f32.mrf.mxu2 }
 0x550   : > { %5806 = vst [vmem:[#allocation5 + $0x48] sm:$0xff] %v5713_v45   ;;  %v3738_v48 = vadd.f32 %v3737_v33, %v3394_v47  ;;  %v3826_v38 = vpop.f32.mrf.mxu3 }
 0x552   : > { %v3827_v10 = vadd.f32 %v3826_v38, %v3738_v48 }
 0x554   : > { %v5753_v14 = vpack.c.bf16 %v3827_v10, %v3825_v59 }
 0x556   : > { %5814 = vst [vmem:[#allocation5 + $0x68] sm:$0xff] %v5753_v14  }
 0x557 PF: > { %p3897_p2 = scmp.eq.s32.totalorder %s6087_s27, 10 }
 0x558   : > { %v5418_v25 = vld [vmem:[#allocation5 + $0x48] sm:$0xff] (%p3897_p2)  ;;  %v5417_v23 = vld [vmem:[#allocation5 + $0x10] sm:$0xff] (%p3897_p2)  ;;  %v5425_v36 = vld [vmem:[#allocation5 + $0x18] sm:$0xff] (%p3897_p2) }
 0x559   : > { %3901 = sbr.rel (!%p3897_p2) target bundleno = 1675 (0x68b), region = 84  ;;  %4037 = vmatpush.bf16.msra.mxu0 (%p3897_p2), %v5418_v25  ;;  %v3934_v9 = vld [vmem:[%s7400_s3] sm:$0xf] (%p3897_p2)  ;;  %v5416_v21 = vld [vmem:[#allocation5 + $0x60] sm:$0xff] (%p3897_p2)  ;;  %v5433_v63 = vld [vmem:[#allocation12 + $0x30] sm:$0xff] (%p3897_p2) }
 0x55a   : > { %v5434_v30 = vld [vmem:[#allocation12 + $0x38] sm:$0xff] (%p3897_p2)  ;;  %3936 = vst [vmem:[#allocation1] ss:$4 sm:$0xff] (%p3897_p2), %v3934_v9  ;;  %v5415_v8 = vld [vmem:[#allocation5 + $0x50] sm:$0xff] (%p3897_p2)  ;;  %v5432_v51 = vld [vmem:[#allocation12 + $0x28] sm:$0xff] (%p3897_p2) }
 0x55b   : > { %v5424_v3 = vld [vmem:[#allocation5 + $0x78] sm:$0xff] (%p3897_p2)  ;;  %4132 = vmatpush.bf16.msra.mxu2 (%p3897_p2), %v5434_v30  ;;  %v5423_v62 = vld [vmem:[#allocation5 + $0x70] sm:$0xff] (%p3897_p2)  ;;  %v5431_v58 = vld [vmem:[#allocation12 + $0x20] sm:$0xff] (%p3897_p2) }
 0x55c   : > { %v5414_v15 = vld [vmem:[#allocation5 + $0x30] sm:$0xff] (%p3897_p2)  ;;  %v5422_v20 = vld [vmem:[#allocation5 + $0x38] sm:$0xff] (%p3897_p2)  ;;  %v5413_v28 = vld [vmem:[#allocation5 + $0x28] sm:$0xff] (%p3897_p2) }
 0x55d   : > { %v5426_v54 = vld [vmem:[#allocation5 + $0x68] sm:$0xff] (%p3897_p2)  ;;  %4038 = vmatpush.bf16.msra.mxu0 (%p3897_p2), %v5417_v23  ;;  %v5421_v5 = vld [vmem:[#allocation5] sm:$0xff] (%p3897_p2)  ;;  %v5430_v26 = vld [vmem:[#allocation12 + $0x18] sm:$0xff] (%p3897_p2) }
 0x55e   : > { %4050 = vmatpush.bf16.msra.mxu1 %v5426_v54  ;;  %v5412_v1 = vld [vmem:[#allocation5 + $0x8] sm:$0xff]  ;;  %v5420_v44 = vld [vmem:[#allocation5 + $0x40] sm:$0xff]  ;;  %v5429_v18 = vld [vmem:[#allocation12 + $0x10] sm:$0xff] }
 0x55f   : > { %4133 = vmatpush.bf16.msra.mxu2 %v5433_v63  ;;  %v5411_v41 = vld [vmem:[#allocation5 + $0x20] sm:$0xff]  ;;  %v5419_v56 = vld [vmem:[#allocation5 + $0x58] sm:$0xff]  ;;  %v5428_v61 = vld [vmem:[#allocation12 + $0x8] sm:$0xff] }
 0x560   : > { %v5427_v27 = vld [vmem:[#allocation12] sm:$0xff]  ;;  %v5942_v53 = vld [vmem:[%s7404_s7] ss:$0 sm:$0xff] }
 0x561   : > { %4039 = vmatpush.bf16.msra.mxu0 %v5416_v21  ;;  %v3937_v19 = vld.sshfl [vmem:[#allocation1] sm:$0xff pattern:$0x73625140]  ;;  %v3938_v52 = vld.sshfl [vmem:[#allocation1 + $0x8] sm:$0xff pattern:$0x73625140] }
 0x562   : > { %4051 = vmatpush.bf16.msra.mxu1 %v5425_v36 }
 0x563   : > { %4134 = vmatpush.bf16.msra.mxu2 %v5432_v51 }
 0x565   : > { %4040 = vmatpush.bf16.msra.mxu0 %v5415_v8 }
 0x566   : > { %4052 = vmatpush.bf16.msra.mxu1 %v5424_v3 }
 0x567   : > { %4135 = vmatpush.bf16.msra.mxu2 %v5431_v58 }
 0x569   : > { %4041 = vmatpush.bf16.msra.mxu0 %v5414_v15 }
 0x56a   : > { %4053 = vmatpush.bf16.msra.mxu1 %v5423_v62 }
 0x56b   : > { %4136 = vmatpush.bf16.msra.mxu2 %v5430_v26 }
 0x56d   : > { %4042 = vmatpush.bf16.msra.mxu0 %v5413_v28 }
 0x56e   : > { %4054 = vmatpush.bf16.msra.mxu1 %v5422_v20 }
 0x56f   : > { %4137 = vmatpush.bf16.msra.mxu2 %v5429_v18 }
 0x571   : > { %4043 = vmatpush.bf16.msra.mxu0 %v5412_v1 }
 0x572   : > { %4055 = vmatpush.bf16.msra.mxu1 %v5421_v5 }
 0x573   : > { %4138 = vmatpush.bf16.msra.mxu2 %v5428_v61 }
 0x575   : > { %4044 = vmatpush.bf16.msra.mxu0 %v5411_v41 }
 0x576   : > { %4056 = vmatpush.bf16.msra.mxu1 %v5420_v44 }
 0x577   : > { %4139 = vmatpush.bf16.msra.mxu2 %v5427_v27 }
 0x578   : > { %4045 = vmatmul.bf16.vlgmr.msra.gmra.mxu0 %v3937_v19 }
 0x57a   : > { %4057 = vmatpush.bf16.msra.mxu1 %v5419_v56 }
 0x57d   : > { %4058 = vmatmul.bf16.vlgmr.msra.gmra.mxu1 %v3938_v52 }
 0x5f5   : > { %v4046_v55 = vpop.f32.mrf.mxu0 }
 0x5fa   : > { %v4059_v4 = vpop.f32.mrf.mxu1 }
 0x5fb   : > { %v4060_v32 = vadd.f32 %v4059_v4, %v4046_v55 }
 0x5fd   : > { %v4063_v6 = vpack.c.bf16 %v4060_v32, %v4060_v32  ;;  %v4048_v16 = vpop.f32.mrf.mxu0 }
 0x5ff   : > { %4140 = vmatmul.bf16.vlgmr.msra.gmra.mxu2 %v4063_v6 }
 0x602   : > { %v4061_v12 = vpop.f32.mrf.mxu1 }
 0x682   : > { %v4141_v35 = vpop.f32.mrf.mxu2 }
 0x683   : > { %v4142_v39 = vadd.f32 %v5942_v53, %v4141_v35 }
 0x685   : > { %4145 = vst [vmem:[#allocation13] sm:$0xf] %v4142_v39 }
 0x68a   : > { %v4143_v0 = vpop.f32.mrf.mxu2 }
 0x68b PF: > { %p5895_p3 = scmp.eq.s32.totalorder %s4253_s30, 10  ;;  %s4154_s19 = sshll.u32 %s7405_s8, 4  ;;  %s4155_s19 = int_to_ptr.hbm [resolvable:$true] %s4154_s19 }
 0x68c   : > { %s6107_s20 = smov [#allocation13]  }
 0x68d   : > { %s4152_s21 = sshll.u32 %s6107_s20, 4  ;;  %s4153_s21 = int_to_ptr.vmem [resolvable:$true] %s4152_s21 }
 0x68e   : > { %5876 = dma.vmem_to_hbm [thread:$0]  (%p5895_p3), %s4153_s21, 64, %s4155_s19, [#allocation9]  }
 0x68f   : > { %6082 = dma.done.wait (%p5895_p3), [#allocation9], 64  }
 0x690   : > { %6084 = vsyncadd (%p5895_p3), [#allocation9], 4294967232 }
 0x691 PF: > { %s21_s29 = sadd.s32 1, %s6095_s29   ;;  %s7419_s27 = smov %s6091_s28 }
 0x692   : > { %p18_p4 = scmp.ge.s32.totalorder %s21_s29, 13   ;;  %s7420_s28 = smov %s7422_s17 }
 0x694   :  { %20 = sbr.rel (!%p18_p4) target bundleno = 4 (0x4), region = 120 }
 0x699   :  { %4168 = vsyncpa [#allocation8], 1 }
 0x69a   :  { %4170 = vsyncpa [#allocation8 + $0x1], 1 }
 0x69b   :  { %4171 = vsyncpa [#allocation11], 1 }
 0x69c   :  { %4172 = vsyncpa [#allocation9], 1 }
 0x69d   :  { %4174 = vsyncpa [#allocation9 + $0x1], 1 }

</bundles_post_ra>
